<compile_context>
chip_gen: v7x
topology: tpu7x:2x2x1
jax: 0.10.0
libtpu: 0.0.40
codegen_flags: <defaults>
</compile_context>

<pallas_src>
import functools

import jax
import jax.numpy as jnp
from jax.experimental import pallas as pl
from jax.experimental.pallas import tpu as pltpu


C1_OUT, C1_K, C1_STRIDE = 32, 7, 5
C2_OUT, C2_K, C2_STRIDE = 64, 5, 5
K2 = C2_K * C2_K                       # 25 conv2 kernel positions
OUT_PAD = 128                          # pad tiny (N, 2) logits to 128 lanes


def _conv_out(n, k, s):
    return (n - k) // s + 1


def _round_up(x, m):
    return ((x + m - 1) // m) * m


# ---------------------------------------------------------------------------
# Fused forward kernel. One grid step = one batch tile of B samples.
# p1_ref holds conv1 im2col patches for the tile, rows ordered (m, p2, b):
#   m  = conv2 kernel position i*5+j        (25 values)
#   p2 = conv2 output position ho2*W2+wo2   (P2 values)
#   b  = sample within the batch tile       (B values, B % 8 == 0)
# so every conv2 m-block and every linear p2-block is a contiguous,
# 8-sublane-aligned row range (free static slice, no relayout).
# ---------------------------------------------------------------------------
def _fused_forward_kernel(p1_ref, w1_ref, b1_ref, w2_ref, b2_ref, w3_ref, b3_ref,
                          o_ref, *, b_tile, p2_count):
    rows_m = p2_count * b_tile                       # rows per conv2 kernel position

    # conv1: (25*P2*B, 56) @ (56, 32), f32 accumulate on the MXU.
    patches1 = p1_ref[0]                             # (25*P2*B, 56) bf16
    pre1 = jnp.dot(patches1, w1_ref[...], preferred_element_type=jnp.float32)
    act1 = jnp.maximum(pre1 + b1_ref[...], 0.0)      # f32 elementwise (v5e-safe)
    act1 = act1.astype(jnp.bfloat16)                 # bf16 only at the dots

    # conv2: 25 accumulating matmuls (P2*B, 32) @ (32, 64) over contiguous,
    # 8-aligned row blocks of act1.
    pre2 = jnp.dot(act1[0:rows_m, :], w2_ref[0], preferred_element_type=jnp.float32)
    for m in range(1, K2):                           # unrolled, static slices
        blk = act1[m * rows_m:(m + 1) * rows_m, :]
        pre2 = pre2 + jnp.dot(blk, w2_ref[m], preferred_element_type=jnp.float32)
    act2 = jnp.maximum(pre2 + b2_ref[...], 0.0)      # (P2*B, 64), rows (p2, b)
    act2 = act2.astype(jnp.bfloat16)

    # linear: P2 accumulating matmuls (B, 64) @ (64, 128) -> (B, 128) logits.
    acc = jnp.dot(act2[0:b_tile, :], w3_ref[0], preferred_element_type=jnp.float32)
    for p in range(1, p2_count):                     # unrolled, static slices
        blk = act2[p * b_tile:(p + 1) * b_tile, :]
        acc = acc + jnp.dot(blk, w3_ref[p], preferred_element_type=jnp.float32)
    y = acc + b3_ref[...]                            # broadcast bias add

    # sigmoid = 1 / (1 + exp(-y)); exp and approx reciprocal both use the EUP slot.
    o_ref[...] = pl.reciprocal(1.0 + jnp.exp(-y), approx=True).astype(o_ref.dtype)


# ---------------------------------------------------------------------------
# Host-side (XLA) glue: conv1 im2col from the raw (bf16) NCHW input, rows
# ordered (tile, m, p2, b), contraction dim padded 49 -> 56.
# TODO(synk): the strided 7x7 patch gather of the raw input stays as XLA glue
# feeding the fused kernel; it has no beneficial Pallas equivalent here.
# ---------------------------------------------------------------------------
def _conv1_patches(x_bf16, h2, w2s, b_tile):
    n = x_bf16.shape[0]                              # already padded to b_tile mult
    k1 = C1_K * C1_K                                 # Cin=1 -> 49
    k1p = _round_up(k1, 8)
    rows, cols = C2_K * h2, C2_K * w2s               # conv1 positions actually used
    taps = []
    for a in range(C1_K):
        for b in range(C1_K):
            sl = x_bf16[:, 0,
                        a:a + C1_STRIDE * (rows - 1) + 1:C1_STRIDE,
                        b:b + C1_STRIDE * (cols - 1) + 1:C1_STRIDE]  # (N, rows, cols)
            taps.append(sl)
    p = jnp.stack(taps, axis=-1)                     # (N, rows, cols, 49), k = a*7+b
    p = p.reshape(n, h2, C2_K, w2s, C2_K, k1)        # (N, ho2, i, wo2, j, k)
    p = p.transpose(2, 4, 1, 3, 0, 5)                # (i, j, ho2, wo2, N, k)
    nt = n // b_tile
    p = p.reshape(K2, h2 * w2s, nt, b_tile, k1)      # (m, p2, tile, b, k)
    p = p.transpose(2, 0, 1, 3, 4)                   # (tile, m, p2, b, k)
    p = p.reshape(nt, K2 * h2 * w2s * b_tile, k1)
    return jnp.pad(p, ((0, 0), (0, 0), (0, k1p - k1)))   # stays bf16


# ---------------------------------------------------------------------------
# One-time host-side weight re-layout (PyTorch layouts -> kernel layouts).
# ---------------------------------------------------------------------------
def prepare_params(params, size, width=100):
    h1, w1s = _conv_out(size, C1_K, C1_STRIDE), _conv_out(width, C1_K, C1_STRIDE)
    h2, w2s = _conv_out(h1, C2_K, C2_STRIDE), _conv_out(w1s, C2_K, C2_STRIDE)
    p2 = h2 * w2s
    k1 = C1_K * C1_K
    k1p = _round_up(k1, 8)
    out_dim = params["w3"].shape[0]

    # conv1: (32, 1, 7, 7) -> (49, 32) -> pad K to 56
    w1p = params["w1"].reshape(C1_OUT, k1).T
    w1p = jnp.pad(w1p, ((0, k1p - k1), (0, 0))).astype(jnp.bfloat16)
    b1 = params["b1"].reshape(1, C1_OUT).astype(jnp.float32)

    # conv2: (64, 32, 5, 5) -> (i, j, ci, co) -> (25, 32, 64)
    w2p = params["w2"].transpose(2, 3, 1, 0).reshape(K2, C1_OUT, C2_OUT)
    w2p = w2p.astype(jnp.bfloat16)
    b2 = params["b2"].reshape(1, C2_OUT).astype(jnp.float32)

    # linear: (out, 64*P2) with columns ordered (co, p2) -> (p2, 64, out_pad)
    w3p = params["w3"].reshape(out_dim, C2_OUT, p2).transpose(2, 1, 0)
    w3p = jnp.pad(w3p, ((0, 0), (0, 0), (0, OUT_PAD - out_dim))).astype(jnp.bfloat16)
    b3 = jnp.pad(params["b3"], (0, OUT_PAD - out_dim)).reshape(1, OUT_PAD)
    b3 = b3.astype(jnp.float32)

    return {"w1p": w1p, "b1": b1, "w2p": w2p, "b2": b2, "w3p": w3p, "b3": b3}


# ---------------------------------------------------------------------------
# Forward pass: one fused pallas_call, grid over batch tiles ("parallel").
# ---------------------------------------------------------------------------
def network_forward(prep, x, *, out_dim, batch_tile=128):
    n, _, hh, ww = x.shape
    h1, w1s = _conv_out(hh, C1_K, C1_STRIDE), _conv_out(ww, C1_K, C1_STRIDE)
    h2, w2s = _conv_out(h1, C2_K, C2_STRIDE), _conv_out(w1s, C2_K, C2_STRIDE)
    p2 = h2 * w2s
    k1p = prep["w1p"].shape[0]
    assert prep["w3p"].shape[0] == p2, "prepared params built for a different size"

    # Batch tile: multiple of 8 (sublane alignment of every in-kernel slice and of
    # the (B, 128) output store). Aim for >= 2 tiles so both v7x TCs get work.
    n8 = _round_up(n, 8)
    if n8 <= 8:
        b_tile = 8
    else:
        b_tile = max(8, min(batch_tile, _round_up(pl.cdiv(n8, 2), 8), n8))
    n_pad = _round_up(n, b_tile)
    nt = n_pad // b_tile
    r1 = K2 * p2 * b_tile

    # bf16 before the gather/transpose halves the im2col's intermediate traffic.
    xb = x.astype(jnp.bfloat16)
    if n_pad != n:
        xb = jnp.pad(xb, ((0, n_pad - n), (0, 0), (0, 0), (0, 0)))
    patches1 = _conv1_patches(xb, h2, w2s, b_tile)   # (nt, 25*P2*B, 56) bf16

    flops = 2 * n_pad * (K2 * p2 * k1p * C1_OUT
                         + K2 * p2 * C1_OUT * C2_OUT
                         + p2 * C2_OUT * OUT_PAD)
    bytes_accessed = (patches1.size * 2
                      + (prep["w1p"].size + prep["w2p"].size + prep["w3p"].size) * 2
                      + (prep["b1"].size + prep["b2"].size + prep["b3"].size) * 4
                      + n_pad * OUT_PAD * 4)

    kernel = functools.partial(_fused_forward_kernel, b_tile=b_tile, p2_count=p2)
    out_padded = pl.pallas_call(
        kernel,
        out_shape=jax.ShapeDtypeStruct((n_pad, OUT_PAD), jnp.float32),
        grid_spec=pltpu.PrefetchScalarGridSpec(
            num_scalar_prefetch=0,
            grid=(nt,),
            in_specs=[
                pl.BlockSpec((1, r1, k1p), lambda t: (t, 0, 0)),            # patches
                pl.BlockSpec((k1p, C1_OUT), lambda t: (0, 0)),              # w1
                pl.BlockSpec((1, C1_OUT), lambda t: (0, 0)),                # b1
                pl.BlockSpec((K2, C1_OUT, C2_OUT), lambda t: (0, 0, 0)),    # w2
                pl.BlockSpec((1, C2_OUT), lambda t: (0, 0)),                # b2
                pl.BlockSpec((p2, C2_OUT, OUT_PAD), lambda t: (0, 0, 0)),   # w3
                pl.BlockSpec((1, OUT_PAD), lambda t: (0, 0)),               # b3
            ],
            out_specs=pl.BlockSpec((b_tile, OUT_PAD), lambda t: (t, 0)),
        ),
        compiler_params=pltpu.CompilerParams(
            dimension_semantics=("parallel",),
            vmem_limit_bytes=48 * 1024 * 1024),
        cost_estimate=pl.CostEstimate(
            flops=flops,
            transcendentals=2 * n_pad * OUT_PAD,
            bytes_accessed=bytes_accessed),
    )(patches1, prep["w1p"], prep["b1"], prep["w2p"], prep["b2"],
      prep["w3p"], prep["b3"])

    return out_padded[:n, :out_dim]


# ---------------------------------------------------------------------------
# Pure-XLA f32 reference (for tolerance checking) and deterministic init
# matching PyTorch defaults (uniform +/- 1/sqrt(fan_in)).
# ---------------------------------------------------------------------------
def _reference_forward(params, x):
    out = jax.lax.conv_general_dilated(
        x, params["w1"], window_strides=(C1_STRIDE, C1_STRIDE), padding="VALID",
        dimension_numbers=("NCHW", "OIHW", "NCHW"))
    out = jnp.maximum(out + params["b1"][None, :, None, None], 0.0)
    out = jax.lax.conv_general_dilated(
        out, params["w2"], window_strides=(C2_STRIDE, C2_STRIDE), padding="VALID",
        dimension_numbers=("NCHW", "OIHW", "NCHW"))
    out = jnp.maximum(out + params["b2"][None, :, None, None], 0.0)
    out = out.reshape(out.shape[0], -1)
    return jax.nn.sigmoid(out @ params["w3"].T + params["b3"])


def init_params(key, size, width=100, output_dim=2):
    def uniform(k, shape, fan_in):
        bound = 1.0 / jnp.sqrt(jnp.float32(fan_in))
        return jax.random.uniform(k, shape, jnp.float32, -bound, bound)

    h1 = _conv_out(size, C1_K, C1_STRIDE)
    w1 = _conv_out(width, C1_K, C1_STRIDE)
    h2 = _conv_out(h1, C2_K, C2_STRIDE)
    w2 = _conv_out(w1, C2_K, C2_STRIDE)
    flat_dim = C2_OUT * h2 * w2

    ks = jax.random.split(key, 6)
    return {
        "w1": uniform(ks[0], (C1_OUT, 1, C1_K, C1_K), 1 * C1_K * C1_K),
        "b1": uniform(ks[1], (C1_OUT,), 1 * C1_K * C1_K),
        "w2": uniform(ks[2], (C2_OUT, C1_OUT, C2_K, C2_K), C1_OUT * C2_K * C2_K),
        "b2": uniform(ks[3], (C2_OUT,), C1_OUT * C2_K * C2_K),
        "w3": uniform(ks[4], (output_dim, flat_dim), flat_dim),
        "b3": uniform(ks[5], (output_dim,), flat_dim),
    }


if __name__ == "__main__":
    key = jax.random.PRNGKey(0)
    k_param, k_x = jax.random.split(key)

    # `size` (sentence height) = 32, width fixed at 100 as implied by the dummy
    # input in calculate_conv_sizes. Batch = 20 -> b_tile = 16, 2 grid tiles
    # (exercises batch padding + the multi-tile "parallel" path).
    batch, size, width = 20, 32, 100
    x = jax.random.normal(k_x, (batch, 1, size, width), dtype=jnp.float32)

    params = init_params(k_param, size=size, width=width, output_dim=2)
    prep = prepare_params(params, size=size, width=width)

    fwd = jax.jit(functools.partial(network_forward, out_dim=2))
    out = jax.block_until_ready(fwd(prep, x))

    assert out.shape == (batch, 2)
    assert bool(jnp.all(jnp.isfinite(out)))
    # sigmoid range (small slack: approx reciprocal on the EUP)
    assert bool(jnp.all((out > -1e-3) & (out < 1.0 + 1e-3)))
    # bf16 matmuls + approx-recip sigmoid: close to the f32 reference, not bit-exact.
    ref = _reference_forward(params, x)
    assert bool(jnp.max(jnp.abs(out - ref)) < 5e-2)

    print("KERNEL_OK")
</pallas_src>

<mosaic_0001>
module attributes {stable_mosaic.version = 11 : i64} {
  func.func @_fused_forward_kernel(%arg0: i32, %arg1: memref<1x1200x56xbf16, #tpu.memory_space<vmem>>, %arg2: memref<56x32xbf16, #tpu.memory_space<vmem>>, %arg3: memref<1x32xf32, #tpu.memory_space<vmem>>, %arg4: memref<25x32x64xbf16, #tpu.memory_space<vmem>>, %arg5: memref<1x64xf32, #tpu.memory_space<vmem>>, %arg6: memref<3x64x128xbf16, #tpu.memory_space<vmem>>, %arg7: memref<1x128xf32, #tpu.memory_space<vmem>>, %arg8: memref<16x128xf32, #tpu.memory_space<vmem>>) attributes {dimension_semantics = [#tpu.dimension_semantics<parallel>], iteration_bounds = array<i64: 2>, scalar_prefetch = 0 : i64, scratch_operands = 0 : i64, tpu.core_type = #tpu.core_type<tc>, window_params = [{transform_indices = @transform_0, window_bounds = array<i64: 1, 1200, 56>}, {pipeline_mode = #tpu.pipeline_mode<synchronous>, transform_indices = @transform_1, window_bounds = array<i64: 56, 32>}, {pipeline_mode = #tpu.pipeline_mode<synchronous>, transform_indices = @transform_2, window_bounds = array<i64: 1, 32>}, {pipeline_mode = #tpu.pipeline_mode<synchronous>, transform_indices = @transform_3, window_bounds = array<i64: 25, 32, 64>}, {pipeline_mode = #tpu.pipeline_mode<synchronous>, transform_indices = @transform_4, window_bounds = array<i64: 1, 64>}, {pipeline_mode = #tpu.pipeline_mode<synchronous>, transform_indices = @transform_5, window_bounds = array<i64: 3, 64, 128>}, {pipeline_mode = #tpu.pipeline_mode<synchronous>, transform_indices = @transform_6, window_bounds = array<i64: 1, 128>}, {transform_indices = @transform_7, window_bounds = array<i64: 16, 128>}]} {
    %c0 = arith.constant 0 : index
    %c0_0 = arith.constant 0 : index
    %c0_1 = arith.constant 0 : index
    %0 = vector.load %arg1[%c0, %c0_0, %c0_1] : memref<1x1200x56xbf16, #tpu.memory_space<vmem>>, vector<1x1200x56xbf16>
    %1 = vector.shape_cast %0 : vector<1x1200x56xbf16> to vector<1200x56xbf16>
    %c0_2 = arith.constant 0 : index
    %c0_3 = arith.constant 0 : index
    %2 = vector.load %arg2[%c0_2, %c0_3] : memref<56x32xbf16, #tpu.memory_space<vmem>>, vector<56x32xbf16>
    %cst = arith.constant dense<0.000000e+00> : vector<1200x32xf32>
    %3 = tpu.matmul %1, %2, %cst {dimension_numbers = #tpu.dot_dimension_numbers<[1], [0], [0], [1], [0, 0, 1, 1], [], []>} : vector<1200x56xbf16>, vector<56x32xbf16>, vector<1200x32xf32> -> vector<1200x32xf32>
    %c0_4 = arith.constant 0 : index
    %c0_5 = arith.constant 0 : index
    %4 = vector.load %arg3[%c0_4, %c0_5] : memref<1x32xf32, #tpu.memory_space<vmem>>, vector<1x32xf32>
    %5 = vector.broadcast %4 : vector<1x32xf32> to vector<1200x32xf32>
    %6 = arith.addf %3, %5 : vector<1200x32xf32>
    %cst_6 = arith.constant 0.000000e+00 : f32
    %7 = vector.broadcast %cst_6 : f32 to vector<1200x32xf32>
    %8 = arith.maximumf %6, %7 : vector<1200x32xf32>
    %9 = arith.truncf %8 : vector<1200x32xf32> to vector<1200x32xbf16>
    %10 = vector.extract_strided_slice %9 {offsets = [0, 0], sizes = [48, 32], strides = [1, 1]} : vector<1200x32xbf16> to vector<48x32xbf16>
    %c0_7 = arith.constant 0 : index
    %c0_8 = arith.constant 0 : index
    %c0_9 = arith.constant 0 : index
    %11 = vector.load %arg4[%c0_7, %c0_8, %c0_9] : memref<25x32x64xbf16, #tpu.memory_space<vmem>>, vector<1x32x64xbf16>
    %12 = vector.shape_cast %11 : vector<1x32x64xbf16> to vector<32x64xbf16>
    %cst_10 = arith.constant dense<0.000000e+00> : vector<48x64xf32>
    %13 = tpu.matmul %10, %12, %cst_10 {dimension_numbers = #tpu.dot_dimension_numbers<[1], [0], [0], [1], [0, 0, 1, 1], [], []>} : vector<48x32xbf16>, vector<32x64xbf16>, vector<48x64xf32> -> vector<48x64xf32>
    %14 = vector.extract_strided_slice %9 {offsets = [48, 0], sizes = [48, 32], strides = [1, 1]} : vector<1200x32xbf16> to vector<48x32xbf16>
    %c1 = arith.constant 1 : index
    %c0_11 = arith.constant 0 : index
    %c0_12 = arith.constant 0 : index
    %15 = vector.load %arg4[%c1, %c0_11, %c0_12] : memref<25x32x64xbf16, #tpu.memory_space<vmem>>, vector<1x32x64xbf16>
    %16 = vector.shape_cast %15 : vector<1x32x64xbf16> to vector<32x64xbf16>
    %cst_13 = arith.constant dense<0.000000e+00> : vector<48x64xf32>
    %17 = tpu.matmul %14, %16, %cst_13 {dimension_numbers = #tpu.dot_dimension_numbers<[1], [0], [0], [1], [0, 0, 1, 1], [], []>} : vector<48x32xbf16>, vector<32x64xbf16>, vector<48x64xf32> -> vector<48x64xf32>
    %18 = arith.addf %13, %17 : vector<48x64xf32>
    %19 = vector.extract_strided_slice %9 {offsets = [96, 0], sizes = [48, 32], strides = [1, 1]} : vector<1200x32xbf16> to vector<48x32xbf16>
    %c2 = arith.constant 2 : index
    %c0_14 = arith.constant 0 : index
    %c0_15 = arith.constant 0 : index
    %20 = vector.load %arg4[%c2, %c0_14, %c0_15] : memref<25x32x64xbf16, #tpu.memory_space<vmem>>, vector<1x32x64xbf16>
    %21 = vector.shape_cast %20 : vector<1x32x64xbf16> to vector<32x64xbf16>
    %cst_16 = arith.constant dense<0.000000e+00> : vector<48x64xf32>
    %22 = tpu.matmul %19, %21, %cst_16 {dimension_numbers = #tpu.dot_dimension_numbers<[1], [0], [0], [1], [0, 0, 1, 1], [], []>} : vector<48x32xbf16>, vector<32x64xbf16>, vector<48x64xf32> -> vector<48x64xf32>
    %23 = arith.addf %18, %22 : vector<48x64xf32>
    %24 = vector.extract_strided_slice %9 {offsets = [144, 0], sizes = [48, 32], strides = [1, 1]} : vector<1200x32xbf16> to vector<48x32xbf16>
    %c3 = arith.constant 3 : index
    %c0_17 = arith.constant 0 : index
    %c0_18 = arith.constant 0 : index
    %25 = vector.load %arg4[%c3, %c0_17, %c0_18] : memref<25x32x64xbf16, #tpu.memory_space<vmem>>, vector<1x32x64xbf16>
    %26 = vector.shape_cast %25 : vector<1x32x64xbf16> to vector<32x64xbf16>
    %cst_19 = arith.constant dense<0.000000e+00> : vector<48x64xf32>
    %27 = tpu.matmul %24, %26, %cst_19 {dimension_numbers = #tpu.dot_dimension_numbers<[1], [0], [0], [1], [0, 0, 1, 1], [], []>} : vector<48x32xbf16>, vector<32x64xbf16>, vector<48x64xf32> -> vector<48x64xf32>
    %28 = arith.addf %23, %27 : vector<48x64xf32>
    %29 = vector.extract_strided_slice %9 {offsets = [192, 0], sizes = [48, 32], strides = [1, 1]} : vector<1200x32xbf16> to vector<48x32xbf16>
    %c4 = arith.constant 4 : index
    %c0_20 = arith.constant 0 : index
    %c0_21 = arith.constant 0 : index
    %30 = vector.load %arg4[%c4, %c0_20, %c0_21] : memref<25x32x64xbf16, #tpu.memory_space<vmem>>, vector<1x32x64xbf16>
    %31 = vector.shape_cast %30 : vector<1x32x64xbf16> to vector<32x64xbf16>
    %cst_22 = arith.constant dense<0.000000e+00> : vector<48x64xf32>
    %32 = tpu.matmul %29, %31, %cst_22 {dimension_numbers = #tpu.dot_dimension_numbers<[1], [0], [0], [1], [0, 0, 1, 1], [], []>} : vector<48x32xbf16>, vector<32x64xbf16>, vector<48x64xf32> -> vector<48x64xf32>
    %33 = arith.addf %28, %32 : vector<48x64xf32>
    %34 = vector.extract_strided_slice %9 {offsets = [240, 0], sizes = [48, 32], strides = [1, 1]} : vector<1200x32xbf16> to vector<48x32xbf16>
    %c5 = arith.constant 5 : index
    %c0_23 = arith.constant 0 : index
    %c0_24 = arith.constant 0 : index
    %35 = vector.load %arg4[%c5, %c0_23, %c0_24] : memref<25x32x64xbf16, #tpu.memory_space<vmem>>, vector<1x32x64xbf16>
    %36 = vector.shape_cast %35 : vector<1x32x64xbf16> to vector<32x64xbf16>
    %cst_25 = arith.constant dense<0.000000e+00> : vector<48x64xf32>
    %37 = tpu.matmul %34, %36, %cst_25 {dimension_numbers = #tpu.dot_dimension_numbers<[1], [0], [0], [1], [0, 0, 1, 1], [], []>} : vector<48x32xbf16>, vector<32x64xbf16>, vector<48x64xf32> -> vector<48x64xf32>
    %38 = arith.addf %33, %37 : vector<48x64xf32>
    %39 = vector.extract_strided_slice %9 {offsets = [288, 0], sizes = [48, 32], strides = [1, 1]} : vector<1200x32xbf16> to vector<48x32xbf16>
    %c6 = arith.constant 6 : index
    %c0_26 = arith.constant 0 : index
    %c0_27 = arith.constant 0 : index
    %40 = vector.load %arg4[%c6, %c0_26, %c0_27] : memref<25x32x64xbf16, #tpu.memory_space<vmem>>, vector<1x32x64xbf16>
    %41 = vector.shape_cast %40 : vector<1x32x64xbf16> to vector<32x64xbf16>
    %cst_28 = arith.constant dense<0.000000e+00> : vector<48x64xf32>
    %42 = tpu.matmul %39, %41, %cst_28 {dimension_numbers = #tpu.dot_dimension_numbers<[1], [0], [0], [1], [0, 0, 1, 1], [], []>} : vector<48x32xbf16>, vector<32x64xbf16>, vector<48x64xf32> -> vector<48x64xf32>
    %43 = arith.addf %38, %42 : vector<48x64xf32>
    %44 = vector.extract_strided_slice %9 {offsets = [336, 0], sizes = [48, 32], strides = [1, 1]} : vector<1200x32xbf16> to vector<48x32xbf16>
    %c7 = arith.constant 7 : index
    %c0_29 = arith.constant 0 : index
    %c0_30 = arith.constant 0 : index
    %45 = vector.load %arg4[%c7, %c0_29, %c0_30] : memref<25x32x64xbf16, #tpu.memory_space<vmem>>, vector<1x32x64xbf16>
    %46 = vector.shape_cast %45 : vector<1x32x64xbf16> to vector<32x64xbf16>
    %cst_31 = arith.constant dense<0.000000e+00> : vector<48x64xf32>
    %47 = tpu.matmul %44, %46, %cst_31 {dimension_numbers = #tpu.dot_dimension_numbers<[1], [0], [0], [1], [0, 0, 1, 1], [], []>} : vector<48x32xbf16>, vector<32x64xbf16>, vector<48x64xf32> -> vector<48x64xf32>
    %48 = arith.addf %43, %47 : vector<48x64xf32>
    %49 = vector.extract_strided_slice %9 {offsets = [384, 0], sizes = [48, 32], strides = [1, 1]} : vector<1200x32xbf16> to vector<48x32xbf16>
    %c8 = arith.constant 8 : index
    %c0_32 = arith.constant 0 : index
    %c0_33 = arith.constant 0 : index
    %50 = vector.load %arg4[%c8, %c0_32, %c0_33] : memref<25x32x64xbf16, #tpu.memory_space<vmem>>, vector<1x32x64xbf16>
    %51 = vector.shape_cast %50 : vector<1x32x64xbf16> to vector<32x64xbf16>
    %cst_34 = arith.constant dense<0.000000e+00> : vector<48x64xf32>
    %52 = tpu.matmul %49, %51, %cst_34 {dimension_numbers = #tpu.dot_dimension_numbers<[1], [0], [0], [1], [0, 0, 1, 1], [], []>} : vector<48x32xbf16>, vector<32x64xbf16>, vector<48x64xf32> -> vector<48x64xf32>
    %53 = arith.addf %48, %52 : vector<48x64xf32>
    %54 = vector.extract_strided_slice %9 {offsets = [432, 0], sizes = [48, 32], strides = [1, 1]} : vector<1200x32xbf16> to vector<48x32xbf16>
    %c9 = arith.constant 9 : index
    %c0_35 = arith.constant 0 : index
    %c0_36 = arith.constant 0 : index
    %55 = vector.load %arg4[%c9, %c0_35, %c0_36] : memref<25x32x64xbf16, #tpu.memory_space<vmem>>, vector<1x32x64xbf16>
    %56 = vector.shape_cast %55 : vector<1x32x64xbf16> to vector<32x64xbf16>
    %cst_37 = arith.constant dense<0.000000e+00> : vector<48x64xf32>
    %57 = tpu.matmul %54, %56, %cst_37 {dimension_numbers = #tpu.dot_dimension_numbers<[1], [0], [0], [1], [0, 0, 1, 1], [], []>} : vector<48x32xbf16>, vector<32x64xbf16>, vector<48x64xf32> -> vector<48x64xf32>
    %58 = arith.addf %53, %57 : vector<48x64xf32>
    %59 = vector.extract_strided_slice %9 {offsets = [480, 0], sizes = [48, 32], strides = [1, 1]} : vector<1200x32xbf16> to vector<48x32xbf16>
    %c10 = arith.constant 10 : index
    %c0_38 = arith.constant 0 : index
    %c0_39 = arith.constant 0 : index
    %60 = vector.load %arg4[%c10, %c0_38, %c0_39] : memref<25x32x64xbf16, #tpu.memory_space<vmem>>, vector<1x32x64xbf16>
    %61 = vector.shape_cast %60 : vector<1x32x64xbf16> to vector<32x64xbf16>
    %cst_40 = arith.constant dense<0.000000e+00> : vector<48x64xf32>
    %62 = tpu.matmul %59, %61, %cst_40 {dimension_numbers = #tpu.dot_dimension_numbers<[1], [0], [0], [1], [0, 0, 1, 1], [], []>} : vector<48x32xbf16>, vector<32x64xbf16>, vector<48x64xf32> -> vector<48x64xf32>
    %63 = arith.addf %58, %62 : vector<48x64xf32>
    %64 = vector.extract_strided_slice %9 {offsets = [528, 0], sizes = [48, 32], strides = [1, 1]} : vector<1200x32xbf16> to vector<48x32xbf16>
    %c11 = arith.constant 11 : index
    %c0_41 = arith.constant 0 : index
    %c0_42 = arith.constant 0 : index
    %65 = vector.load %arg4[%c11, %c0_41, %c0_42] : memref<25x32x64xbf16, #tpu.memory_space<vmem>>, vector<1x32x64xbf16>
    %66 = vector.shape_cast %65 : vector<1x32x64xbf16> to vector<32x64xbf16>
    %cst_43 = arith.constant dense<0.000000e+00> : vector<48x64xf32>
    %67 = tpu.matmul %64, %66, %cst_43 {dimension_numbers = #tpu.dot_dimension_numbers<[1], [0], [0], [1], [0, 0, 1, 1], [], []>} : vector<48x32xbf16>, vector<32x64xbf16>, vector<48x64xf32> -> vector<48x64xf32>
    %68 = arith.addf %63, %67 : vector<48x64xf32>
    %69 = vector.extract_strided_slice %9 {offsets = [576, 0], sizes = [48, 32], strides = [1, 1]} : vector<1200x32xbf16> to vector<48x32xbf16>
    %c12 = arith.constant 12 : index
    %c0_44 = arith.constant 0 : index
    %c0_45 = arith.constant 0 : index
    %70 = vector.load %arg4[%c12, %c0_44, %c0_45] : memref<25x32x64xbf16, #tpu.memory_space<vmem>>, vector<1x32x64xbf16>
    %71 = vector.shape_cast %70 : vector<1x32x64xbf16> to vector<32x64xbf16>
    %cst_46 = arith.constant dense<0.000000e+00> : vector<48x64xf32>
    %72 = tpu.matmul %69, %71, %cst_46 {dimension_numbers = #tpu.dot_dimension_numbers<[1], [0], [0], [1], [0, 0, 1, 1], [], []>} : vector<48x32xbf16>, vector<32x64xbf16>, vector<48x64xf32> -> vector<48x64xf32>
    %73 = arith.addf %68, %72 : vector<48x64xf32>
    %74 = vector.extract_strided_slice %9 {offsets = [624, 0], sizes = [48, 32], strides = [1, 1]} : vector<1200x32xbf16> to vector<48x32xbf16>
    %c13 = arith.constant 13 : index
    %c0_47 = arith.constant 0 : index
    %c0_48 = arith.constant 0 : index
    %75 = vector.load %arg4[%c13, %c0_47, %c0_48] : memref<25x32x64xbf16, #tpu.memory_space<vmem>>, vector<1x32x64xbf16>
    %76 = vector.shape_cast %75 : vector<1x32x64xbf16> to vector<32x64xbf16>
    %cst_49 = arith.constant dense<0.000000e+00> : vector<48x64xf32>
    %77 = tpu.matmul %74, %76, %cst_49 {dimension_numbers = #tpu.dot_dimension_numbers<[1], [0], [0], [1], [0, 0, 1, 1], [], []>} : vector<48x32xbf16>, vector<32x64xbf16>, vector<48x64xf32> -> vector<48x64xf32>
    %78 = arith.addf %73, %77 : vector<48x64xf32>
    %79 = vector.extract_strided_slice %9 {offsets = [672, 0], sizes = [48, 32], strides = [1, 1]} : vector<1200x32xbf16> to vector<48x32xbf16>
    %c14 = arith.constant 14 : index
    %c0_50 = arith.constant 0 : index
    %c0_51 = arith.constant 0 : index
    %80 = vector.load %arg4[%c14, %c0_50, %c0_51] : memref<25x32x64xbf16, #tpu.memory_space<vmem>>, vector<1x32x64xbf16>
    %81 = vector.shape_cast %80 : vector<1x32x64xbf16> to vector<32x64xbf16>
    %cst_52 = arith.constant dense<0.000000e+00> : vector<48x64xf32>
    %82 = tpu.matmul %79, %81, %cst_52 {dimension_numbers = #tpu.dot_dimension_numbers<[1], [0], [0], [1], [0, 0, 1, 1], [], []>} : vector<48x32xbf16>, vector<32x64xbf16>, vector<48x64xf32> -> vector<48x64xf32>
    %83 = arith.addf %78, %82 : vector<48x64xf32>
    %84 = vector.extract_strided_slice %9 {offsets = [720, 0], sizes = [48, 32], strides = [1, 1]} : vector<1200x32xbf16> to vector<48x32xbf16>
    %c15 = arith.constant 15 : index
    %c0_53 = arith.constant 0 : index
    %c0_54 = arith.constant 0 : index
    %85 = vector.load %arg4[%c15, %c0_53, %c0_54] : memref<25x32x64xbf16, #tpu.memory_space<vmem>>, vector<1x32x64xbf16>
    %86 = vector.shape_cast %85 : vector<1x32x64xbf16> to vector<32x64xbf16>
    %cst_55 = arith.constant dense<0.000000e+00> : vector<48x64xf32>
    %87 = tpu.matmul %84, %86, %cst_55 {dimension_numbers = #tpu.dot_dimension_numbers<[1], [0], [0], [1], [0, 0, 1, 1], [], []>} : vector<48x32xbf16>, vector<32x64xbf16>, vector<48x64xf32> -> vector<48x64xf32>
    %88 = arith.addf %83, %87 : vector<48x64xf32>
    %89 = vector.extract_strided_slice %9 {offsets = [768, 0], sizes = [48, 32], strides = [1, 1]} : vector<1200x32xbf16> to vector<48x32xbf16>
    %c16 = arith.constant 16 : index
    %c0_56 = arith.constant 0 : index
    %c0_57 = arith.constant 0 : index
    %90 = vector.load %arg4[%c16, %c0_56, %c0_57] : memref<25x32x64xbf16, #tpu.memory_space<vmem>>, vector<1x32x64xbf16>
    %91 = vector.shape_cast %90 : vector<1x32x64xbf16> to vector<32x64xbf16>
    %cst_58 = arith.constant dense<0.000000e+00> : vector<48x64xf32>
    %92 = tpu.matmul %89, %91, %cst_58 {dimension_numbers = #tpu.dot_dimension_numbers<[1], [0], [0], [1], [0, 0, 1, 1], [], []>} : vector<48x32xbf16>, vector<32x64xbf16>, vector<48x64xf32> -> vector<48x64xf32>
    %93 = arith.addf %88, %92 : vector<48x64xf32>
    %94 = vector.extract_strided_slice %9 {offsets = [816, 0], sizes = [48, 32], strides = [1, 1]} : vector<1200x32xbf16> to vector<48x32xbf16>
    %c17 = arith.constant 17 : index
    %c0_59 = arith.constant 0 : index
    %c0_60 = arith.constant 0 : index
    %95 = vector.load %arg4[%c17, %c0_59, %c0_60] : memref<25x32x64xbf16, #tpu.memory_space<vmem>>, vector<1x32x64xbf16>
    %96 = vector.shape_cast %95 : vector<1x32x64xbf16> to vector<32x64xbf16>
    %cst_61 = arith.constant dense<0.000000e+00> : vector<48x64xf32>
    %97 = tpu.matmul %94, %96, %cst_61 {dimension_numbers = #tpu.dot_dimension_numbers<[1], [0], [0], [1], [0, 0, 1, 1], [], []>} : vector<48x32xbf16>, vector<32x64xbf16>, vector<48x64xf32> -> vector<48x64xf32>
    %98 = arith.addf %93, %97 : vector<48x64xf32>
    %99 = vector.extract_strided_slice %9 {offsets = [864, 0], sizes = [48, 32], strides = [1, 1]} : vector<1200x32xbf16> to vector<48x32xbf16>
    %c18 = arith.constant 18 : index
    %c0_62 = arith.constant 0 : index
    %c0_63 = arith.constant 0 : index
    %100 = vector.load %arg4[%c18, %c0_62, %c0_63] : memref<25x32x64xbf16, #tpu.memory_space<vmem>>, vector<1x32x64xbf16>
    %101 = vector.shape_cast %100 : vector<1x32x64xbf16> to vector<32x64xbf16>
    %cst_64 = arith.constant dense<0.000000e+00> : vector<48x64xf32>
    %102 = tpu.matmul %99, %101, %cst_64 {dimension_numbers = #tpu.dot_dimension_numbers<[1], [0], [0], [1], [0, 0, 1, 1], [], []>} : vector<48x32xbf16>, vector<32x64xbf16>, vector<48x64xf32> -> vector<48x64xf32>
    %103 = arith.addf %98, %102 : vector<48x64xf32>
    %104 = vector.extract_strided_slice %9 {offsets = [912, 0], sizes = [48, 32], strides = [1, 1]} : vector<1200x32xbf16> to vector<48x32xbf16>
    %c19 = arith.constant 19 : index
    %c0_65 = arith.constant 0 : index
    %c0_66 = arith.constant 0 : index
    %105 = vector.load %arg4[%c19, %c0_65, %c0_66] : memref<25x32x64xbf16, #tpu.memory_space<vmem>>, vector<1x32x64xbf16>
    %106 = vector.shape_cast %105 : vector<1x32x64xbf16> to vector<32x64xbf16>
    %cst_67 = arith.constant dense<0.000000e+00> : vector<48x64xf32>
    %107 = tpu.matmul %104, %106, %cst_67 {dimension_numbers = #tpu.dot_dimension_numbers<[1], [0], [0], [1], [0, 0, 1, 1], [], []>} : vector<48x32xbf16>, vector<32x64xbf16>, vector<48x64xf32> -> vector<48x64xf32>
    %108 = arith.addf %103, %107 : vector<48x64xf32>
    %109 = vector.extract_strided_slice %9 {offsets = [960, 0], sizes = [48, 32], strides = [1, 1]} : vector<1200x32xbf16> to vector<48x32xbf16>
    %c20 = arith.constant 20 : index
    %c0_68 = arith.constant 0 : index
    %c0_69 = arith.constant 0 : index
    %110 = vector.load %arg4[%c20, %c0_68, %c0_69] : memref<25x32x64xbf16, #tpu.memory_space<vmem>>, vector<1x32x64xbf16>
    %111 = vector.shape_cast %110 : vector<1x32x64xbf16> to vector<32x64xbf16>
    %cst_70 = arith.constant dense<0.000000e+00> : vector<48x64xf32>
    %112 = tpu.matmul %109, %111, %cst_70 {dimension_numbers = #tpu.dot_dimension_numbers<[1], [0], [0], [1], [0, 0, 1, 1], [], []>} : vector<48x32xbf16>, vector<32x64xbf16>, vector<48x64xf32> -> vector<48x64xf32>
    %113 = arith.addf %108, %112 : vector<48x64xf32>
    %114 = vector.extract_strided_slice %9 {offsets = [1008, 0], sizes = [48, 32], strides = [1, 1]} : vector<1200x32xbf16> to vector<48x32xbf16>
    %c21 = arith.constant 21 : index
    %c0_71 = arith.constant 0 : index
    %c0_72 = arith.constant 0 : index
    %115 = vector.load %arg4[%c21, %c0_71, %c0_72] : memref<25x32x64xbf16, #tpu.memory_space<vmem>>, vector<1x32x64xbf16>
    %116 = vector.shape_cast %115 : vector<1x32x64xbf16> to vector<32x64xbf16>
    %cst_73 = arith.constant dense<0.000000e+00> : vector<48x64xf32>
    %117 = tpu.matmul %114, %116, %cst_73 {dimension_numbers = #tpu.dot_dimension_numbers<[1], [0], [0], [1], [0, 0, 1, 1], [], []>} : vector<48x32xbf16>, vector<32x64xbf16>, vector<48x64xf32> -> vector<48x64xf32>
    %118 = arith.addf %113, %117 : vector<48x64xf32>
    %119 = vector.extract_strided_slice %9 {offsets = [1056, 0], sizes = [48, 32], strides = [1, 1]} : vector<1200x32xbf16> to vector<48x32xbf16>
    %c22 = arith.constant 22 : index
    %c0_74 = arith.constant 0 : index
    %c0_75 = arith.constant 0 : index
    %120 = vector.load %arg4[%c22, %c0_74, %c0_75] : memref<25x32x64xbf16, #tpu.memory_space<vmem>>, vector<1x32x64xbf16>
    %121 = vector.shape_cast %120 : vector<1x32x64xbf16> to vector<32x64xbf16>
    %cst_76 = arith.constant dense<0.000000e+00> : vector<48x64xf32>
    %122 = tpu.matmul %119, %121, %cst_76 {dimension_numbers = #tpu.dot_dimension_numbers<[1], [0], [0], [1], [0, 0, 1, 1], [], []>} : vector<48x32xbf16>, vector<32x64xbf16>, vector<48x64xf32> -> vector<48x64xf32>
    %123 = arith.addf %118, %122 : vector<48x64xf32>
    %124 = vector.extract_strided_slice %9 {offsets = [1104, 0], sizes = [48, 32], strides = [1, 1]} : vector<1200x32xbf16> to vector<48x32xbf16>
    %c23 = arith.constant 23 : index
    %c0_77 = arith.constant 0 : index
    %c0_78 = arith.constant 0 : index
    %125 = vector.load %arg4[%c23, %c0_77, %c0_78] : memref<25x32x64xbf16, #tpu.memory_space<vmem>>, vector<1x32x64xbf16>
    %126 = vector.shape_cast %125 : vector<1x32x64xbf16> to vector<32x64xbf16>
    %cst_79 = arith.constant dense<0.000000e+00> : vector<48x64xf32>
    %127 = tpu.matmul %124, %126, %cst_79 {dimension_numbers = #tpu.dot_dimension_numbers<[1], [0], [0], [1], [0, 0, 1, 1], [], []>} : vector<48x32xbf16>, vector<32x64xbf16>, vector<48x64xf32> -> vector<48x64xf32>
    %128 = arith.addf %123, %127 : vector<48x64xf32>
    %129 = vector.extract_strided_slice %9 {offsets = [1152, 0], sizes = [48, 32], strides = [1, 1]} : vector<1200x32xbf16> to vector<48x32xbf16>
    %c24 = arith.constant 24 : index
    %c0_80 = arith.constant 0 : index
    %c0_81 = arith.constant 0 : index
    %130 = vector.load %arg4[%c24, %c0_80, %c0_81] : memref<25x32x64xbf16, #tpu.memory_space<vmem>>, vector<1x32x64xbf16>
    %131 = vector.shape_cast %130 : vector<1x32x64xbf16> to vector<32x64xbf16>
    %cst_82 = arith.constant dense<0.000000e+00> : vector<48x64xf32>
    %132 = tpu.matmul %129, %131, %cst_82 {dimension_numbers = #tpu.dot_dimension_numbers<[1], [0], [0], [1], [0, 0, 1, 1], [], []>} : vector<48x32xbf16>, vector<32x64xbf16>, vector<48x64xf32> -> vector<48x64xf32>
    %133 = arith.addf %128, %132 : vector<48x64xf32>
    %c0_83 = arith.constant 0 : index
    %c0_84 = arith.constant 0 : index
    %134 = vector.load %arg5[%c0_83, %c0_84] : memref<1x64xf32, #tpu.memory_space<vmem>>, vector<1x64xf32>
    %135 = vector.broadcast %134 : vector<1x64xf32> to vector<48x64xf32>
    %136 = arith.addf %133, %135 : vector<48x64xf32>
    %cst_85 = arith.constant 0.000000e+00 : f32
    %137 = vector.broadcast %cst_85 : f32 to vector<48x64xf32>
    %138 = arith.maximumf %136, %137 : vector<48x64xf32>
    %139 = arith.truncf %138 : vector<48x64xf32> to vector<48x64xbf16>
    %140 = vector.extract_strided_slice %139 {offsets = [0, 0], sizes = [16, 64], strides = [1, 1]} : vector<48x64xbf16> to vector<16x64xbf16>
    %c0_86 = arith.constant 0 : index
    %c0_87 = arith.constant 0 : index
    %c0_88 = arith.constant 0 : index
    %141 = vector.load %arg6[%c0_86, %c0_87, %c0_88] : memref<3x64x128xbf16, #tpu.memory_space<vmem>>, vector<1x64x128xbf16>
    %142 = vector.shape_cast %141 : vector<1x64x128xbf16> to vector<64x128xbf16>
    %cst_89 = arith.constant dense<0.000000e+00> : vector<16x128xf32>
    %143 = tpu.matmul %140, %142, %cst_89 {dimension_numbers = #tpu.dot_dimension_numbers<[1], [0], [0], [1], [0, 0, 1, 1], [], []>} : vector<16x64xbf16>, vector<64x128xbf16>, vector<16x128xf32> -> vector<16x128xf32>
    %144 = vector.extract_strided_slice %139 {offsets = [16, 0], sizes = [16, 64], strides = [1, 1]} : vector<48x64xbf16> to vector<16x64xbf16>
    %c1_90 = arith.constant 1 : index
    %c0_91 = arith.constant 0 : index
    %c0_92 = arith.constant 0 : index
    %145 = vector.load %arg6[%c1_90, %c0_91, %c0_92] : memref<3x64x128xbf16, #tpu.memory_space<vmem>>, vector<1x64x128xbf16>
    %146 = vector.shape_cast %145 : vector<1x64x128xbf16> to vector<64x128xbf16>
    %cst_93 = arith.constant dense<0.000000e+00> : vector<16x128xf32>
    %147 = tpu.matmul %144, %146, %cst_93 {dimension_numbers = #tpu.dot_dimension_numbers<[1], [0], [0], [1], [0, 0, 1, 1], [], []>} : vector<16x64xbf16>, vector<64x128xbf16>, vector<16x128xf32> -> vector<16x128xf32>
    %148 = arith.addf %143, %147 : vector<16x128xf32>
    %149 = vector.extract_strided_slice %139 {offsets = [32, 0], sizes = [16, 64], strides = [1, 1]} : vector<48x64xbf16> to vector<16x64xbf16>
    %c2_94 = arith.constant 2 : index
    %c0_95 = arith.constant 0 : index
    %c0_96 = arith.constant 0 : index
    %150 = vector.load %arg6[%c2_94, %c0_95, %c0_96] : memref<3x64x128xbf16, #tpu.memory_space<vmem>>, vector<1x64x128xbf16>
    %151 = vector.shape_cast %150 : vector<1x64x128xbf16> to vector<64x128xbf16>
    %cst_97 = arith.constant dense<0.000000e+00> : vector<16x128xf32>
    %152 = tpu.matmul %149, %151, %cst_97 {dimension_numbers = #tpu.dot_dimension_numbers<[1], [0], [0], [1], [0, 0, 1, 1], [], []>} : vector<16x64xbf16>, vector<64x128xbf16>, vector<16x128xf32> -> vector<16x128xf32>
    %153 = arith.addf %148, %152 : vector<16x128xf32>
    %c0_98 = arith.constant 0 : index
    %c0_99 = arith.constant 0 : index
    %154 = vector.load %arg7[%c0_98, %c0_99] : memref<1x128xf32, #tpu.memory_space<vmem>>, vector<1x128xf32>
    %155 = vector.broadcast %154 : vector<1x128xf32> to vector<16x128xf32>
    %156 = arith.addf %153, %155 : vector<16x128xf32>
    %cst_100 = arith.constant 0.000000e+00 : f32
    %157 = vector.broadcast %cst_100 : f32 to vector<16x128xf32>
    %158 = arith.subf %157, %156 : vector<16x128xf32>
    %159 = math.exp %158 : vector<16x128xf32>
    %cst_101 = arith.constant 1.000000e+00 : f32
    %160 = vector.broadcast %cst_101 : f32 to vector<16x128xf32>
    %161 = arith.addf %160, %159 : vector<16x128xf32>
    %162 = tpu.reciprocal %161 {approx = true} : vector<16x128xf32> -> vector<16x128xf32>
    %c0_102 = arith.constant 0 : index
    %c0_103 = arith.constant 0 : index
    %163 = vector.load %arg8[%c0_102, %c0_103] : memref<16x128xf32, #tpu.memory_space<vmem>>, vector<16x128xf32>
    tpu.vector_store %arg8[%c0_102, %c0_103], %162 {strides = array<i32>} : memref<16x128xf32, #tpu.memory_space<vmem>>, vector<16x128xf32>,
    return
  }
  func.func @transform_0(%arg0: i32) -> (i32, i32, i32) {
    %c0_i32 = arith.constant 0 : i32
    %c0_i32_0 = arith.constant 0 : i32
    %c0_i32_1 = arith.constant 0 : i32
    return %arg0, %c0_i32, %c0_i32_0 : i32, i32, i32
  }
  func.func @transform_1(%arg0: i32) -> (i32, i32) {
    %c0_i32 = arith.constant 0 : i32
    %c0_i32_0 = arith.constant 0 : i32
    %c0_i32_1 = arith.constant 0 : i32
    return %c0_i32, %c0_i32_0 : i32, i32
  }
  func.func @transform_2(%arg0: i32) -> (i32, i32) {
    %c0_i32 = arith.constant 0 : i32
    %c0_i32_0 = arith.constant 0 : i32
    %c0_i32_1 = arith.constant 0 : i32
    return %c0_i32, %c0_i32_0 : i32, i32
  }
  func.func @transform_3(%arg0: i32) -> (i32, i32, i32) {
    %c0_i32 = arith.constant 0 : i32
    %c0_i32_0 = arith.constant 0 : i32
    %c0_i32_1 = arith.constant 0 : i32
    %c0_i32_2 = arith.constant 0 : i32
    return %c0_i32, %c0_i32_0, %c0_i32_1 : i32, i32, i32
  }
  func.func @transform_4(%arg0: i32) -> (i32, i32) {
    %c0_i32 = arith.constant 0 : i32
    %c0_i32_0 = arith.constant 0 : i32
    %c0_i32_1 = arith.constant 0 : i32
    return %c0_i32, %c0_i32_0 : i32, i32
  }
  func.func @transform_5(%arg0: i32) -> (i32, i32, i32) {
    %c0_i32 = arith.constant 0 : i32
    %c0_i32_0 = arith.constant 0 : i32
    %c0_i32_1 = arith.constant 0 : i32
    %c0_i32_2 = arith.constant 0 : i32
    return %c0_i32, %c0_i32_0, %c0_i32_1 : i32, i32, i32
  }
  func.func @transform_6(%arg0: i32) -> (i32, i32) {
    %c0_i32 = arith.constant 0 : i32
    %c0_i32_0 = arith.constant 0 : i32
    %c0_i32_1 = arith.constant 0 : i32
    return %c0_i32, %c0_i32_0 : i32, i32
  }
  func.func @transform_7(%arg0: i32) -> (i32, i32) {
    %c0_i32 = arith.constant 0 : i32
    %c0_i32_0 = arith.constant 0 : i32
    return %arg0, %c0_i32 : i32, i32
  }
}

</mosaic_0001>

<bundles_post_ra>
// kernel: network_forward.1
= control target key start
LH: loop header
LB: loop body
LE: loop exit
PB: predicated region body
PF: predicated region fallthrough
CT: control target
= control target key end

     0   :  { %s6068_s24 = smov 0   ;;  %s7220_s0 = inlined_call_operand.vmem [shape: bf16[2,1200,56], index: 0, kind: input, shape index: {}]   ;;  %s7221_s1 = inlined_call_operand.vmem [shape: bf16[56,32], index: 1, kind: input, shape index: {}]   ;;  %s7222_s2 = inlined_call_operand.vmem [shape: f32[1,32], index: 2, kind: input, shape index: {}]   ;;  %s7223_s3 = inlined_call_operand.vmem [shape: bf16[25,32,64], index: 3, kind: input, shape index: {}]   ;;  %s7224_s4 = inlined_call_operand.vmem [shape: f32[1,64], index: 4, kind: input, shape index: {}]   ;;  %s7225_s5 = inlined_call_operand.vmem [shape: bf16[3,64,128], index: 5, kind: input, shape index: {}]   ;;  %s7226_s6 = inlined_call_operand.vmem [shape: f32[1,128], index: 6, kind: input, shape index: {}]   ;;  %s7227_s7 = inlined_call_operand.vmem [shape: f32[32,128], index: 7, kind: output, shape index: {}]  }
   0x1 LB: > { %s6074_s25 = sadd.s32 4294967295, %s6024_s24   ;;  %p4478_p0 = scmp.ge.s32.totalorder %s6024_s24, 1  ;;  %s6024_s24 = sphi %s6068_s24, %s17_s24  }
   0x2   : > { %p237_p1 = scmp.lt.s32.totalorder %s6024_s24, 3 }
   0x4   : > { %p238_p2 = pnand %p4478_p0, %p237_p1 }
   0x5   : > { %v5867_v0 = vld [vmem:[%s7221_s1] sm:$0xff] (!%p238_p2)   ;;  %v6026_v1 = vmov (!%p238_p2), 0.0   ;;  %v5868_v2 = vld [vmem:[%s7221_s1 + $0x8] sm:$0xff] (!%p238_p2)   ;;  %vm6027_vm0 = vmmov (!%p238_p2), 0   ;;  %p269_p3 = scmp.lt.s32.totalorder (!%p238_p2), %s6074_s25, 1  ;;  %v5869_v3 = vld [vmem:[%s7221_s1 + $0x10] sm:$0xff] (!%p238_p2)  }
   0x6   : > { %241 = sbr.rel (%p238_p2) target bundleno = 1335 (0x537), region = 48  ;;  %5112 = vmatprep.subr.bf16.mxu0 (!%p238_p2), %v6026_v1  ;;  %5420 = vmatprep.subr.bf16.mxu1 (!%p238_p2), %v6026_v1  ;;  %v5870_v4 = vld [vmem:[%s7221_s1 + $0x18] ss:$0 sps:$4 sm:$0xff] (!%p238_p2)   ;;  %vm1067_vm1 = vcmask (!%p238_p2), 1043456   ;;  %vm841_vm2 = vcmask (!%p238_p2), 457728   ;;  %v5898_v20 = vld [vmem:[%s7223_s3 + $0x10] sm:$0xff] (!%p238_p2)  }
   0x7   : > { %5113 = vmatpush3.bf16.msra.mxu0 (!%p238_p2), %v5867_v0  ;;  %5120 = vmatprep.mubr.msk.bf16.mxu0 (!%p238_p2), %vm6027_vm0, %v6026_v1  ;;  %v1069_v5 = vsel (!%p238_p2), %vm1067_vm1, %v5870_v4, 0  ;;  %v5900_v22 = vld [vmem:[%s7223_s3 + $0x18] sm:$0xff] (!%p238_p2)   ;;  %v6224_v35 = vld [vmem:[%s7222_s2] ss:$0 sm:$0xff] (!%p238_p2)  ;;  %vm1950_vm3 = vcmask (!%p238_p2), 261120   ;;  %vm4205_vm4 = vcmask (!%p238_p2), 523264  }
   0x8   : > { %5114 = vmatprep.subr.bf16.mxu0 (!%p238_p2), %v6026_v1  ;;  %5424 = vmatprep.mubr.msk.bf16.mxu1 (!%p238_p2), %vm6027_vm0, %v6026_v1  ;;  %s4480_s29 = sshll.u32 (!%p238_p2), %s6074_s25, 1 }
   0x9   : > { %5421 = vmatpush3.bf16.msra.mxu1 (!%p238_p2), %v5898_v20  ;;  %p275_p4 = scmp.lt.s32.totalorder (!%p238_p2), %s4480_s29, 3 }
   0xa   : > { %5422 = vmatprep.subr.bf16.mxu1 (!%p238_p2), %v6026_v1 }
   0xb   : > { %5115 = vmatpush3.bf16.msra.mxu0 (!%p238_p2), %v5868_v2 }
   0xc   : > { %5116 = vmatprep.subr.bf16.mxu0 (!%p238_p2), %v6026_v1 }
   0xd   : > { %s270_s11 = scalar_select %p269_p3, %s6074_s25, 1  ;;  %5423 = vmatpush3.bf16.msra.mxu1 %v5900_v22 }
   0xe   : > { %5436 = vmatprep.subr.bf16.mxu1 %v6026_v1  ;;  %s7229_s29 = smov (!%p275_p4, %s4480_s29), 3 }
   0xf   : > { %s5856_s12 = smul.u32 600, %s270_s11  ;;  %5117 = vmatpush3.bf16.msra.mxu0 %v5869_v3 }
  0x10   : > { %5118 = vmatprep.subr.bf16.mxu0 %v6026_v1 }
  0x11   : > { %s6103_s15 = scalar_lea.vmem %s7220_s0, %s5856_s12 }
  0x12   : > { %v5871_v6 = vld [vmem:[%s6103_s15] sm:$0xff]   ;;  %v5872_v7 = vld [vmem:[%s6103_s15 + $0x8] sm:$0xff]   ;;  %v5873_v8 = vld [vmem:[%s6103_s15 + $0x10] sm:$0xff]  }
  0x13   : > { %5119 = vmatpush3.bf16.msra.mxu0 %v1069_v5  ;;  %v5874_v9 = vld [vmem:[%s6103_s15 + $0x18] sm:$0xff]   ;;  %v5875_v10 = vld [vmem:[%s6103_s15 + $0x20] sm:$0xff]   ;;  %v5876_v11 = vld [vmem:[%s6103_s15 + $0x28] sm:$0xff]  }
  0x14   : > { %5832 = vmatprep.subr.bf16.mxu0 %v6026_v1  ;;  %v5877_v12 = vld [vmem:[%s6103_s15 + $0x30] sm:$0xff]   ;;  %v5878_v13 = vld [vmem:[%s6103_s15 + $0x38] sm:$0xff]   ;;  %v5879_v14 = vld [vmem:[%s6103_s15 + $0x40] sm:$0xff]  }
  0x15   : > { %v5880_v15 = vld [vmem:[%s6103_s15 + $0x48] sm:$0xff]   ;;  %v5881_v16 = vld [vmem:[%s6103_s15 + $0x50] sm:$0xff]   ;;  %v5882_v17 = vld [vmem:[%s6103_s15 + $0x58] sm:$0xff]  }
  0x16   : > { %5121 = vmatmul.mubr.msk.bf16.vlgmr.msra.gmra.mrb[0].mxu0 %vm841_vm2, %v5871_v6  ;;  %v5883_v18 = vld [vmem:[%s6103_s15 + $0x60] sm:$0xff]   ;;  %v5884_v19 = vld [vmem:[%s6103_s15 + $0x68] sm:$0xff]   ;;  %v5885_v21 = vld [vmem:[%s6103_s15 + $0x70] sm:$0xff]  }
  0x17   : > { %5124 = vmatprep.mubr.msk.bf16.mxu0 %vm6027_vm0, %v6026_v1  ;;  %v5886_v23 = vld [vmem:[%s6103_s15 + $0x78] sm:$0xff]   ;;  %v5887_v24 = vld [vmem:[%s6103_s15 + $0x80] sm:$0xff]   ;;  %v5888_v25 = vld [vmem:[%s6103_s15 + $0x88] sm:$0xff]  }
  0x18   : > { %v5889_v26 = vld [vmem:[%s6103_s15 + $0x90] sm:$0xff]   ;;  %v5890_v27 = vld [vmem:[%s6103_s15 + $0x98] sm:$0xff]   ;;  %v5891_v28 = vld [vmem:[%s6103_s15 + $0xa0] sm:$0xff]  }
  0x19   : > { %v5892_v29 = vld [vmem:[%s6103_s15 + $0xa8] sm:$0xff]   ;;  %v5893_v30 = vld [vmem:[%s6103_s15 + $0xb0] sm:$0xff]   ;;  %v5894_v31 = vld [vmem:[%s6103_s15 + $0xb8] sm:$0xff]  }
  0x1a   : > { %v5895_v32 = vld [vmem:[%s6103_s15 + $0xc0] sm:$0xff]   ;;  %v5896_v33 = vld [vmem:[%s6103_s15 + $0xc8] sm:$0xff]   ;;  %v5897_v34 = vld [vmem:[%s6103_s15 + $0xd0] sm:$0xff]  }
  0x1b   : > { %v5899_v39 = vld [vmem:[%s6103_s15 + $0xd8] sm:$0xff]   ;;  %v5902_v49 = vld [vmem:[%s6103_s15 + $0xe0] sm:$0xff]   ;;  %v5903_v59 = vld [vmem:[%s6103_s15 + $0xe8] sm:$0xff]  }
  0x1c   : > { %v5905_v6 = vld [vmem:[%s6103_s15 + $0xf0] sm:$0xff]  }
  0x1e   : > { %5125 = vmatmul.mubr.msk.bf16.gmra.mrb[4].mxu0 %vm841_vm2, %v5872_v7 }
  0x1f   : > { %5128 = vmatprep.mubr.msk.bf16.mxu0 %vm6027_vm0, %v6026_v1 }
  0x26   : > { %5129 = vmatmul.mubr.msk.bf16.gmra.mrb[8].mxu0 %vm841_vm2, %v5873_v8 }
  0x27   : > { %5132 = vmatprep.mubr.msk.bf16.mxu0 %vm6027_vm0, %v6026_v1 }
  0x2e   : > { %5133 = vmatmul.mubr.msk.bf16.gmra.mrb[12].mxu0 %vm841_vm2, %v5874_v9 }
  0x2f   : > { %5136 = vmatprep.mubr.msk.bf16.mxu0 %vm6027_vm0, %v6026_v1 }
  0x36   : > { %5137 = vmatmul.mubr.msk.bf16.gmra.mrb[16].mxu0 %vm841_vm2, %v5875_v10 }
  0x37   : > { %5140 = vmatprep.mubr.msk.bf16.mxu0 %vm6027_vm0, %v6026_v1 }
  0x3e   : > { %5141 = vmatmul.mubr.msk.bf16.gmra.mrb[20].mxu0 %vm841_vm2, %v5876_v11 }
  0x3f   : > { %5144 = vmatprep.mubr.msk.bf16.mxu0 %vm6027_vm0, %v6026_v1 }
  0x46   : > { %5145 = vmatmul.mubr.msk.bf16.gmra.mrb[24].mxu0 %vm841_vm2, %v5877_v12  ;;  %v5901_v12 = vld [vmem:[%s7223_s3] sm:$0xff]  }
  0x47   : > { %5148 = vmatprep.mubr.msk.bf16.mxu0 %vm6027_vm0, %v6026_v1 }
  0x4e   : > { %5149 = vmatmul.mubr.msk.bf16.gmra.mrb[28].mxu0 %vm841_vm2, %v5878_v13 }
  0x4f   : > { %5152 = vmatprep.mubr.msk.bf16.mxu0 %vm6027_vm0, %v6026_v1 }
  0x56   : > { %5153 = vmatmul.mubr.msk.bf16.gmra.mrb[32].mxu0 %vm841_vm2, %v5879_v14 }
  0x57   : > { %5156 = vmatprep.mubr.msk.bf16.mxu0 %vm6027_vm0, %v6026_v1 }
  0x5e   : > { %5157 = vmatmul.mubr.msk.bf16.gmra.mrb[36].mxu0 %vm841_vm2, %v5880_v15 }
  0x5f   : > { %5160 = vmatprep.mubr.msk.bf16.mxu0 %vm6027_vm0, %v6026_v1 }
  0x66   : > { %5161 = vmatmul.mubr.msk.bf16.gmra.mrb[40].mxu0 %vm841_vm2, %v5881_v16 }
  0x67   : > { %5164 = vmatprep.mubr.msk.bf16.mxu0 %vm6027_vm0, %v6026_v1 }
  0x6e   : > { %5165 = vmatmul.mubr.msk.bf16.gmra.mrb[44].mxu0 %vm841_vm2, %v5882_v17  ;;  %v5907_v17 = vld [vmem:[%s6103_s15 + $0xf8] sm:$0xff]  }
  0x6f   : > { %5168 = vmatprep.mubr.msk.bf16.mxu0 %vm6027_vm0, %v6026_v1 }
  0x76   : > { %5169 = vmatmul.mubr.msk.bf16.gmra.mrb[48].mxu0 %vm841_vm2, %v5883_v18 }
  0x77   : > { %5172 = vmatprep.mubr.msk.bf16.mxu0 %vm6027_vm0, %v6026_v1 }
  0x7e   : > { %5173 = vmatmul.mubr.msk.bf16.gmra.mrb[52].mxu0 %vm841_vm2, %v5884_v19  ;;  %v5904_v19 = vld [vmem:[%s7223_s3 + $0x8] sm:$0xff]  }
  0x7f   : > { %5176 = vmatprep.mubr.msk.bf16.mxu0 %vm6027_vm0, %v6026_v1 }
  0x86   : > { %5177 = vmatmul.mubr.msk.bf16.gmra.mrb[56].mxu0 %vm841_vm2, %v5885_v21 }
  0x87   : > { %5180 = vmatprep.mubr.msk.bf16.mxu0 %vm6027_vm0, %v6026_v1 }
  0x8e   : > { %5181 = vmatmul.mubr.msk.bf16.gmra.mrb[60].mxu0 %vm841_vm2, %v5886_v23 }
  0x8f   : > { %5184 = vmatprep.mubr.msk.bf16.mxu0 %vm6027_vm0, %v6026_v1 }
  0x96   : > { %5185 = vmatmul.mubr.msk.bf16.gmra.mrb[64].mxu0 %vm841_vm2, %v5887_v24 }
  0x97   : > { %5188 = vmatprep.mubr.msk.bf16.mxu0 %vm6027_vm0, %v6026_v1 }
  0x9e   : > { %5189 = vmatmul.mubr.msk.bf16.gmra.mrb[68].mxu0 %vm841_vm2, %v5888_v25 }
  0x9f   : > { %5192 = vmatprep.mubr.msk.bf16.mxu0 %vm6027_vm0, %v6026_v1 }
  0xa6   : > { %5193 = vmatmul.mubr.msk.bf16.gmra.mrb[72].mxu0 %vm841_vm2, %v5889_v26 }
  0xa7   : > { %5196 = vmatprep.mubr.msk.bf16.mxu0 %vm6027_vm0, %v6026_v1 }
  0xae   : > { %5197 = vmatmul.mubr.msk.bf16.gmra.mrb[76].mxu0 %vm841_vm2, %v5890_v27 }
  0xaf   : > { %5200 = vmatprep.mubr.msk.bf16.mxu0 %vm6027_vm0, %v6026_v1 }
  0xb6   : > { %5201 = vmatmul.mubr.msk.bf16.gmra.mrb[80].mxu0 %vm841_vm2, %v5891_v28  ;;  %v5908_v28 = vld [vmem:[%s6103_s15 + $0x100] sm:$0xff]  }
  0xb7   : > { %5204 = vmatprep.mubr.msk.bf16.mxu0 %vm6027_vm0, %v6026_v1 }
  0xbe   : > { %5205 = vmatmul.mubr.msk.bf16.gmra.mrb[84].mxu0 %vm841_vm2, %v5892_v29 }
  0xbf   : > { %5208 = vmatprep.mubr.msk.bf16.mxu0 %vm6027_vm0, %v6026_v1 }
  0xc6   : > { %5209 = vmatmul.mubr.msk.bf16.gmra.mrb[88].mxu0 %vm841_vm2, %v5893_v30 }
  0xc7   : > { %5212 = vmatprep.mubr.msk.bf16.mxu0 %vm6027_vm0, %v6026_v1 }
  0xce   : > { %5213 = vmatmul.mubr.msk.bf16.gmra.mrb[92].mxu0 %vm841_vm2, %v5894_v31 }
  0xcf   : > { %5216 = vmatprep.mubr.msk.bf16.mxu0 %vm6027_vm0, %v6026_v1 }
  0xd6   : > { %5217 = vmatmul.mubr.msk.bf16.gmra.mrb[96].mxu0 %vm841_vm2, %v5895_v32 }
  0xd7   : > { %5220 = vmatprep.mubr.msk.bf16.mxu0 %vm6027_vm0, %v6026_v1 }
  0xde   : > { %5221 = vmatmul.mubr.msk.bf16.gmra.mrb[100].mxu0 %vm841_vm2, %v5896_v33 }
  0xdf   : > { %5224 = vmatprep.mubr.msk.bf16.mxu0 %vm6027_vm0, %v6026_v1 }
  0xe6   : > { %5225 = vmatmul.mubr.msk.bf16.gmra.mrb[104].mxu0 %vm841_vm2, %v5897_v34 }
  0xe7   : > { %5228 = vmatprep.mubr.msk.bf16.mxu0 %vm6027_vm0, %v6026_v1 }
  0xe9   : > { %v1105_v36 = vpop.f32.mrb[0].mxu0 }
  0xea   : > { %v1106_v37 = vadd.f32 %v6224_v35, %v1105_v36  ;;  %v5122_v38 = vpop.f32.mrb[1].mxu0 }
  0xeb   : > { %v1108_v40 = vpop.f32.mrb[2].mxu0 }
  0xec   : > { %v1109_v41 = vadd.f32 %v6224_v35, %v1108_v40  ;;  %v5123_v42 = vpop.f32.mrb[3].mxu0  ;;  %v1704_v43 = vmax.f32 %v1106_v37, 0.0 }
  0xee   : > { %v1705_v44 = vmax.f32 %v1109_v41, 0.0  ;;  %5229 = vmatmul.mubr.msk.bf16.gmra.mrb[108].mxu0 %vm841_vm2, %v5899_v39  ;;  %v5910_v39 = vld [vmem:[%s6103_s15 + $0x108] sm:$0xff]  }
  0xef   : > { %5232 = vmatprep.mubr.msk.bf16.mxu0 %vm6027_vm0, %v6026_v1 }
  0xf0   : > { %v6234_v45 = vpack.c.bf16 %v1705_v44, %v1704_v43 }
  0xf1   : > { %v1113_v46 = vpop.f32.mrb[4].mxu0 }
  0xf2   : > { %v1114_v47 = vadd.f32 %v6224_v35, %v1113_v46  ;;  %v5126_v48 = vpop.f32.mrb[5].mxu0  ;;  %v5906_v46 = vld [vmem:[%s7223_s3 + $0x20] sm:$0xff]  }
  0xf3   : > { %v1116_v50 = vpop.f32.mrb[6].mxu0 }
  0xf4   : > { %v1117_v51 = vadd.f32 %v6224_v35, %v1116_v50  ;;  %v5127_v52 = vpop.f32.mrb[7].mxu0  ;;  %v1706_v53 = vmax.f32 %v1114_v47, 0.0 }
  0xf5   : > { %v5909_v52 = vld [vmem:[%s7223_s3 + $0x28] sm:$0xff]  }
  0xf6   : > { %v1707_v54 = vmax.f32 %v1117_v51, 0.0  ;;  %5233 = vmatmul.mubr.msk.bf16.gmra.mrb[112].mxu0 %vm841_vm2, %v5902_v49  ;;  %v5912_v51 = vld [vmem:[%s6103_s15 + $0x110] sm:$0xff]  }
  0xf7   : > { %5236 = vmatprep.mubr.msk.bf16.mxu0 %vm6027_vm0, %v6026_v1 }
  0xf8   : > { %v6242_v55 = vpack.c.bf16 %v1707_v54, %v1706_v53 }
  0xf9   : > { %v1121_v56 = vpop.f32.mrb[8].mxu0 }
  0xfa   : > { %v1122_v57 = vadd.f32 %v6224_v35, %v1121_v56  ;;  %v5130_v58 = vpop.f32.mrb[9].mxu0 }
  0xfb   : > { %v1124_v60 = vpop.f32.mrb[10].mxu0 }
  0xfc   : > { %v1125_v61 = vadd.f32 %v6224_v35, %v1124_v60  ;;  %v5131_v62 = vpop.f32.mrb[11].mxu0  ;;  %v1708_v63 = vmax.f32 %v1122_v57, 0.0 }
  0xfd   : > { %v5913_v62 = vld [vmem:[%s6103_s15 + $0x118] sm:$0xff]  }
  0xfe   : > { %v1709_v0 = vmax.f32 %v1125_v61, 0.0  ;;  %5237 = vmatmul.mubr.msk.bf16.gmra.mrb[116].mxu0 %vm841_vm2, %v5903_v59 }
  0xff   : > { %5240 = vmatprep.mubr.msk.bf16.mxu0 %vm6027_vm0, %v6026_v1 }
 0x100   : > { %v6250_v2 = vpack.c.bf16 %v1709_v0, %v1708_v63 }
 0x101   : > { %v1129_v3 = vpop.f32.mrb[12].mxu0 }
 0x102   : > { %v1130_v4 = vadd.f32 %v6224_v35, %v1129_v3  ;;  %v5134_v5 = vpop.f32.mrb[13].mxu0 }
 0x103   : > { %v1132_v7 = vpop.f32.mrb[14].mxu0 }
 0x104   : > { %v1133_v8 = vadd.f32 %v6224_v35, %v1132_v7  ;;  %v5135_v9 = vpop.f32.mrb[15].mxu0  ;;  %v1710_v10 = vmax.f32 %v1130_v4, 0.0 }
 0x105   : > { %v5915_v9 = vld [vmem:[%s6103_s15 + $0x120] sm:$0xff]  }
 0x106   : > { %v1711_v11 = vmax.f32 %v1133_v8, 0.0  ;;  %5241 = vmatmul.mubr.msk.bf16.gmra.mrb[120].mxu0 %vm841_vm2, %v5905_v6 }
 0x107   : > { %5244 = vmatprep.mubr.msk.bf16.mxu0 %vm6027_vm0, %v6026_v1 }
 0x108   : > { %v1857_v13 = vpack.c.bf16 %v1711_v11, %v1710_v10 }
 0x109   : > { %v1137_v14 = vpop.f32.mrb[16].mxu0 }
 0x10a   : > { %v1138_v15 = vadd.f32 %v6224_v35, %v1137_v14  ;;  %v5138_v16 = vpop.f32.mrb[17].mxu0  ;;  %5425 = vmatmul.mubr.msk.bf16.vlgmr.msra.gmra.mrb[0].mxu1 %vm1950_vm3, %v1857_v13 }
 0x10b   : > { %5437 = vmatpush3.bf16.msra.mxu1 %v5901_v12  ;;  %v1140_v18 = vpop.f32.mrb[18].mxu0  ;;  %5428 = vmatprep.mubr.msk.bf16.mxu1 %vm6027_vm0, %v6026_v1 }
 0x10c   : > { %v1141_v20 = vadd.f32 %v6224_v35, %v1140_v18  ;;  %v5139_v21 = vpop.f32.mrb[19].mxu0  ;;  %5438 = vmatprep.subr.bf16.mxu1 %v6026_v1  ;;  %v1712_v22 = vmax.f32 %v1138_v15, 0.0 }
 0x10e   : > { %v1713_v23 = vmax.f32 %v1141_v20, 0.0  ;;  %5245 = vmatmul.mubr.msk.bf16.gmra.mrb[124].mxu0 %vm841_vm2, %v5907_v17  ;;  %v5914_v20 = vld [vmem:[%s7223_s3 + $0x38] sm:$0xff]  }
 0x10f   : > { %5439 = vmatpush3.bf16.msra.mxu1 %v5904_v19  ;;  %5248 = vmatprep.mubr.msk.bf16.mxu0 %vm6027_vm0, %v6026_v1  ;;  %v5917_v19 = vld [vmem:[%s6103_s15 + $0x128] sm:$0xff]  }
 0x110   : > { %v1858_v24 = vpack.c.bf16 %v1713_v23, %v1712_v22  ;;  %5452 = vmatprep.subr.bf16.mxu1 %v6026_v1 }
 0x111   : > { %v1145_v25 = vpop.f32.mrb[20].mxu0 }
 0x112   : > { %v1146_v26 = vadd.f32 %v6224_v35, %v1145_v25  ;;  %v5142_v27 = vpop.f32.mrb[21].mxu0  ;;  %5429 = vmatmul.mubr.msk.bf16.gmra.mrb[4].mxu1 %vm1950_vm3, %v1858_v24 }
 0x113   : > { %v1148_v29 = vpop.f32.mrb[22].mxu0  ;;  %5432 = vmatprep.mubr.msk.bf16.mxu1 %vm6027_vm0, %v6026_v1 }
 0x114   : > { %v1149_v30 = vadd.f32 %v6224_v35, %v1148_v29  ;;  %v5143_v31 = vpop.f32.mrb[23].mxu0  ;;  %v1714_v32 = vmax.f32 %v1146_v26, 0.0 }
 0x116   : > { %v1715_v33 = vmax.f32 %v1149_v30, 0.0  ;;  %5249 = vmatmul.mubr.msk.bf16.gmra.mrb[128].mxu0 %vm841_vm2, %v5908_v28  ;;  %v5918_v30 = vld [vmem:[%s6103_s15 + $0x130] sm:$0xff]  }
 0x117   : > { %5252 = vmatprep.mubr.msk.bf16.mxu0 %vm6027_vm0, %v6026_v1 }
 0x118   : > { %v1859_v34 = vpack.c.bf16 %v1715_v33, %v1714_v32 }
 0x119   : > { %v1153_v36 = vpop.f32.mrb[24].mxu0 }
 0x11a   : > { %5433 = vmatmul.mubr.msk.bf16.gmra.mrb[8].mxu1 %vm1950_vm3, %v1859_v34  ;;  %v1154_v37 = vadd.f32 %v6224_v35, %v1153_v36  ;;  %v5146_v38 = vpop.f32.mrb[25].mxu0 }
 0x11b   : > { %5440 = vmatprep.mubr.msk.bf16.mxu1 %vm6027_vm0, %v6026_v1  ;;  %v1156_v40 = vpop.f32.mrb[26].mxu0 }
 0x11c   : > { %v1716_v41 = vmax.f32 %v1154_v37, 0.0  ;;  %v1157_v42 = vadd.f32 %v6224_v35, %v1156_v40  ;;  %v5147_v43 = vpop.f32.mrb[27].mxu0 }
 0x11e   : > { %v1717_v44 = vmax.f32 %v1157_v42, 0.0  ;;  %5253 = vmatmul.mubr.msk.bf16.gmra.mrb[132].mxu0 %vm841_vm2, %v5910_v39 }
 0x11f   : > { %5256 = vmatprep.mubr.msk.bf16.mxu0 %vm6027_vm0, %v6026_v1 }
 0x120   : > { %v1860_v47 = vpack.c.bf16 %v1717_v44, %v1716_v41  ;;  %v5920_v41 = vld [vmem:[%s6103_s15 + $0x138] sm:$0xff]  }
 0x121   : > { %v1161_v48 = vpop.f32.mrb[28].mxu0 }
 0x122   : > { %5441 = vmatmul.mubr.msk.bf16.vlgmr.msra.gmra.mrb[12].mxu1 %vm1950_vm3, %v6234_v45  ;;  %v1162_v49 = vadd.f32 %v6224_v35, %v1161_v48  ;;  %v5150_v50 = vpop.f32.mrb[29].mxu0  ;;  %v5916_v48 = vld [vmem:[%s7223_s3 + $0x40] sm:$0xff]  }
 0x123   : > { %5453 = vmatpush3.bf16.msra.mxu1 %v5906_v46  ;;  %5444 = vmatprep.mubr.msk.bf16.mxu1 %vm6027_vm0, %v6026_v1  ;;  %v1164_v53 = vpop.f32.mrb[30].mxu0 }
 0x124   : > { %5454 = vmatprep.subr.bf16.mxu1 %v6026_v1  ;;  %v1718_v54 = vmax.f32 %v1162_v49, 0.0  ;;  %v1165_v56 = vadd.f32 %v6224_v35, %v1164_v53  ;;  %v5151_v45 = vpop.f32.mrb[31].mxu0  ;;  %v5922_v53 = vld [vmem:[%s6103_s15 + $0x140] sm:$0xff]  }
 0x126   : > { %v1719_v57 = vmax.f32 %v1165_v56, 0.0  ;;  %5257 = vmatmul.mubr.msk.bf16.gmra.mrb[136].mxu0 %vm841_vm2, %v5912_v51 }
 0x127   : > { %5455 = vmatpush3.bf16.msra.mxu1 %v5909_v52  ;;  %5260 = vmatprep.mubr.msk.bf16.mxu0 %vm6027_vm0, %v6026_v1 }
 0x128   : > { %v1861_v58 = vpack.c.bf16 %v1719_v57, %v1718_v54  ;;  %5468 = vmatprep.subr.bf16.mxu1 %v6026_v1  ;;  %v5919_v54 = vld [vmem:[%s7223_s3 + $0x48] sm:$0xff]  }
 0x129   : > { %v1169_v59 = vpop.f32.mrb[32].mxu0 }
 0x12a   : > { %5445 = vmatmul.mubr.msk.bf16.gmra.mrb[16].mxu1 %vm1950_vm3, %v6242_v55  ;;  %v1170_v60 = vadd.f32 %v6224_v35, %v1169_v59  ;;  %v5154_v61 = vpop.f32.mrb[33].mxu0 }
 0x12b   : > { %5448 = vmatprep.mubr.msk.bf16.mxu1 %vm6027_vm0, %v6026_v1  ;;  %v1172_v63 = vpop.f32.mrb[34].mxu0 }
 0x12c   : > { %v1720_v0 = vmax.f32 %v1170_v60, 0.0  ;;  %v1173_v3 = vadd.f32 %v6224_v35, %v1172_v63  ;;  %v5155_v4 = vpop.f32.mrb[35].mxu0 }
 0x12e   : > { %v1721_v5 = vmax.f32 %v1173_v3, 0.0  ;;  %5261 = vmatmul.mubr.msk.bf16.gmra.mrb[140].mxu0 %vm841_vm2, %v5913_v62 }
 0x12f   : > { %5264 = vmatprep.mubr.msk.bf16.mxu0 %vm6027_vm0, %v6026_v1 }
 0x130   : > { %v1862_v55 = vpack.c.bf16 %v1721_v5, %v1720_v0  ;;  %v5923_v0 = vld [vmem:[%s6103_s15 + $0x148] sm:$0xff]  }
 0x131   : > { %v1177_v6 = vpop.f32.mrb[36].mxu0 }
 0x132   : > { %5449 = vmatmul.mubr.msk.bf16.gmra.mrb[20].mxu1 %vm1950_vm3, %v6250_v2  ;;  %v1178_v7 = vadd.f32 %v6224_v35, %v1177_v6  ;;  %v5158_v8 = vpop.f32.mrb[37].mxu0  ;;  %v5911_v2 = vld [vmem:[%s7223_s3 + $0x30] sm:$0xff]  }
 0x133   : > { %5456 = vmatprep.mubr.msk.bf16.mxu1 %vm6027_vm0, %v6026_v1  ;;  %v1180_v10 = vpop.f32.mrb[38].mxu0 }
 0x134   : > { %v1722_v11 = vmax.f32 %v1178_v7, 0.0  ;;  %v1181_v12 = vadd.f32 %v6224_v35, %v1180_v10  ;;  %v5159_v13 = vpop.f32.mrb[39].mxu0 }
 0x136   : > { %v1723_v14 = vmax.f32 %v1181_v12, 0.0  ;;  %5265 = vmatmul.mubr.msk.bf16.gmra.mrb[144].mxu0 %vm841_vm2, %v5915_v9 }
 0x137   : > { %5268 = vmatprep.mubr.msk.bf16.mxu0 %vm6027_vm0, %v6026_v1 }
 0x138   : > { %v1863_v15 = vpack.c.bf16 %v1723_v14, %v1722_v11  ;;  %v5925_v11 = vld [vmem:[%s6103_s15 + $0x150] sm:$0xff]  }
 0x139   : > { %v1185_v16 = vpop.f32.mrb[40].mxu0 }
 0x13a   : > { %5457 = vmatmul.mubr.msk.bf16.vlgmr.msra.gmra.mrb[24].mxu1 %vm1950_vm3, %v1860_v47  ;;  %v1186_v17 = vadd.f32 %v6224_v35, %v1185_v16  ;;  %v5162_v18 = vpop.f32.mrb[41].mxu0 }
 0x13b   : > { %5469 = vmatpush3.bf16.msra.mxu1 %v5911_v2  ;;  %5460 = vmatprep.mubr.msk.bf16.mxu1 %vm6027_vm0, %v6026_v1  ;;  %v1188_v21 = vpop.f32.mrb[42].mxu0 }
 0x13c   : > { %5470 = vmatprep.subr.bf16.mxu1 %v6026_v1  ;;  %v1724_v22 = vmax.f32 %v1186_v17, 0.0  ;;  %v1189_v23 = vadd.f32 %v6224_v35, %v1188_v21  ;;  %v5163_v24 = vpop.f32.mrb[43].mxu0  ;;  %v5921_v17 = vld [vmem:[%s7223_s3 + $0x50] sm:$0xff]  }
 0x13e   : > { %v1725_v25 = vmax.f32 %v1189_v23, 0.0  ;;  %5269 = vmatmul.mubr.msk.bf16.gmra.mrb[148].mxu0 %vm841_vm2, %v5917_v19  ;;  %v5924_v23 = vld [vmem:[%s7223_s3 + $0x58] sm:$0xff]  }
 0x13f   : > { %5471 = vmatpush3.bf16.msra.mxu1 %v5914_v20  ;;  %5272 = vmatprep.mubr.msk.bf16.mxu0 %vm6027_vm0, %v6026_v1 }
 0x140   : > { %v1864_v26 = vpack.c.bf16 %v1725_v25, %v1724_v22  ;;  %5484 = vmatprep.subr.bf16.mxu1 %v6026_v1  ;;  %v5927_v22 = vld [vmem:[%s6103_s15 + $0x158] sm:$0xff]  }
 0x141   : > { %v1193_v27 = vpop.f32.mrb[44].mxu0 }
 0x142   : > { %5461 = vmatmul.mubr.msk.bf16.gmra.mrb[28].mxu1 %vm1950_vm3, %v1861_v58  ;;  %v1194_v28 = vadd.f32 %v6224_v35, %v1193_v27  ;;  %v5166_v29 = vpop.f32.mrb[45].mxu0 }
 0x143   : > { %5464 = vmatprep.mubr.msk.bf16.mxu1 %vm6027_vm0, %v6026_v1  ;;  %v1196_v31 = vpop.f32.mrb[46].mxu0 }
 0x144   : > { %v1726_v32 = vmax.f32 %v1194_v28, 0.0  ;;  %v1197_v33 = vadd.f32 %v6224_v35, %v1196_v31  ;;  %v5167_v34 = vpop.f32.mrb[47].mxu0 }
 0x146   : > { %v1727_v36 = vmax.f32 %v1197_v33, 0.0  ;;  %5273 = vmatmul.mubr.msk.bf16.gmra.mrb[152].mxu0 %vm841_vm2, %v5918_v30  ;;  %v5928_v33 = vld [vmem:[%s6103_s15 + $0x160] sm:$0xff]  }
 0x147   : > { %5276 = vmatprep.mubr.msk.bf16.mxu0 %vm6027_vm0, %v6026_v1 }
 0x148   : > { %v1865_v37 = vpack.c.bf16 %v1727_v36, %v1726_v32 }
 0x149   : > { %v1201_v38 = vpop.f32.mrb[48].mxu0 }
 0x14a   : > { %5465 = vmatmul.mubr.msk.bf16.gmra.mrb[32].mxu1 %vm1950_vm3, %v1862_v55  ;;  %v1202_v39 = vadd.f32 %v6224_v35, %v1201_v38  ;;  %v5170_v40 = vpop.f32.mrb[49].mxu0 }
 0x14b   : > { %5472 = vmatprep.mubr.msk.bf16.mxu1 %vm6027_vm0, %v6026_v1  ;;  %v1204_v42 = vpop.f32.mrb[50].mxu0 }
 0x14c   : > { %v1728_v43 = vmax.f32 %v1202_v39, 0.0  ;;  %v1205_v44 = vadd.f32 %v6224_v35, %v1204_v42  ;;  %v5171_v46 = vpop.f32.mrb[51].mxu0 }
 0x14e   : > { %v1729_v47 = vmax.f32 %v1205_v44, 0.0  ;;  %5277 = vmatmul.mubr.msk.bf16.gmra.mrb[156].mxu0 %vm841_vm2, %v5920_v41  ;;  %v5930_v44 = vld [vmem:[%s6103_s15 + $0x168] sm:$0xff]  }
 0x14f   : > { %5280 = vmatprep.mubr.msk.bf16.mxu0 %vm6027_vm0, %v6026_v1 }
 0x150   : > { %v1866_v49 = vpack.c.bf16 %v1729_v47, %v1728_v43 }
 0x151   : > { %v1209_v50 = vpop.f32.mrb[52].mxu0 }
 0x152   : > { %5473 = vmatmul.mubr.msk.bf16.vlgmr.msra.gmra.mrb[36].mxu1 %vm1950_vm3, %v1863_v15  ;;  %v1210_v51 = vadd.f32 %v6224_v35, %v1209_v50  ;;  %v5174_v52 = vpop.f32.mrb[53].mxu0  ;;  %v5948_v15 = vld [vmem:[%s7225_s5] sm:$0xff]  }
 0x153   : > { %5485 = vmatpush3.bf16.msra.mxu1 %v5916_v48  ;;  %5476 = vmatprep.mubr.msk.bf16.mxu1 %vm6027_vm0, %v6026_v1  ;;  %v1212_v56 = vpop.f32.mrb[54].mxu0 }
 0x154   : > { %5486 = vmatprep.subr.bf16.mxu1 %v6026_v1  ;;  %v1730_v45 = vmax.f32 %v1210_v51, 0.0  ;;  %v1213_v57 = vadd.f32 %v6224_v35, %v1212_v56  ;;  %v5175_v58 = vpop.f32.mrb[55].mxu0  ;;  %5833 = vmatpush3.bf16.msra.mxu0 %v5948_v15  ;;  %v5926_v51 = vld [vmem:[%s7223_s3 + $0x60] sm:$0xff]  }
 0x155   : > { %5834 = vmatprep.subr.bf16.mxu0 %v6026_v1 }
 0x156   : > { %v1731_v59 = vmax.f32 %v1213_v57, 0.0  ;;  %5281 = vmatmul.mubr.msk.bf16.gmra.mrb[160].mxu0 %vm841_vm2, %v5922_v53  ;;  %v5929_v57 = vld [vmem:[%s7223_s3 + $0x68] sm:$0xff]  }
 0x157   : > { %5487 = vmatpush3.bf16.msra.mxu1 %v5919_v54  ;;  %5284 = vmatprep.mubr.msk.bf16.mxu0 %vm6027_vm0, %v6026_v1 }
 0x158   : > { %v1867_v60 = vpack.c.bf16 %v1731_v59, %v1730_v45  ;;  %5500 = vmatprep.subr.bf16.mxu1 %v6026_v1  ;;  %v5932_v45 = vld [vmem:[%s6103_s15 + $0x170] sm:$0xff]  }
 0x159   : > { %v1217_v61 = vpop.f32.mrb[56].mxu0 }
 0x15a   : > { %5477 = vmatmul.mubr.msk.bf16.gmra.mrb[40].mxu1 %vm1950_vm3, %v1864_v26  ;;  %v1218_v62 = vadd.f32 %v6224_v35, %v1217_v61  ;;  %v5178_v63 = vpop.f32.mrb[57].mxu0 }
 0x15b   : > { %5480 = vmatprep.mubr.msk.bf16.mxu1 %vm6027_vm0, %v6026_v1  ;;  %v1220_v3 = vpop.f32.mrb[58].mxu0 }
 0x15c   : > { %v1732_v4 = vmax.f32 %v1218_v62, 0.0  ;;  %v1221_v5 = vadd.f32 %v6224_v35, %v1220_v3  ;;  %v5179_v55 = vpop.f32.mrb[59].mxu0 }
 0x15e   : > { %v1733_v6 = vmax.f32 %v1221_v5, 0.0  ;;  %5285 = vmatmul.mubr.msk.bf16.gmra.mrb[164].mxu0 %vm841_vm2, %v5923_v0  ;;  %v5933_v5 = vld [vmem:[%s6103_s15 + $0x178] sm:$0xff]  }
 0x15f   : > { %5288 = vmatprep.mubr.msk.bf16.mxu0 %vm6027_vm0, %v6026_v1 }
 0x160   : > { %v1868_v7 = vpack.c.bf16 %v1733_v6, %v1732_v4 }
 0x161   : > { %v1225_v8 = vpop.f32.mrb[60].mxu0 }
 0x162   : > { %5481 = vmatmul.mubr.msk.bf16.gmra.mrb[44].mxu1 %vm1950_vm3, %v1865_v37  ;;  %v1226_v9 = vadd.f32 %v6224_v35, %v1225_v8  ;;  %v5182_v10 = vpop.f32.mrb[61].mxu0 }
 0x163   : > { %5488 = vmatprep.mubr.msk.bf16.mxu1 %vm6027_vm0, %v6026_v1  ;;  %v1228_v12 = vpop.f32.mrb[62].mxu0 }
 0x164   : > { %v1734_v13 = vmax.f32 %v1226_v9, 0.0  ;;  %v1229_v14 = vadd.f32 %v6224_v35, %v1228_v12  ;;  %v5183_v2 = vpop.f32.mrb[63].mxu0 }
 0x166   : > { %v1735_v16 = vmax.f32 %v1229_v14, 0.0  ;;  %5289 = vmatmul.mubr.msk.bf16.gmra.mrb[168].mxu0 %vm841_vm2, %v5925_v11  ;;  %v5935_v14 = vld [vmem:[%s6103_s15 + $0x180] sm:$0xff]  }
 0x167   : > { %5292 = vmatprep.mubr.msk.bf16.mxu0 %vm6027_vm0, %v6026_v1 }
 0x168   : > { %v1869_v18 = vpack.c.bf16 %v1735_v16, %v1734_v13 }
 0x169   : > { %v1233_v19 = vpop.f32.mrb[64].mxu0 }
 0x16a   : > { %5489 = vmatmul.mubr.msk.bf16.vlgmr.msra.gmra.mrb[48].mxu1 %vm1950_vm3, %v1866_v49  ;;  %v1234_v20 = vadd.f32 %v6224_v35, %v1233_v19  ;;  %v5186_v21 = vpop.f32.mrb[65].mxu0  ;;  %v5931_v19 = vld [vmem:[%s7223_s3 + $0x70] sm:$0xff]  }
 0x16b   : > { %5501 = vmatpush3.bf16.msra.mxu1 %v5921_v17  ;;  %5492 = vmatprep.mubr.msk.bf16.mxu1 %vm6027_vm0, %v6026_v1  ;;  %v1236_v24 = vpop.f32.mrb[66].mxu0 }
 0x16c   : > { %5502 = vmatprep.subr.bf16.mxu1 %v6026_v1  ;;  %v1736_v25 = vmax.f32 %v1234_v20, 0.0  ;;  %v1237_v26 = vadd.f32 %v6224_v35, %v1236_v24  ;;  %v5187_v27 = vpop.f32.mrb[67].mxu0  ;;  %v5937_v24 = vld [vmem:[%s6103_s15 + $0x188] sm:$0xff]  }
 0x16e   : > { %v1737_v28 = vmax.f32 %v1237_v26, 0.0  ;;  %5293 = vmatmul.mubr.msk.bf16.gmra.mrb[172].mxu0 %vm841_vm2, %v5927_v22 }
 0x16f   : > { %5503 = vmatpush3.bf16.msra.mxu1 %v5924_v23  ;;  %5296 = vmatprep.mubr.msk.bf16.mxu0 %vm6027_vm0, %v6026_v1 }
 0x170   : > { %v1870_v29 = vpack.c.bf16 %v1737_v28, %v1736_v25  ;;  %5516 = vmatprep.subr.bf16.mxu1 %v6026_v1  ;;  %v5934_v25 = vld [vmem:[%s7223_s3 + $0x78] sm:$0xff]  }
 0x171   : > { %v1241_v30 = vpop.f32.mrb[68].mxu0 }
 0x172   : > { %5493 = vmatmul.mubr.msk.bf16.gmra.mrb[52].mxu1 %vm1950_vm3, %v1867_v60  ;;  %v1242_v31 = vadd.f32 %v6224_v35, %v1241_v30  ;;  %v5190_v32 = vpop.f32.mrb[69].mxu0 }
 0x173   : > { %5496 = vmatprep.mubr.msk.bf16.mxu1 %vm6027_vm0, %v6026_v1  ;;  %v1244_v34 = vpop.f32.mrb[70].mxu0 }
 0x174   : > { %v1738_v36 = vmax.f32 %v1242_v31, 0.0  ;;  %v1245_v37 = vadd.f32 %v6224_v35, %v1244_v34  ;;  %v5191_v38 = vpop.f32.mrb[71].mxu0 }
 0x176   : > { %v1739_v39 = vmax.f32 %v1245_v37, 0.0  ;;  %5297 = vmatmul.mubr.msk.bf16.gmra.mrb[176].mxu0 %vm841_vm2, %v5928_v33 }
 0x177   : > { %5300 = vmatprep.mubr.msk.bf16.mxu0 %vm6027_vm0, %v6026_v1 }
 0x178   : > { %v1871_v40 = vpack.c.bf16 %v1739_v39, %v1738_v36  ;;  %v5938_v36 = vld [vmem:[%s6103_s15 + $0x190] sm:$0xff]  }
 0x179   : > { %v1249_v41 = vpop.f32.mrb[72].mxu0 }
 0x17a   : > { %5497 = vmatmul.mubr.msk.bf16.gmra.mrb[56].mxu1 %vm1950_vm3, %v1868_v7  ;;  %v1250_v42 = vadd.f32 %v6224_v35, %v1249_v41  ;;  %v5194_v43 = vpop.f32.mrb[73].mxu0 }
 0x17b   : > { %5504 = vmatprep.mubr.msk.bf16.mxu1 %vm6027_vm0, %v6026_v1  ;;  %v1252_v46 = vpop.f32.mrb[74].mxu0 }
 0x17c   : > { %v1740_v47 = vmax.f32 %v1250_v42, 0.0  ;;  %v1253_v48 = vadd.f32 %v6224_v35, %v1252_v46  ;;  %v5195_v49 = vpop.f32.mrb[75].mxu0 }
 0x17e   : > { %v1741_v50 = vmax.f32 %v1253_v48, 0.0  ;;  %5301 = vmatmul.mubr.msk.bf16.gmra.mrb[180].mxu0 %vm841_vm2, %v5930_v44 }
 0x17f   : > { %5304 = vmatprep.mubr.msk.bf16.mxu0 %vm6027_vm0, %v6026_v1 }
 0x180   : > { %v1872_v52 = vpack.c.bf16 %v1741_v50, %v1740_v47  ;;  %v5940_v47 = vld [vmem:[%s6103_s15 + $0x198] sm:$0xff]  }
 0x181   : > { %v1257_v53 = vpop.f32.mrb[76].mxu0 }
 0x182   : > { %5505 = vmatmul.mubr.msk.bf16.vlgmr.msra.gmra.mrb[60].mxu1 %vm1950_vm3, %v1869_v18  ;;  %v1258_v54 = vadd.f32 %v6224_v35, %v1257_v53  ;;  %v5198_v56 = vpop.f32.mrb[77].mxu0  ;;  %v5936_v53 = vld [vmem:[%s7223_s3 + $0x80] sm:$0xff]  }
 0x183   : > { %5517 = vmatpush3.bf16.msra.mxu1 %v5926_v51  ;;  %5508 = vmatprep.mubr.msk.bf16.mxu1 %vm6027_vm0, %v6026_v1  ;;  %v1260_v58 = vpop.f32.mrb[78].mxu0 }
 0x184   : > { %5518 = vmatprep.subr.bf16.mxu1 %v6026_v1  ;;  %v1742_v59 = vmax.f32 %v1258_v54, 0.0  ;;  %v1261_v60 = vadd.f32 %v6224_v35, %v1260_v58  ;;  %v5199_v61 = vpop.f32.mrb[79].mxu0  ;;  %v5942_v58 = vld [vmem:[%s6103_s15 + $0x1a0] sm:$0xff]  }
 0x186   : > { %v1743_v62 = vmax.f32 %v1261_v60, 0.0  ;;  %5305 = vmatmul.mubr.msk.bf16.gmra.mrb[184].mxu0 %vm841_vm2, %v5932_v45 }
 0x187   : > { %5519 = vmatpush3.bf16.msra.mxu1 %v5929_v57  ;;  %5308 = vmatprep.mubr.msk.bf16.mxu0 %vm6027_vm0, %v6026_v1 }
 0x188   : > { %v1873_v63 = vpack.c.bf16 %v1743_v62, %v1742_v59  ;;  %5532 = vmatprep.subr.bf16.mxu1 %v6026_v1  ;;  %v5939_v59 = vld [vmem:[%s7223_s3 + $0x88] sm:$0xff]  }
 0x189   : > { %v1265_v0 = vpop.f32.mrb[80].mxu0 }
 0x18a   : > { %5509 = vmatmul.mubr.msk.bf16.gmra.mrb[64].mxu1 %vm1950_vm3, %v1870_v29  ;;  %v1266_v3 = vadd.f32 %v6224_v35, %v1265_v0  ;;  %v5202_v4 = vpop.f32.mrb[81].mxu0 }
 0x18b   : > { %5512 = vmatprep.mubr.msk.bf16.mxu1 %vm6027_vm0, %v6026_v1  ;;  %v1268_v55 = vpop.f32.mrb[82].mxu0 }
 0x18c   : > { %v1744_v6 = vmax.f32 %v1266_v3, 0.0  ;;  %v1269_v7 = vadd.f32 %v6224_v35, %v1268_v55  ;;  %v5203_v8 = vpop.f32.mrb[83].mxu0 }
 0x18e   : > { %v1745_v9 = vmax.f32 %v1269_v7, 0.0  ;;  %5309 = vmatmul.mubr.msk.bf16.gmra.mrb[188].mxu0 %vm841_vm2, %v5933_v5 }
 0x18f   : > { %5312 = vmatprep.mubr.msk.bf16.mxu0 %vm6027_vm0, %v6026_v1 }
 0x190   : > { %v1874_v10 = vpack.c.bf16 %v1745_v9, %v1744_v6  ;;  %v5943_v6 = vld [vmem:[%s6103_s15 + $0x1a8] sm:$0xff]  }
 0x191   : > { %v1273_v11 = vpop.f32.mrb[84].mxu0 }
 0x192   : > { %5513 = vmatmul.mubr.msk.bf16.gmra.mrb[68].mxu1 %vm1950_vm3, %v1871_v40  ;;  %v1274_v12 = vadd.f32 %v6224_v35, %v1273_v11  ;;  %v5206_v13 = vpop.f32.mrb[85].mxu0 }
 0x193   : > { %5520 = vmatprep.mubr.msk.bf16.mxu1 %vm6027_vm0, %v6026_v1  ;;  %v1276_v2 = vpop.f32.mrb[86].mxu0 }
 0x194   : > { %v1746_v15 = vmax.f32 %v1274_v12, 0.0  ;;  %v1277_v16 = vadd.f32 %v6224_v35, %v1276_v2  ;;  %v5207_v17 = vpop.f32.mrb[87].mxu0 }
 0x196   : > { %v1747_v18 = vmax.f32 %v1277_v16, 0.0  ;;  %5313 = vmatmul.mubr.msk.bf16.gmra.mrb[192].mxu0 %vm841_vm2, %v5935_v14 }
 0x197   : > { %5316 = vmatprep.mubr.msk.bf16.mxu0 %vm6027_vm0, %v6026_v1 }
 0x198   : > { %v1875_v20 = vpack.c.bf16 %v1747_v18, %v1746_v15  ;;  %v5945_v15 = vld [vmem:[%s6103_s15 + $0x1b0] sm:$0xff]  }
 0x199   : > { %v1281_v21 = vpop.f32.mrb[88].mxu0 }
 0x19a   : > { %5521 = vmatmul.mubr.msk.bf16.vlgmr.msra.gmra.mrb[72].mxu1 %vm1950_vm3, %v1872_v52  ;;  %v1282_v22 = vadd.f32 %v6224_v35, %v1281_v21  ;;  %v5210_v23 = vpop.f32.mrb[89].mxu0  ;;  %v5941_v21 = vld [vmem:[%s7223_s3 + $0x90] sm:$0xff]  }
 0x19b   : > { %5533 = vmatpush3.bf16.msra.mxu1 %v5931_v19  ;;  %5524 = vmatprep.mubr.msk.bf16.mxu1 %vm6027_vm0, %v6026_v1  ;;  %v1284_v26 = vpop.f32.mrb[90].mxu0 }
 0x19c   : > { %5534 = vmatprep.subr.bf16.mxu1 %v6026_v1  ;;  %v1748_v27 = vmax.f32 %v1282_v22, 0.0  ;;  %v1285_v28 = vadd.f32 %v6224_v35, %v1284_v26  ;;  %v5211_v29 = vpop.f32.mrb[91].mxu0  ;;  %v5947_v26 = vld [vmem:[%s6103_s15 + $0x1b8] sm:$0xff]  }
 0x19e   : > { %v1749_v30 = vmax.f32 %v1285_v28, 0.0  ;;  %5317 = vmatmul.mubr.msk.bf16.gmra.mrb[196].mxu0 %vm841_vm2, %v5937_v24 }
 0x19f   : > { %5535 = vmatpush3.bf16.msra.mxu1 %v5934_v25  ;;  %5320 = vmatprep.mubr.msk.bf16.mxu0 %vm6027_vm0, %v6026_v1 }
 0x1a0   : > { %v1876_v31 = vpack.c.bf16 %v1749_v30, %v1748_v27  ;;  %5548 = vmatprep.subr.bf16.mxu1 %v6026_v1  ;;  %v5944_v27 = vld [vmem:[%s7223_s3 + $0x98] sm:$0xff]  }
 0x1a1   : > { %v1289_v32 = vpop.f32.mrb[92].mxu0 }
 0x1a2   : > { %5525 = vmatmul.mubr.msk.bf16.gmra.mrb[76].mxu1 %vm1950_vm3, %v1873_v63  ;;  %v1290_v33 = vadd.f32 %v6224_v35, %v1289_v32  ;;  %v5214_v34 = vpop.f32.mrb[93].mxu0 }
 0x1a3   : > { %5528 = vmatprep.mubr.msk.bf16.mxu1 %vm6027_vm0, %v6026_v1  ;;  %v1292_v37 = vpop.f32.mrb[94].mxu0 }
 0x1a4   : > { %v1750_v38 = vmax.f32 %v1290_v33, 0.0  ;;  %v1293_v39 = vadd.f32 %v6224_v35, %v1292_v37  ;;  %v5215_v40 = vpop.f32.mrb[95].mxu0 }
 0x1a6   : > { %v1751_v41 = vmax.f32 %v1293_v39, 0.0  ;;  %5321 = vmatmul.mubr.msk.bf16.gmra.mrb[200].mxu0 %vm841_vm2, %v5938_v36 }
 0x1a7   : > { %5324 = vmatprep.mubr.msk.bf16.mxu0 %vm6027_vm0, %v6026_v1 }
 0x1a8   : > { %v1877_v42 = vpack.c.bf16 %v1751_v41, %v1750_v38  ;;  %v5949_v38 = vld [vmem:[%s6103_s15 + $0x1c0] sm:$0xff]  }
 0x1a9   : > { %v1297_v43 = vpop.f32.mrb[96].mxu0 }
 0x1aa   : > { %5529 = vmatmul.mubr.msk.bf16.gmra.mrb[80].mxu1 %vm1950_vm3, %v1874_v10  ;;  %v1298_v44 = vadd.f32 %v6224_v35, %v1297_v43  ;;  %v5218_v46 = vpop.f32.mrb[97].mxu0 }
 0x1ab   : > { %5536 = vmatprep.mubr.msk.bf16.mxu1 %vm6027_vm0, %v6026_v1  ;;  %v1300_v48 = vpop.f32.mrb[98].mxu0 }
 0x1ac   : > { %v1752_v49 = vmax.f32 %v1298_v44, 0.0  ;;  %v1301_v50 = vadd.f32 %v6224_v35, %v1300_v48  ;;  %v5219_v51 = vpop.f32.mrb[99].mxu0 }
 0x1ae   : > { %v1753_v52 = vmax.f32 %v1301_v50, 0.0  ;;  %5325 = vmatmul.mubr.msk.bf16.gmra.mrb[204].mxu0 %vm841_vm2, %v5940_v47 }
 0x1af   : > { %5328 = vmatprep.mubr.msk.bf16.mxu0 %vm6027_vm0, %v6026_v1 }
 0x1b0   : > { %v1878_v54 = vpack.c.bf16 %v1753_v52, %v1752_v49  ;;  %v5951_v49 = vld [vmem:[%s6103_s15 + $0x1c8] sm:$0xff]  }
 0x1b1   : > { %v1305_v56 = vpop.f32.mrb[100].mxu0 }
 0x1b2   : > { %5537 = vmatmul.mubr.msk.bf16.vlgmr.msra.gmra.mrb[84].mxu1 %vm1950_vm3, %v1875_v20  ;;  %v1306_v45 = vadd.f32 %v6224_v35, %v1305_v56  ;;  %v5222_v57 = vpop.f32.mrb[101].mxu0 }
 0x1b3   : > { %5549 = vmatpush3.bf16.msra.mxu1 %v5936_v53  ;;  %5540 = vmatprep.mubr.msk.bf16.mxu1 %vm6027_vm0, %v6026_v1  ;;  %v1308_v60 = vpop.f32.mrb[102].mxu0 }
 0x1b4   : > { %5550 = vmatprep.subr.bf16.mxu1 %v6026_v1  ;;  %v1754_v61 = vmax.f32 %v1306_v45, 0.0  ;;  %v1309_v62 = vadd.f32 %v6224_v35, %v1308_v60  ;;  %v5223_v63 = vpop.f32.mrb[103].mxu0 }
 0x1b6   : > { %v1755_v0 = vmax.f32 %v1309_v62, 0.0  ;;  %5329 = vmatmul.mubr.msk.bf16.gmra.mrb[208].mxu0 %vm841_vm2, %v5942_v58  ;;  %v5946_v58 = vld [vmem:[%s7223_s3 + $0xa0] sm:$0xff]  }
 0x1b7   : > { %5551 = vmatpush3.bf16.msra.mxu1 %v5939_v59  ;;  %5332 = vmatprep.mubr.msk.bf16.mxu0 %vm6027_vm0, %v6026_v1 }
 0x1b8   : > { %v1879_v3 = vpack.c.bf16 %v1755_v0, %v1754_v61  ;;  %5564 = vmatprep.subr.bf16.mxu1 %v6026_v1  ;;  %v5953_v0 = vld [vmem:[%s6103_s15 + $0x1d0] sm:$0xff]  }
 0x1b9   : > { %v1313_v4 = vpop.f32.mrb[104].mxu0 }
 0x1ba   : > { %5541 = vmatmul.mubr.msk.bf16.gmra.mrb[88].mxu1 %vm1950_vm3, %v1876_v31  ;;  %v1314_v5 = vadd.f32 %v6224_v35, %v1313_v4  ;;  %v5226_v55 = vpop.f32.mrb[105].mxu0 }
 0x1bb   : > { %5544 = vmatprep.mubr.msk.bf16.mxu1 %vm6027_vm0, %v6026_v1  ;;  %v1316_v7 = vpop.f32.mrb[106].mxu0 }
 0x1bc   : > { %v1756_v8 = vmax.f32 %v1314_v5, 0.0  ;;  %v1317_v9 = vadd.f32 %v6224_v35, %v1316_v7  ;;  %v5227_v10 = vpop.f32.mrb[107].mxu0 }
 0x1be   : > { %v1757_v11 = vmax.f32 %v1317_v9, 0.0  ;;  %5333 = vmatmul.mubr.msk.bf16.gmra.mrb[212].mxu0 %vm841_vm2, %v5943_v6 }
 0x1bf   : > { %5336 = vmatprep.mubr.msk.bf16.mxu0 %vm6027_vm0, %v6026_v1 }
 0x1c0   : > { %v1880_v12 = vpack.c.bf16 %v1757_v11, %v1756_v8 }
 0x1c1   : > { %v1321_v13 = vpop.f32.mrb[108].mxu0 }
 0x1c2   : > { %5545 = vmatmul.mubr.msk.bf16.gmra.mrb[92].mxu1 %vm1950_vm3, %v1877_v42  ;;  %v1322_v14 = vadd.f32 %v6224_v35, %v1321_v13  ;;  %v5230_v2 = vpop.f32.mrb[109].mxu0  ;;  %v6613_v13 = vld [vmem:[%s7222_s2] ss:$0 sm:$0xff] }
 0x1c3   : > { %5552 = vmatprep.mubr.msk.bf16.mxu1 %vm6027_vm0, %v6026_v1  ;;  %v1324_v16 = vpop.f32.mrb[110].mxu0 }
 0x1c4   : > { %v1758_v17 = vmax.f32 %v1322_v14, 0.0  ;;  %v1325_v18 = vadd.f32 %v6224_v35, %v1324_v16  ;;  %v5231_v19 = vpop.f32.mrb[111].mxu0 }
 0x1c6   : > { %v1759_v20 = vmax.f32 %v1325_v18, 0.0  ;;  %5337 = vmatmul.mubr.msk.bf16.gmra.mrb[216].mxu0 %vm841_vm2, %v5945_v15  ;;  %v5954_v15 = vld [vmem:[%s6103_s15 + $0x1d8] sm:$0xff]  }
 0x1c7   : > { %5340 = vmatprep.mubr.msk.bf16.mxu0 %vm6027_vm0, %v6026_v1 }
 0x1c8   : > { %v1881_v22 = vpack.c.bf16 %v1759_v20, %v1758_v17 }
 0x1c9   : > { %v1329_v23 = vpop.f32.mrb[112].mxu0 }
 0x1ca   : > { %5553 = vmatmul.mubr.msk.bf16.vlgmr.msra.gmra.mrb[96].mxu1 %vm1950_vm3, %v1878_v54  ;;  %v1330_v24 = vadd.f32 %v6224_v35, %v1329_v23  ;;  %v5234_v25 = vpop.f32.mrb[113].mxu0 }
 0x1cb   : > { %5565 = vmatpush3.bf16.msra.mxu1 %v5941_v21  ;;  %5556 = vmatprep.mubr.msk.bf16.mxu1 %vm6027_vm0, %v6026_v1  ;;  %v1332_v28 = vpop.f32.mrb[114].mxu0 }
 0x1cc   : > { %5566 = vmatprep.subr.bf16.mxu1 %v6026_v1  ;;  %v1760_v29 = vmax.f32 %v1330_v24, 0.0  ;;  %v1333_v30 = vadd.f32 %v6224_v35, %v1332_v28  ;;  %v5235_v31 = vpop.f32.mrb[115].mxu0 }
 0x1ce   : > { %v1761_v32 = vmax.f32 %v1333_v30, 0.0  ;;  %5341 = vmatmul.mubr.msk.bf16.gmra.mrb[220].mxu0 %vm841_vm2, %v5947_v26 }
 0x1cf   : > { %5567 = vmatpush3.bf16.msra.mxu1 %v5944_v27  ;;  %5344 = vmatprep.mubr.msk.bf16.mxu0 %vm6027_vm0, %v6026_v1 }
 0x1d0   : > { %v1882_v33 = vpack.c.bf16 %v1761_v32, %v1760_v29  ;;  %5580 = vmatprep.subr.bf16.mxu1 %v6026_v1  ;;  %v5956_v29 = vld [vmem:[%s6103_s15 + $0x1e0] sm:$0xff]  }
 0x1d1   : > { %v1337_v34 = vpop.f32.mrb[116].mxu0 }
 0x1d2   : > { %5557 = vmatmul.mubr.msk.bf16.gmra.mrb[100].mxu1 %vm1950_vm3, %v1879_v3  ;;  %v1338_v36 = vadd.f32 %v6224_v35, %v1337_v34  ;;  %v5238_v37 = vpop.f32.mrb[117].mxu0  ;;  %v5950_v3 = vld [vmem:[%s7223_s3 + $0xa8] sm:$0xff]  }
 0x1d3   : > { %5560 = vmatprep.mubr.msk.bf16.mxu1 %vm6027_vm0, %v6026_v1  ;;  %v1340_v39 = vpop.f32.mrb[118].mxu0 }
 0x1d4   : > { %v1762_v40 = vmax.f32 %v1338_v36, 0.0  ;;  %v1341_v41 = vadd.f32 %v6224_v35, %v1340_v39  ;;  %v5239_v42 = vpop.f32.mrb[119].mxu0 }
 0x1d6   : > { %v1763_v43 = vmax.f32 %v1341_v41, 0.0  ;;  %5345 = vmatmul.mubr.msk.bf16.gmra.mrb[224].mxu0 %vm841_vm2, %v5949_v38 }
 0x1d7   : > { %5348 = vmatprep.mubr.msk.bf16.mxu0 %vm6027_vm0, %v6026_v1 }
 0x1d8   : > { %v6571_v44 = vpack.c.bf16 %v1763_v43, %v1762_v40  ;;  %v5952_v40 = vld [vmem:[%s7223_s3 + $0xb0] sm:$0xff]  }
 0x1d9   : > { %v1345_v46 = vpop.f32.mrb[120].mxu0 }
 0x1da   : > { %5561 = vmatmul.mubr.msk.bf16.gmra.mrb[104].mxu1 %vm1950_vm3, %v1880_v12  ;;  %v1346_v47 = vadd.f32 %v6224_v35, %v1345_v46  ;;  %v5242_v48 = vpop.f32.mrb[121].mxu0 }
 0x1db   : > { %5568 = vmatprep.mubr.msk.bf16.mxu1 %vm6027_vm0, %v6026_v1  ;;  %v1348_v50 = vpop.f32.mrb[122].mxu0  ;;  %v5958_v48 = vld [vmem:[%s6103_s15 + $0x1e8] sm:$0xff]  }
 0x1dc   : > { %v1764_v51 = vmax.f32 %v1346_v47, 0.0  ;;  %v1349_v52 = vadd.f32 %v6224_v35, %v1348_v50  ;;  %v5243_v53 = vpop.f32.mrb[123].mxu0  ;;  %v5955_v50 = vld [vmem:[%s7223_s3 + $0xb8] sm:$0xff]  }
 0x1dd   : > { %v1994_v54 = vpop.f32.mrb[0].mxu1 }
 0x1de   : > { %v5426_v56 = vpop.f32.mrb[1].mxu1  ;;  %v1765_v45 = vmax.f32 %v1349_v52, 0.0  ;;  %5349 = vmatmul.mubr.msk.bf16.gmra.mrb[228].mxu0 %vm841_vm2, %v5951_v49  ;;  %v5979_v49 = vld [vmem:[%s7225_s5 + $0x8] sm:$0xff]  }
 0x1df   : > { %v6580_v57 = vpop.f32.mrb[2].mxu1  ;;  %5352 = vmatprep.mubr.msk.bf16.mxu0 %vm6027_vm0, %v6026_v1  ;;  %5835 = vmatpush3.bf16.msra.mxu0 %v5979_v49 }
 0x1e0   : > { %v5427_v59 = vpop.f32.mrb[3].mxu1  ;;  %v6587_v60 = vpack.c.bf16 %v1765_v45, %v1764_v51  ;;  %5836 = vmatprep.subr.bf16.mxu0 %v6026_v1 }
 0x1e1   : > { %v1353_v61 = vpop.f32.mrb[124].mxu0 }
 0x1e2   : > { %5569 = vmatmul.mubr.msk.bf16.vlgmr.msra.gmra.mrb[108].mxu1 %vm1950_vm3, %v1881_v22  ;;  %v1354_v62 = vadd.f32 %v6224_v35, %v1353_v61  ;;  %v5246_v63 = vpop.f32.mrb[125].mxu0 }
 0x1e3   : > { %5581 = vmatpush3.bf16.msra.mxu1 %v5946_v58  ;;  %5572 = vmatprep.mubr.msk.bf16.mxu1 %vm6027_vm0, %v6026_v1  ;;  %v1356_v4 = vpop.f32.mrb[126].mxu0 }
 0x1e4   : > { %5582 = vmatprep.subr.bf16.mxu1 %v6026_v1  ;;  %v1766_v5 = vmax.f32 %v1354_v62, 0.0  ;;  %v1357_v55 = vadd.f32 %v6224_v35, %v1356_v4  ;;  %v5247_v6 = vpop.f32.mrb[127].mxu0  ;;  %v5959_v4 = vld [vmem:[%s6103_s15 + $0x1f0] sm:$0xff]  }
 0x1e5   : > { %v6599_v7 = vpop.f32.mrb[4].mxu1 }
 0x1e6   : > { %v5430_v8 = vpop.f32.mrb[5].mxu1  ;;  %v1767_v9 = vmax.f32 %v1357_v55, 0.0  ;;  %5353 = vmatmul.mubr.msk.bf16.gmra.mrb[232].mxu0 %vm841_vm2, %v5953_v0 }
 0x1e7   : > { %v6602_v10 = vpop.f32.mrb[6].mxu1  ;;  %5583 = vmatpush3.bf16.msra.mxu1 %v5950_v3  ;;  %5356 = vmatprep.mubr.msk.bf16.mxu0 %vm6027_vm0, %v6026_v1 }
 0x1e8   : > { %v5431_v11 = vpop.f32.mrb[7].mxu1  ;;  %v6606_v12 = vpack.c.bf16 %v1767_v9, %v1766_v5  ;;  %5596 = vmatprep.subr.bf16.mxu1 %v6026_v1 }
 0x1e9   : > { %v1361_v35 = vpop.f32.mrb[128].mxu0 }
 0x1ea   : > { %5573 = vmatmul.mubr.msk.bf16.gmra.mrb[112].mxu1 %vm1950_vm3, %v1882_v33  ;;  %v1362_v14 = vadd.f32 %v6613_v13, %v1361_v35  ;;  %v5250_v2 = vpop.f32.mrb[129].mxu0 }
 0x1eb   : > { %5576 = vmatprep.mubr.msk.bf16.mxu1 %vm6027_vm0, %v6026_v1  ;;  %v1364_v16 = vpop.f32.mrb[130].mxu0 }
 0x1ec   : > { %v1768_v17 = vmax.f32 %v1362_v14, 0.0  ;;  %v1365_v18 = vadd.f32 %v6613_v13, %v1364_v16  ;;  %v5251_v19 = vpop.f32.mrb[131].mxu0 }
 0x1ed   : > { %v6620_v20 = vpop.f32.mrb[8].mxu1 }
 0x1ee   : > { %v5434_v21 = vpop.f32.mrb[9].mxu1  ;;  %v1769_v22 = vmax.f32 %v1365_v18, 0.0  ;;  %5357 = vmatmul.mubr.msk.bf16.gmra.mrb[236].mxu0 %vm841_vm2, %v5954_v15  ;;  %v5961_v18 = vld [vmem:[%s6103_s15 + $0x1f8] sm:$0xff]  }
 0x1ef   : > { %v6623_v23 = vpop.f32.mrb[10].mxu1  ;;  %5360 = vmatprep.mubr.msk.bf16.mxu0 %vm6027_vm0, %v6026_v1 }
 0x1f0   : > { %v5435_v24 = vpop.f32.mrb[11].mxu1  ;;  %v6627_v25 = vpack.c.bf16 %v1769_v22, %v1768_v17 }
 0x1f1   : > { %v1369_v26 = vpop.f32.mrb[132].mxu0 }
 0x1f2   : > { %5577 = vmatmul.mubr.msk.bf16.gmra.mrb[116].mxu1 %vm1950_vm3, %v6571_v44  ;;  %v1370_v27 = vadd.f32 %v6613_v13, %v1369_v26  ;;  %v5254_v28 = vpop.f32.mrb[133].mxu0 }
 0x1f3   : > { %5584 = vmatprep.mubr.msk.bf16.mxu1 %vm6027_vm0, %v6026_v1  ;;  %v1372_v30 = vpop.f32.mrb[134].mxu0  ;;  %v5957_v28 = vld [vmem:[%s7223_s3 + $0xc0] sm:$0xff]  }
 0x1f4   : > { %v1770_v31 = vmax.f32 %v1370_v27, 0.0  ;;  %v1373_v32 = vadd.f32 %v6613_v13, %v1372_v30  ;;  %v5255_v33 = vpop.f32.mrb[135].mxu0 }
 0x1f5   : > { %v2072_v34 = vpop.f32.mrb[12].mxu1 }
 0x1f6   : > { %v6636_v36 = vadd.f32 %v2072_v34, %v1994_v54  ;;  %v5442_v37 = vpop.f32.mrb[13].mxu1  ;;  %v1771_v38 = vmax.f32 %v1373_v32, 0.0  ;;  %5361 = vmatmul.mubr.msk.bf16.gmra.mrb[240].mxu0 %vm841_vm2, %v5956_v29 }
 0x1f7   : > { %v2075_v39 = vpop.f32.mrb[14].mxu1  ;;  %5364 = vmatprep.mubr.msk.bf16.mxu0 %vm6027_vm0, %v6026_v1  ;;  %v5960_v37 = vld [vmem:[%s7223_s3 + $0xc8] sm:$0xff]  }
 0x1f8   : > { %v6645_v41 = vadd.f32 %v2075_v39, %v6580_v57  ;;  %v5443_v42 = vpop.f32.mrb[15].mxu1  ;;  %v6647_v43 = vpack.c.bf16 %v1771_v38, %v1770_v31 }
 0x1f9   : > { %v1377_v44 = vpop.f32.mrb[136].mxu0 }
 0x1fa   : > { %5585 = vmatmul.mubr.msk.bf16.vlgmr.msra.gmra.mrb[120].mxu1 %vm1950_vm3, %v6587_v60  ;;  %v1378_v46 = vadd.f32 %v6613_v13, %v1377_v44  ;;  %v5258_v47 = vpop.f32.mrb[137].mxu0 }
 0x1fb   : > { %5597 = vmatpush3.bf16.msra.mxu1 %v5952_v40  ;;  %5588 = vmatprep.mubr.msk.bf16.mxu1 %vm6027_vm0, %v6026_v1  ;;  %v1380_v51 = vpop.f32.mrb[138].mxu0 }
 0x1fc   : > { %5598 = vmatprep.subr.bf16.mxu1 %v6026_v1  ;;  %v1772_v52 = vmax.f32 %v1378_v46, 0.0  ;;  %v1381_v53 = vadd.f32 %v6613_v13, %v1380_v51  ;;  %v5259_v54 = vpop.f32.mrb[139].mxu0 }
 0x1fd   : > { %v2080_v56 = vpop.f32.mrb[16].mxu1  ;;  %v5964_v54 = vld [vmem:[%s6103_s15 + $0x208] sm:$0xff]  }
 0x1fe   : > { %v6665_v45 = vadd.f32 %v2080_v56, %v6599_v7  ;;  %v5446_v57 = vpop.f32.mrb[17].mxu1  ;;  %v1773_v58 = vmax.f32 %v1381_v53, 0.0  ;;  %5365 = vmatmul.mubr.msk.bf16.gmra.mrb[244].mxu0 %vm841_vm2, %v5958_v48 }
 0x1ff   : > { %v2083_v59 = vpop.f32.mrb[18].mxu1  ;;  %5599 = vmatpush3.bf16.msra.mxu1 %v5955_v50  ;;  %5368 = vmatprep.mubr.msk.bf16.mxu0 %vm6027_vm0, %v6026_v1 }
 0x200   : > { %v6671_v60 = vadd.f32 %v2083_v59, %v6602_v10  ;;  %v5447_v61 = vpop.f32.mrb[19].mxu1  ;;  %v6673_v62 = vpack.c.bf16 %v1773_v58, %v1772_v52  ;;  %5612 = vmatprep.subr.bf16.mxu1 %v6026_v1 }
 0x201   : > { %v1385_v63 = vpop.f32.mrb[140].mxu0 }
 0x202   : > { %5589 = vmatmul.mubr.msk.bf16.gmra.mrb[124].mxu1 %vm1950_vm3, %v6606_v12  ;;  %v1386_v0 = vadd.f32 %v6613_v13, %v1385_v63  ;;  %v5262_v3 = vpop.f32.mrb[141].mxu0 }
 0x203   : > { %5592 = vmatprep.mubr.msk.bf16.mxu1 %vm6027_vm0, %v6026_v1  ;;  %v1388_v5 = vpop.f32.mrb[142].mxu0 }
 0x204   : > { %v1774_v55 = vmax.f32 %v1386_v0, 0.0  ;;  %v1389_v6 = vadd.f32 %v6613_v13, %v1388_v5  ;;  %v5263_v7 = vpop.f32.mrb[143].mxu0 }
 0x205   : > { %v2088_v8 = vpop.f32.mrb[20].mxu1  ;;  %v5966_v7 = vld [vmem:[%s6103_s15 + $0x210] sm:$0xff]  }
 0x206   : > { %v6684_v9 = vadd.f32 %v2088_v8, %v6620_v20  ;;  %v5450_v10 = vpop.f32.mrb[21].mxu1  ;;  %v1775_v11 = vmax.f32 %v1389_v6, 0.0  ;;  %5369 = vmatmul.mubr.msk.bf16.gmra.mrb[248].mxu0 %vm841_vm2, %v5959_v4 }
 0x207   : > { %v2091_v12 = vpop.f32.mrb[22].mxu1  ;;  %5372 = vmatprep.mubr.msk.bf16.mxu0 %vm6027_vm0, %v6026_v1 }
 0x208   : > { %v6690_v35 = vadd.f32 %v2091_v12, %v6623_v23  ;;  %v5451_v14 = vpop.f32.mrb[23].mxu1  ;;  %v6692_v2 = vpack.c.bf16 %v1775_v11, %v1774_v55 }
 0x209   : > { %v1393_v15 = vpop.f32.mrb[144].mxu0 }
 0x20a   : > { %5593 = vmatmul.mubr.msk.bf16.gmra.mrb[128].mxu1 %vm1950_vm3, %v6627_v25  ;;  %v1394_v16 = vadd.f32 %v6613_v13, %v1393_v15  ;;  %v5266_v17 = vpop.f32.mrb[145].mxu0 }
 0x20b   : > { %5600 = vmatprep.mubr.msk.bf16.mxu1 %vm6027_vm0, %v6026_v1  ;;  %v1396_v19 = vpop.f32.mrb[146].mxu0 }
 0x20c   : > { %v1776_v20 = vmax.f32 %v1394_v16, 0.0  ;;  %v1397_v21 = vadd.f32 %v6613_v13, %v1396_v19  ;;  %v5267_v22 = vpop.f32.mrb[147].mxu0  ;;  %v5962_v16 = vld [vmem:[%s7223_s3 + $0xd0] sm:$0xff]  }
 0x20d   : > { %v2155_v23 = vpop.f32.mrb[24].mxu1 }
 0x20e   : > { %v6702_v24 = vadd.f32 %v2155_v23, %v6636_v36  ;;  %v5458_v26 = vpop.f32.mrb[25].mxu1  ;;  %v1777_v27 = vmax.f32 %v1397_v21, 0.0  ;;  %5373 = vmatmul.mubr.msk.bf16.gmra.mrb[252].mxu0 %vm841_vm2, %v5961_v18  ;;  %v5963_v36 = vld [vmem:[%s6103_s15 + $0x200] sm:$0xff]   ;;  %v5968_v23 = vld [vmem:[%s6103_s15 + $0x218] sm:$0xff]  }
 0x20f   : > { %v2158_v25 = vpop.f32.mrb[26].mxu1  ;;  %5376 = vmatprep.mubr.msk.bf16.mxu0 %vm6027_vm0, %v6026_v1 }
 0x210   : > { %v6711_v29 = vadd.f32 %v2158_v25, %v6645_v41  ;;  %v5459_v30 = vpop.f32.mrb[27].mxu1  ;;  %v6713_v31 = vpack.c.bf16 %v1777_v27, %v1776_v20 }
 0x211   : > { %v1401_v32 = vpop.f32.mrb[148].mxu0 }
 0x212   : > { %5601 = vmatmul.mubr.msk.bf16.vlgmr.msra.gmra.mrb[132].mxu1 %vm1950_vm3, %v6647_v43  ;;  %v1402_v33 = vadd.f32 %v6613_v13, %v1401_v32  ;;  %v5270_v34 = vpop.f32.mrb[149].mxu0 }
 0x213   : > { %5613 = vmatpush3.bf16.msra.mxu1 %v5957_v28  ;;  %5604 = vmatprep.mubr.msk.bf16.mxu1 %vm6027_vm0, %v6026_v1  ;;  %v1404_v38 = vpop.f32.mrb[150].mxu0 }
 0x214   : > { %5614 = vmatprep.subr.bf16.mxu1 %v6026_v1  ;;  %v1778_v39 = vmax.f32 %v1402_v33, 0.0  ;;  %v1405_v40 = vadd.f32 %v6613_v13, %v1404_v38  ;;  %v5271_v41 = vpop.f32.mrb[151].mxu0 }
 0x215   : > { %v2163_v42 = vpop.f32.mrb[28].mxu1  ;;  %v5969_v41 = vld [vmem:[%s6103_s15 + $0x220] sm:$0xff]  }
 0x216   : > { %v6727_v43 = vadd.f32 %v2163_v42, %v6665_v45  ;;  %v5462_v44 = vpop.f32.mrb[29].mxu1  ;;  %v1779_v46 = vmax.f32 %v1405_v40, 0.0  ;;  %5377 = vmatmul.mubr.msk.bf16.gmra.mrb[0].mxu0 %vm841_vm2, %v5963_v36 }
 0x217   : > { %v2166_v47 = vpop.f32.mrb[30].mxu1  ;;  %5615 = vmatpush3.bf16.msra.mxu1 %v5960_v37  ;;  %5380 = vmatprep.mubr.msk.bf16.mxu0 %vm6027_vm0, %v6026_v1 }
 0x218   : > { %v6733_v48 = vadd.f32 %v2166_v47, %v6671_v60  ;;  %v5463_v49 = vpop.f32.mrb[31].mxu1  ;;  %v6735_v50 = vpack.c.bf16 %v1779_v46, %v1778_v39  ;;  %5628 = vmatprep.subr.bf16.mxu1 %v6026_v1 }
 0x219   : > { %v1409_v51 = vpop.f32.mrb[152].mxu0 }
 0x21a   : > { %5605 = vmatmul.mubr.msk.bf16.gmra.mrb[136].mxu1 %vm1950_vm3, %v6673_v62  ;;  %v1410_v52 = vadd.f32 %v6613_v13, %v1409_v51  ;;  %v5274_v53 = vpop.f32.mrb[153].mxu0 }
 0x21b   : > { %5608 = vmatprep.mubr.msk.bf16.mxu1 %vm6027_vm0, %v6026_v1  ;;  %v1412_v56 = vpop.f32.mrb[154].mxu0 }
 0x21c   : > { %v1780_v45 = vmax.f32 %v1410_v52, 0.0  ;;  %v1413_v57 = vadd.f32 %v6613_v13, %v1412_v56  ;;  %v5275_v58 = vpop.f32.mrb[155].mxu0 }
 0x21d   : > { %v2171_v59 = vpop.f32.mrb[32].mxu1  ;;  %v5971_v58 = vld [vmem:[%s6103_s15 + $0x228] sm:$0xff]  }
 0x21e   : > { %v6746_v60 = vadd.f32 %v2171_v59, %v6684_v9  ;;  %v5466_v61 = vpop.f32.mrb[33].mxu1  ;;  %v1781_v63 = vmax.f32 %v1413_v57, 0.0  ;;  %5381 = vmatmul.mubr.msk.bf16.gmra.mrb[4].mxu0 %vm841_vm2, %v5964_v54 }
 0x21f   : > { %v2174_v62 = vpop.f32.mrb[34].mxu1  ;;  %5384 = vmatprep.mubr.msk.bf16.mxu0 %vm6027_vm0, %v6026_v1 }
 0x220   : > { %v6752_v0 = vadd.f32 %v2174_v62, %v6690_v35  ;;  %v5467_v3 = vpop.f32.mrb[35].mxu1  ;;  %v6754_v4 = vpack.c.bf16 %v1781_v63, %v1780_v45 }
 0x221   : > { %v1417_v5 = vpop.f32.mrb[156].mxu0 }
 0x222   : > { %5609 = vmatmul.mubr.msk.bf16.gmra.mrb[140].mxu1 %vm1950_vm3, %v6692_v2  ;;  %v1418_v55 = vadd.f32 %v6613_v13, %v1417_v5  ;;  %v5278_v6 = vpop.f32.mrb[157].mxu0 }
 0x223   : > { %5616 = vmatprep.mubr.msk.bf16.mxu1 %vm6027_vm0, %v6026_v1  ;;  %v1420_v8 = vpop.f32.mrb[158].mxu0 }
 0x224   : > { %v1782_v9 = vmax.f32 %v1418_v55, 0.0  ;;  %v1421_v10 = vadd.f32 %v6613_v13, %v1420_v8  ;;  %v5279_v11 = vpop.f32.mrb[159].mxu0  ;;  %v5967_v55 = vld [vmem:[%s7223_s3 + $0xe0] sm:$0xff]  }
 0x225   : > { %v2244_v12 = vpop.f32.mrb[36].mxu1 }
 0x226   : > { %v6764_v35 = vadd.f32 %v2244_v12, %v6702_v24  ;;  %v5474_v14 = vpop.f32.mrb[37].mxu1  ;;  %v1783_v15 = vmax.f32 %v1421_v10, 0.0  ;;  %5385 = vmatmul.mubr.msk.bf16.gmra.mrb[8].mxu0 %vm841_vm2, %v5966_v7  ;;  %v5965_v24 = vld [vmem:[%s7223_s3 + $0xd8] sm:$0xff]   ;;  %v5973_v12 = vld [vmem:[%s6103_s15 + $0x230] sm:$0xff]  }
 0x227   : > { %v2247_v2 = vpop.f32.mrb[38].mxu1  ;;  %5388 = vmatprep.mubr.msk.bf16.mxu0 %vm6027_vm0, %v6026_v1 }
 0x228   : > { %v6773_v17 = vadd.f32 %v2247_v2, %v6711_v29  ;;  %v5475_v18 = vpop.f32.mrb[39].mxu1  ;;  %v6775_v19 = vpack.c.bf16 %v1783_v15, %v1782_v9 }
 0x229   : > { %v1425_v20 = vpop.f32.mrb[160].mxu0 }
 0x22a   : > { %5617 = vmatmul.mubr.msk.bf16.vlgmr.msra.gmra.mrb[144].mxu1 %vm1950_vm3, %v6713_v31  ;;  %v1426_v21 = vadd.f32 %v6613_v13, %v1425_v20  ;;  %v5282_v22 = vpop.f32.mrb[161].mxu0 }
 0x22b   : > { %5629 = vmatpush3.bf16.msra.mxu1 %v5962_v16  ;;  %5620 = vmatprep.mubr.msk.bf16.mxu1 %vm6027_vm0, %v6026_v1  ;;  %v1428_v26 = vpop.f32.mrb[162].mxu0 }
 0x22c   : > { %5630 = vmatprep.subr.bf16.mxu1 %v6026_v1  ;;  %v1784_v27 = vmax.f32 %v1426_v21, 0.0  ;;  %v1429_v25 = vadd.f32 %v6613_v13, %v1428_v26  ;;  %v5283_v28 = vpop.f32.mrb[163].mxu0 }
 0x22d   : > { %v2252_v29 = vpop.f32.mrb[40].mxu1  ;;  %v5974_v28 = vld [vmem:[%s6103_s15 + $0x238] sm:$0xff]  }
 0x22e   : > { %v5478_v30 = vpop.f32.mrb[41].mxu1  ;;  %v1785_v31 = vmax.f32 %v1429_v25, 0.0  ;;  %5389 = vmatmul.mubr.msk.bf16.gmra.mrb[12].mxu0 %vm841_vm2, %v5968_v23  ;;  %v6790_v32 = vadd.f32 %v2252_v29, %v6727_v43 }
 0x22f   : > { %v2255_v33 = vpop.f32.mrb[42].mxu1  ;;  %5631 = vmatpush3.bf16.msra.mxu1 %v5965_v24  ;;  %5392 = vmatprep.mubr.msk.bf16.mxu0 %vm6027_vm0, %v6026_v1 }
 0x230   : > { %v5479_v34 = vpop.f32.mrb[43].mxu1  ;;  %v6794_v36 = vpack.c.bf16 %v1785_v31, %v1784_v27  ;;  %5644 = vmatprep.subr.bf16.mxu1 %v6026_v1  ;;  %v6798_v37 = vadd.f32 %v2255_v33, %v6733_v48 }
 0x231   : > { %v1433_v38 = vpop.f32.mrb[164].mxu0 }
 0x232   : > { %5621 = vmatmul.mubr.msk.bf16.gmra.mrb[148].mxu1 %vm1950_vm3, %v6735_v50  ;;  %v1434_v39 = vadd.f32 %v6613_v13, %v1433_v38  ;;  %v5286_v40 = vpop.f32.mrb[165].mxu0 }
 0x233   : > { %5624 = vmatprep.mubr.msk.bf16.mxu1 %vm6027_vm0, %v6026_v1  ;;  %v1436_v42 = vpop.f32.mrb[166].mxu0 }
 0x234   : > { %v1786_v43 = vmax.f32 %v1434_v39, 0.0  ;;  %v1437_v44 = vadd.f32 %v6613_v13, %v1436_v42  ;;  %v5287_v46 = vpop.f32.mrb[167].mxu0 }
 0x235   : > { %v2260_v47 = vpop.f32.mrb[44].mxu1  ;;  %v5976_v46 = vld [vmem:[%s6103_s15 + $0x240] sm:$0xff]  }
 0x236   : > { %v5482_v48 = vpop.f32.mrb[45].mxu1  ;;  %v1787_v49 = vmax.f32 %v1437_v44, 0.0  ;;  %5393 = vmatmul.mubr.msk.bf16.gmra.mrb[16].mxu0 %vm841_vm2, %v5969_v41  ;;  %v6809_v50 = vadd.f32 %v2260_v47, %v6746_v60 }
 0x237   : > { %v2263_v51 = vpop.f32.mrb[46].mxu1  ;;  %5396 = vmatprep.mubr.msk.bf16.mxu0 %vm6027_vm0, %v6026_v1 }
 0x238   : > { %v5483_v52 = vpop.f32.mrb[47].mxu1  ;;  %v6813_v53 = vpack.c.bf16 %v1787_v49, %v1786_v43  ;;  %v6816_v54 = vadd.f32 %v2263_v51, %v6752_v0 }
 0x239   : > { %v1441_v56 = vpop.f32.mrb[168].mxu0 }
 0x23a   : > { %5625 = vmatmul.mubr.msk.bf16.gmra.mrb[152].mxu1 %vm1950_vm3, %v6754_v4  ;;  %v1442_v45 = vadd.f32 %v6613_v13, %v1441_v56  ;;  %v5290_v57 = vpop.f32.mrb[169].mxu0 }
 0x23b   : > { %5632 = vmatprep.mubr.msk.bf16.mxu1 %vm6027_vm0, %v6026_v1  ;;  %v1444_v59 = vpop.f32.mrb[170].mxu0 }
 0x23c   : > { %v1788_v60 = vmax.f32 %v1442_v45, 0.0  ;;  %v1445_v61 = vadd.f32 %v6613_v13, %v1444_v59  ;;  %v5291_v63 = vpop.f32.mrb[171].mxu0  ;;  %v5972_v45 = vld [vmem:[%s7223_s3 + $0xf0] sm:$0xff]  }
 0x23d   : > { %v2333_v62 = vpop.f32.mrb[48].mxu1 }
 0x23e   : > { %v5490_v0 = vpop.f32.mrb[49].mxu1  ;;  %v1789_v3 = vmax.f32 %v1445_v61, 0.0  ;;  %5397 = vmatmul.mubr.msk.bf16.gmra.mrb[20].mxu0 %vm841_vm2, %v5971_v58  ;;  %v6827_v4 = vadd.f32 %v2333_v62, %v6764_v35  ;;  %v5970_v35 = vld [vmem:[%s7223_s3 + $0xe8] sm:$0xff]  }
 0x23f   : > { %v2336_v5 = vpop.f32.mrb[50].mxu1  ;;  %5400 = vmatprep.mubr.msk.bf16.mxu0 %vm6027_vm0, %v6026_v1  ;;  %v5978_v62 = vld [vmem:[%s6103_s15 + $0x248] sm:$0xff]   ;;  %v5975_v0 = vld [vmem:[%s7223_s3 + $0xf8] sm:$0xff]  }
 0x240   : > { %v5491_v6 = vpop.f32.mrb[51].mxu1  ;;  %v6834_v7 = vpack.c.bf16 %v1789_v3, %v1788_v60  ;;  %v6837_v8 = vadd.f32 %v2336_v5, %v6773_v17 }
 0x241   : > { %v1449_v9 = vpop.f32.mrb[172].mxu0 }
 0x242   : > { %5633 = vmatmul.mubr.msk.bf16.vlgmr.msra.gmra.mrb[156].mxu1 %vm1950_vm3, %v6775_v19  ;;  %v1450_v10 = vadd.f32 %v6613_v13, %v1449_v9  ;;  %v5294_v11 = vpop.f32.mrb[173].mxu0 }
 0x243   : > { %5645 = vmatpush3.bf16.msra.mxu1 %v5967_v55  ;;  %5636 = vmatprep.mubr.msk.bf16.mxu1 %vm6027_vm0, %v6026_v1  ;;  %v1452_v14 = vpop.f32.mrb[174].mxu0 }
 0x244   : > { %5646 = vmatprep.subr.bf16.mxu1 %v6026_v1  ;;  %v1790_v15 = vmax.f32 %v1450_v10, 0.0  ;;  %v1453_v2 = vadd.f32 %v6613_v13, %v1452_v14  ;;  %v5295_v16 = vpop.f32.mrb[175].mxu0 }
 0x245   : > { %v2341_v17 = vpop.f32.mrb[52].mxu1  ;;  %v5980_v16 = vld [vmem:[%s6103_s15 + $0x250] sm:$0xff]   ;;  %s4481_s15 = sshll.u32 %s7229_s29, 3 }
 0x246   : > { %v6851_v18 = vadd.f32 %v2341_v17, %v6790_v32  ;;  %v5494_v19 = vpop.f32.mrb[53].mxu1  ;;  %v1791_v20 = vmax.f32 %v1453_v2, 0.0  ;;  %5401 = vmatmul.mubr.msk.bf16.gmra.mrb[24].mxu0 %vm841_vm2, %v5973_v12  ;;  %s278_s9 = scalar_lea.vmem %s7227_s7, %s4481_s15 }
 0x247   : > { %v2344_v21 = vpop.f32.mrb[54].mxu1  ;;  %5647 = vmatpush3.bf16.msra.mxu1 %v5970_v35  ;;  %5404 = vmatprep.mubr.msk.bf16.mxu0 %vm6027_vm0, %v6026_v1 }
 0x248   : > { %v6857_v22 = vadd.f32 %v2344_v21, %v6798_v37  ;;  %v5495_v23 = vpop.f32.mrb[55].mxu1  ;;  %v6859_v24 = vpack.c.bf16 %v1791_v20, %v1790_v15  ;;  %5660 = vmatprep.subr.bf16.mxu1 %v6026_v1 }
 0x249   : > { %v1457_v26 = vpop.f32.mrb[176].mxu0 }
 0x24a   : > { %5637 = vmatmul.mubr.msk.bf16.gmra.mrb[160].mxu1 %vm1950_vm3, %v6794_v36  ;;  %v1458_v27 = vadd.f32 %v6613_v13, %v1457_v26  ;;  %v5298_v25 = vpop.f32.mrb[177].mxu0 }
 0x24b   : > { %5640 = vmatprep.mubr.msk.bf16.mxu1 %vm6027_vm0, %v6026_v1  ;;  %v1460_v29 = vpop.f32.mrb[178].mxu0 }
 0x24c   : > { %v1792_v30 = vmax.f32 %v1458_v27, 0.0  ;;  %v1461_v31 = vadd.f32 %v6613_v13, %v1460_v29  ;;  %v5299_v32 = vpop.f32.mrb[179].mxu0 }
 0x24d   : > { %v2349_v33 = vpop.f32.mrb[56].mxu1 }
 0x24e   : > { %v6870_v34 = vadd.f32 %v2349_v33, %v6809_v50  ;;  %v5498_v37 = vpop.f32.mrb[57].mxu1  ;;  %v1793_v38 = vmax.f32 %v1461_v31, 0.0  ;;  %5405 = vmatmul.mubr.msk.bf16.gmra.mrb[28].mxu0 %vm841_vm2, %v5974_v28 }
 0x24f   : > { %v2352_v36 = vpop.f32.mrb[58].mxu1  ;;  %5408 = vmatprep.mubr.msk.bf16.mxu0 %vm6027_vm0, %v6026_v1 }
 0x250   : > { %v6876_v39 = vadd.f32 %v2352_v36, %v6816_v54  ;;  %v5499_v40 = vpop.f32.mrb[59].mxu1  ;;  %v6878_v41 = vpack.c.bf16 %v1793_v38, %v1792_v30 }
 0x251   : > { %v1465_v42 = vpop.f32.mrb[180].mxu0 }
 0x252   : > { %5641 = vmatmul.mubr.msk.bf16.gmra.mrb[164].mxu1 %vm1950_vm3, %v6813_v53  ;;  %v1466_v43 = vadd.f32 %v6613_v13, %v1465_v42  ;;  %v5302_v44 = vpop.f32.mrb[181].mxu0 }
 0x253   : > { %5648 = vmatprep.mubr.msk.bf16.mxu1 %vm6027_vm0, %v6026_v1  ;;  %v1468_v47 = vpop.f32.mrb[182].mxu0 }
 0x254   : > { %v1794_v48 = vmax.f32 %v1466_v43, 0.0  ;;  %v1469_v49 = vadd.f32 %v6613_v13, %v1468_v47  ;;  %v5303_v50 = vpop.f32.mrb[183].mxu0 }
 0x255   : > { %v2422_v51 = vpop.f32.mrb[60].mxu1  ;;  %v5981_v50 = vld [vmem:[%s7223_s3 + $0x108] sm:$0xff]  }
 0x256   : > { %v6888_v52 = vadd.f32 %v2422_v51, %v6827_v4  ;;  %v5506_v54 = vpop.f32.mrb[61].mxu1  ;;  %v1795_v56 = vmax.f32 %v1469_v49, 0.0  ;;  %5409 = vmatmul.mubr.msk.bf16.gmra.mrb[32].mxu0 %vm841_vm2, %v5976_v46 }
 0x257   : > { %v2425_v53 = vpop.f32.mrb[62].mxu1  ;;  %5412 = vmatprep.mubr.msk.bf16.mxu0 %vm6027_vm0, %v6026_v1 }
 0x258   : > { %v6897_v57 = vadd.f32 %v2425_v53, %v6837_v8  ;;  %v5507_v58 = vpop.f32.mrb[63].mxu1  ;;  %v6899_v59 = vpack.c.bf16 %v1795_v56, %v1794_v48 }
 0x259   : > { %v1473_v60 = vpop.f32.mrb[184].mxu0 }
 0x25a   : > { %5649 = vmatmul.mubr.msk.bf16.vlgmr.msra.gmra.mrb[168].mxu1 %vm1950_vm3, %v6834_v7  ;;  %v1474_v61 = vadd.f32 %v6613_v13, %v1473_v60  ;;  %v5306_v63 = vpop.f32.mrb[185].mxu0 }
 0x25b   : > { %5661 = vmatpush3.bf16.msra.mxu1 %v5972_v45  ;;  %5652 = vmatprep.mubr.msk.bf16.mxu1 %vm6027_vm0, %v6026_v1  ;;  %v1476_v3 = vpop.f32.mrb[186].mxu0 }
 0x25c   : > { %5662 = vmatprep.subr.bf16.mxu1 %v6026_v1  ;;  %v1796_v4 = vmax.f32 %v1474_v61, 0.0  ;;  %v1477_v5 = vadd.f32 %v6613_v13, %v1476_v3  ;;  %v5307_v55 = vpop.f32.mrb[187].mxu0 }
 0x25d   : > { %v2430_v6 = vpop.f32.mrb[64].mxu1 }
 0x25e   : > { %v2447_v7 = vadd.f32 %v2430_v6, %v6851_v18  ;;  %v5510_v8 = vpop.f32.mrb[65].mxu1  ;;  %v1797_v9 = vmax.f32 %v1477_v5, 0.0  ;;  %5413 = vmatmul.mubr.msk.bf16.gmra.mrb[36].mxu0 %vm841_vm2, %v5978_v62 }
 0x25f   : > { %v2433_v10 = vpop.f32.mrb[66].mxu1  ;;  %5663 = vmatpush3.bf16.msra.mxu1 %v5975_v0  ;;  %5416 = vmatprep.mubr.msk.bf16.mxu0 %vm6027_vm0, %v6026_v1 }
 0x260   : > { %v2448_v11 = vadd.f32 %v2433_v10, %v6857_v22  ;;  %v5511_v12 = vpop.f32.mrb[67].mxu1  ;;  %v6917_v35 = vpack.c.bf16 %v1797_v9, %v1796_v4  ;;  %5676 = vmatprep.subr.bf16.mxu1 %v6026_v1 }
 0x261   : > { %v1481_v14 = vpop.f32.mrb[188].mxu0 }
 0x262   : > { %5653 = vmatmul.mubr.msk.bf16.gmra.mrb[172].mxu1 %vm1950_vm3, %v6859_v24  ;;  %v1482_v15 = vadd.f32 %v6613_v13, %v1481_v14  ;;  %v5310_v2 = vpop.f32.mrb[189].mxu0 }
 0x263   : > { %5656 = vmatprep.mubr.msk.bf16.mxu1 %vm6027_vm0, %v6026_v1  ;;  %v1484_v17 = vpop.f32.mrb[190].mxu0 }
 0x264   : > { %v1798_v18 = vmax.f32 %v1482_v15, 0.0  ;;  %v1485_v19 = vadd.f32 %v6613_v13, %v1484_v17  ;;  %v5311_v20 = vpop.f32.mrb[191].mxu0 }
 0x265   : > { %v2438_v21 = vpop.f32.mrb[68].mxu1 }
 0x266   : > { %v2449_v22 = vadd.f32 %v2438_v21, %v6870_v34  ;;  %v5514_v23 = vpop.f32.mrb[69].mxu1  ;;  %v1799_v26 = vmax.f32 %v1485_v19, 0.0  ;;  %5417 = vmatmul.mubr.msk.bf16.gmra.mrb[40].mxu0 %vm841_vm2, %v5980_v16 }
 0x267   : > { %v2441_v24 = vpop.f32.mrb[70].mxu1  ;;  %5840 = vmatprep.mubr.msk.bf16.mxu0 %vm6027_vm0, %v6026_v1 }
 0x268   : > { %v2450_v27 = vadd.f32 %v2441_v24, %v6876_v39  ;;  %v5515_v25 = vpop.f32.mrb[71].mxu1  ;;  %v1901_v28 = vpack.c.bf16 %v1799_v26, %v1798_v18 }
 0x269   : > { %v1489_v29 = vpop.f32.mrb[192].mxu0 }
 0x26a   : > { %5657 = vmatmul.mubr.msk.bf16.gmra.mrb[176].mxu1 %vm1950_vm3, %v6878_v41  ;;  %v1490_v30 = vadd.f32 %v6613_v13, %v1489_v29  ;;  %v5314_v31 = vpop.f32.mrb[193].mxu0  ;;  %v5977_v41 = vld [vmem:[%s7223_s3 + $0x100] sm:$0xff]  }
 0x26b   : > { %5664 = vmatprep.mubr.msk.bf16.mxu1 %vm6027_vm0, %v6026_v1  ;;  %v1492_v32 = vpop.f32.mrb[194].mxu0 }
 0x26c   : > { %v1800_v33 = vmax.f32 %v1490_v30, 0.0  ;;  %v1493_v34 = vadd.f32 %v6613_v13, %v1492_v32  ;;  %v5315_v37 = vpop.f32.mrb[195].mxu0 }
 0x26d   : > { %v2511_v38 = vpop.f32.mrb[72].mxu1 }
 0x26e   : > { %v2534_v36 = vadd.f32 %v2511_v38, %v6888_v52  ;;  %v5522_v39 = vpop.f32.mrb[73].mxu1  ;;  %v1801_v40 = vmax.f32 %v1493_v34, 0.0 }
 0x26f   : > { %v2514_v42 = vpop.f32.mrb[74].mxu1 }
 0x270   : > { %v2535_v43 = vadd.f32 %v2514_v42, %v6897_v57  ;;  %v5523_v44 = vpop.f32.mrb[75].mxu1  ;;  %v1902_v46 = vpack.c.bf16 %v1801_v40, %v1800_v33  ;;  %v5983_v33 = vld [vmem:[%s7223_s3 + $0x118] sm:$0xff]  }
 0x271   : > { %v1497_v47 = vpop.f32.mrb[196].mxu0 }
 0x272   : > { %5665 = vmatmul.mubr.msk.bf16.vlgmr.msra.gmra.mrb[180].mxu1 %vm1950_vm3, %v6899_v59  ;;  %v1498_v48 = vadd.f32 %v6613_v13, %v1497_v47  ;;  %v5318_v49 = vpop.f32.mrb[197].mxu0 }
 0x273   : > { %5677 = vmatpush3.bf16.msra.mxu1 %v5977_v41  ;;  %5668 = vmatprep.mubr.msk.bf16.mxu1 %vm6027_vm0, %v6026_v1  ;;  %v1500_v51 = vpop.f32.mrb[198].mxu0 }
 0x274   : > { %5678 = vmatprep.subr.bf16.mxu1 %v6026_v1  ;;  %v1802_v52 = vmax.f32 %v1498_v48, 0.0  ;;  %v1501_v54 = vadd.f32 %v6613_v13, %v1500_v51  ;;  %v5319_v56 = vpop.f32.mrb[199].mxu0  ;;  %v5994_v48 = vld [vmem:[%s7225_s5 + $0x10] sm:$0xff]  }
 0x275   : > { %v2519_v53 = vpop.f32.mrb[76].mxu1  ;;  %5837 = vmatpush3.bf16.msra.mxu0 %v5994_v48 }
 0x276   : > { %v2536_v45 = vadd.f32 %v2519_v53, %v2447_v7  ;;  %v5526_v57 = vpop.f32.mrb[77].mxu1  ;;  %v1803_v58 = vmax.f32 %v1501_v54, 0.0  ;;  %5838 = vmatprep.subr.bf16.mxu0 %v6026_v1 }
 0x277   : > { %v2522_v59 = vpop.f32.mrb[78].mxu1  ;;  %5679 = vmatpush3.bf16.msra.mxu1 %v5981_v50 }
 0x278   : > { %v2537_v60 = vadd.f32 %v2522_v59, %v2448_v11  ;;  %v5527_v61 = vpop.f32.mrb[79].mxu1  ;;  %v1903_v63 = vpack.c.bf16 %v1803_v58, %v1802_v52  ;;  %5692 = vmatprep.subr.bf16.mxu1 %v6026_v1 }
 0x279   : > { %v1505_v62 = vpop.f32.mrb[200].mxu0 }
 0x27a   : > { %5669 = vmatmul.mubr.msk.bf16.gmra.mrb[184].mxu1 %vm1950_vm3, %v6917_v35  ;;  %v1506_v0 = vadd.f32 %v6613_v13, %v1505_v62  ;;  %v5322_v3 = vpop.f32.mrb[201].mxu0 }
 0x27b   : > { %5672 = vmatprep.mubr.msk.bf16.mxu1 %vm6027_vm0, %v6026_v1  ;;  %v1508_v4 = vpop.f32.mrb[202].mxu0 }
 0x27c   : > { %v1804_v5 = vmax.f32 %v1506_v0, 0.0  ;;  %v1509_v55 = vadd.f32 %v6613_v13, %v1508_v4  ;;  %v5323_v6 = vpop.f32.mrb[203].mxu0 }
 0x27d   : > { %v2527_v7 = vpop.f32.mrb[80].mxu1 }
 0x27e   : > { %v2538_v8 = vadd.f32 %v2527_v7, %v2449_v22  ;;  %v5530_v9 = vpop.f32.mrb[81].mxu1  ;;  %v1805_v10 = vmax.f32 %v1509_v55, 0.0 }
 0x27f   : > { %v2530_v11 = vpop.f32.mrb[82].mxu1 }
 0x280   : > { %v2539_v12 = vadd.f32 %v2530_v11, %v2450_v27  ;;  %v5531_v14 = vpop.f32.mrb[83].mxu1  ;;  %v1904_v15 = vpack.c.bf16 %v1805_v10, %v1804_v5  ;;  %v5982_v27 = vld [vmem:[%s7223_s3 + $0x110] sm:$0xff]  }
 0x281   : > { %v1513_v35 = vpop.f32.mrb[204].mxu0  ;;  %v5984_v14 = vld [vmem:[%s7223_s3 + $0x120] sm:$0xff]  }
 0x282   : > { %5673 = vmatmul.mubr.msk.bf16.gmra.mrb[188].mxu1 %vm1950_vm3, %v1901_v28  ;;  %v1514_v2 = vadd.f32 %v6613_v13, %v1513_v35  ;;  %v5326_v16 = vpop.f32.mrb[205].mxu0 }
 0x283   : > { %5680 = vmatprep.mubr.msk.bf16.mxu1 %vm6027_vm0, %v6026_v1  ;;  %v1516_v17 = vpop.f32.mrb[206].mxu0 }
 0x284   : > { %v1806_v18 = vmax.f32 %v1514_v2, 0.0  ;;  %v1517_v19 = vadd.f32 %v6613_v13, %v1516_v17  ;;  %v5327_v20 = vpop.f32.mrb[207].mxu0 }
 0x285   : > { %v2600_v21 = vpop.f32.mrb[84].mxu1 }
 0x286   : > { %v2623_v22 = vadd.f32 %v2600_v21, %v2534_v36  ;;  %v5538_v23 = vpop.f32.mrb[85].mxu1  ;;  %v1807_v26 = vmax.f32 %v1517_v19, 0.0  ;;  %v5985_v19 = vld [vmem:[%s7223_s3 + $0x128] sm:$0xff]  }
 0x287   : > { %v2603_v24 = vpop.f32.mrb[86].mxu1 }
 0x288   : > { %v2624_v25 = vadd.f32 %v2603_v24, %v2535_v43  ;;  %v5539_v28 = vpop.f32.mrb[87].mxu1  ;;  %v1905_v29 = vpack.c.bf16 %v1807_v26, %v1806_v18 }
 0x289   : > { %v1521_v30 = vpop.f32.mrb[208].mxu0 }
 0x28a   : > { %5681 = vmatmul.mubr.msk.bf16.vlgmr.msra.gmra.mrb[192].mxu1 %vm1950_vm3, %v1902_v46  ;;  %v1522_v31 = vadd.f32 %v6613_v13, %v1521_v30  ;;  %v5330_v32 = vpop.f32.mrb[209].mxu0 }
 0x28b   : > { %5693 = vmatpush3.bf16.msra.mxu1 %v5982_v27  ;;  %5684 = vmatprep.mubr.msk.bf16.mxu1 %vm6027_vm0, %v6026_v1  ;;  %v1524_v34 = vpop.f32.mrb[210].mxu0 }
 0x28c   : > { %5694 = vmatprep.subr.bf16.mxu1 %v6026_v1  ;;  %v1808_v37 = vmax.f32 %v1522_v31, 0.0  ;;  %v1525_v38 = vadd.f32 %v6613_v13, %v1524_v34  ;;  %v5331_v36 = vpop.f32.mrb[211].mxu0 }
 0x28d   : > { %v2608_v39 = vpop.f32.mrb[88].mxu1  ;;  %v7015_v36 = vld [vmem:[%s7222_s2] ss:$0 sm:$0xff] }
 0x28e   : > { %v2625_v40 = vadd.f32 %v2608_v39, %v2536_v45  ;;  %v5542_v42 = vpop.f32.mrb[89].mxu1  ;;  %v1809_v41 = vmax.f32 %v1525_v38, 0.0 }
 0x28f   : > { %v2611_v43 = vpop.f32.mrb[90].mxu1  ;;  %5695 = vmatpush3.bf16.msra.mxu1 %v5983_v33 }
 0x290   : > { %v2626_v44 = vadd.f32 %v2611_v43, %v2537_v60  ;;  %v5543_v46 = vpop.f32.mrb[91].mxu1  ;;  %v6977_v47 = vpack.c.bf16 %v1809_v41, %v1808_v37  ;;  %5708 = vmatprep.subr.bf16.mxu1 %v6026_v1 }
 0x291   : > { %v1529_v49 = vpop.f32.mrb[212].mxu0 }
 0x292   : > { %5685 = vmatmul.mubr.msk.bf16.gmra.mrb[196].mxu1 %vm1950_vm3, %v1903_v63  ;;  %v1530_v50 = vadd.f32 %v6613_v13, %v1529_v49  ;;  %v5334_v51 = vpop.f32.mrb[213].mxu0 }
 0x293   : > { %5688 = vmatprep.mubr.msk.bf16.mxu1 %vm6027_vm0, %v6026_v1  ;;  %v1532_v52 = vpop.f32.mrb[214].mxu0 }
 0x294   : > { %v1810_v54 = vmax.f32 %v1530_v50, 0.0  ;;  %v1533_v56 = vadd.f32 %v6613_v13, %v1532_v52  ;;  %v5335_v53 = vpop.f32.mrb[215].mxu0 }
 0x295   : > { %v2616_v45 = vpop.f32.mrb[92].mxu1 }
 0x296   : > { %v2627_v57 = vadd.f32 %v2616_v45, %v2538_v8  ;;  %v5546_v58 = vpop.f32.mrb[93].mxu1  ;;  %v1811_v59 = vmax.f32 %v1533_v56, 0.0 }
 0x297   : > { %v2619_v60 = vpop.f32.mrb[94].mxu1 }
 0x298   : > { %v2628_v61 = vadd.f32 %v2619_v60, %v2539_v12  ;;  %v5547_v63 = vpop.f32.mrb[95].mxu1  ;;  %v1907_v62 = vpack.c.bf16 %v1811_v59, %v1810_v54 }
 0x299   : > { %v1537_v0 = vpop.f32.mrb[216].mxu0 }
 0x29a   : > { %5689 = vmatmul.mubr.msk.bf16.gmra.mrb[200].mxu1 %vm1950_vm3, %v1904_v15  ;;  %v1538_v3 = vadd.f32 %v6613_v13, %v1537_v0  ;;  %v5338_v4 = vpop.f32.mrb[217].mxu0 }
 0x29b   : > { %5696 = vmatprep.mubr.msk.bf16.mxu1 %vm6027_vm0, %v6026_v1  ;;  %v1540_v5 = vpop.f32.mrb[218].mxu0 }
 0x29c   : > { %v1812_v55 = vmax.f32 %v1538_v3, 0.0  ;;  %v1541_v6 = vadd.f32 %v6613_v13, %v1540_v5  ;;  %v5339_v7 = vpop.f32.mrb[219].mxu0 }
 0x29d   : > { %v2689_v8 = vpop.f32.mrb[96].mxu1 }
 0x29e   : > { %v2712_v9 = vadd.f32 %v2689_v8, %v2623_v22  ;;  %v5554_v10 = vpop.f32.mrb[97].mxu1  ;;  %v1813_v11 = vmax.f32 %v1541_v6, 0.0 }
 0x29f   : > { %v2692_v12 = vpop.f32.mrb[98].mxu1 }
 0x2a0   : > { %v2713_v15 = vadd.f32 %v2692_v12, %v2624_v25  ;;  %v5555_v35 = vpop.f32.mrb[99].mxu1  ;;  %v1908_v2 = vpack.c.bf16 %v1813_v11, %v1812_v55  ;;  %v5987_v55 = vld [vmem:[%s7223_s3 + $0x138] sm:$0xff]  }
 0x2a1   : > { %v1545_v16 = vpop.f32.mrb[220].mxu0 }
 0x2a2   : > { %5697 = vmatmul.mubr.msk.bf16.vlgmr.msra.gmra.mrb[204].mxu1 %vm1950_vm3, %v1905_v29  ;;  %v1546_v17 = vadd.f32 %v6613_v13, %v1545_v16  ;;  %v5342_v18 = vpop.f32.mrb[221].mxu0 }
 0x2a3   : > { %5709 = vmatpush3.bf16.msra.mxu1 %v5984_v14  ;;  %5700 = vmatprep.mubr.msk.bf16.mxu1 %vm6027_vm0, %v6026_v1  ;;  %v1548_v20 = vpop.f32.mrb[222].mxu0 }
 0x2a4   : > { %5710 = vmatprep.subr.bf16.mxu1 %v6026_v1  ;;  %v1814_v21 = vmax.f32 %v1546_v17, 0.0  ;;  %v1549_v22 = vadd.f32 %v6613_v13, %v1548_v20  ;;  %v5343_v23 = vpop.f32.mrb[223].mxu0 }
 0x2a5   : > { %v2697_v26 = vpop.f32.mrb[100].mxu1 }
 0x2a6   : > { %v2714_v24 = vadd.f32 %v2697_v26, %v2625_v40  ;;  %v5558_v27 = vpop.f32.mrb[101].mxu1  ;;  %v1815_v25 = vmax.f32 %v1549_v22, 0.0 }
 0x2a7   : > { %v2700_v28 = vpop.f32.mrb[102].mxu1  ;;  %5711 = vmatpush3.bf16.msra.mxu1 %v5985_v19 }
 0x2a8   : > { %v2715_v29 = vadd.f32 %v2700_v28, %v2626_v44  ;;  %v5559_v30 = vpop.f32.mrb[103].mxu1  ;;  %v1909_v31 = vpack.c.bf16 %v1815_v25, %v1814_v21  ;;  %5724 = vmatprep.subr.bf16.mxu1 %v6026_v1 }
 0x2a9   : > { %v1553_v32 = vpop.f32.mrb[224].mxu0 }
 0x2aa   : > { %5701 = vmatmul.mubr.msk.bf16.gmra.mrb[208].mxu1 %vm1950_vm3, %v6977_v47  ;;  %v1554_v33 = vadd.f32 %v6613_v13, %v1553_v32  ;;  %v5346_v34 = vpop.f32.mrb[225].mxu0 }
 0x2ab   : > { %5704 = vmatprep.mubr.msk.bf16.mxu1 %vm6027_vm0, %v6026_v1  ;;  %v1556_v37 = vpop.f32.mrb[226].mxu0 }
 0x2ac   : > { %v1816_v38 = vmax.f32 %v1554_v33, 0.0  ;;  %v1557_v39 = vadd.f32 %v7015_v36, %v1556_v37  ;;  %v5347_v40 = vpop.f32.mrb[227].mxu0 }
 0x2ad   : > { %v2705_v42 = vpop.f32.mrb[104].mxu1 }
 0x2ae   : > { %v2716_v41 = vadd.f32 %v2705_v42, %v2627_v57  ;;  %v5562_v43 = vpop.f32.mrb[105].mxu1  ;;  %v1817_v44 = vmax.f32 %v1557_v39, 0.0 }
 0x2af   : > { %v2708_v46 = vpop.f32.mrb[106].mxu1 }
 0x2b0   : > { %v2717_v13 = vadd.f32 %v2708_v46, %v2628_v61  ;;  %v5563_v47 = vpop.f32.mrb[107].mxu1  ;;  %v1910_v48 = vpack.c.bf16 %v1817_v44, %v1816_v38  ;;  %v5986_v61 = vld [vmem:[%s7223_s3 + $0x130] sm:$0xff]  }
 0x2b1   : > { %v1561_v49 = vpop.f32.mrb[228].mxu0 }
 0x2b2   : > { %5705 = vmatmul.mubr.msk.bf16.gmra.mrb[212].mxu1 %vm1950_vm3, %v1907_v62  ;;  %v1562_v50 = vadd.f32 %v7015_v36, %v1561_v49  ;;  %v5350_v51 = vpop.f32.mrb[229].mxu0 }
 0x2b3   : > { %5712 = vmatprep.mubr.msk.bf16.mxu1 %vm6027_vm0, %v6026_v1  ;;  %v1564_v52 = vpop.f32.mrb[230].mxu0 }
 0x2b4   : > { %v1818_v54 = vmax.f32 %v1562_v50, 0.0  ;;  %v1565_v56 = vadd.f32 %v7015_v36, %v1564_v52  ;;  %v5351_v53 = vpop.f32.mrb[231].mxu0 }
 0x2b5   : > { %v2778_v45 = vpop.f32.mrb[108].mxu1 }
 0x2b6   : > { %v2801_v57 = vadd.f32 %v2778_v45, %v2712_v9  ;;  %v5570_v58 = vpop.f32.mrb[109].mxu1  ;;  %v1819_v59 = vmax.f32 %v1565_v56, 0.0 }
 0x2b7   : > { %v2781_v60 = vpop.f32.mrb[110].mxu1 }
 0x2b8   : > { %v2802_v63 = vadd.f32 %v2781_v60, %v2713_v15  ;;  %v5571_v62 = vpop.f32.mrb[111].mxu1  ;;  %v1911_v0 = vpack.c.bf16 %v1819_v59, %v1818_v54  ;;  %v5989_v54 = vld [vmem:[%s7223_s3 + $0x148] sm:$0xff]  }
 0x2b9   : > { %v1569_v3 = vpop.f32.mrb[232].mxu0 }
 0x2ba   : > { %5713 = vmatmul.mubr.msk.bf16.vlgmr.msra.gmra.mrb[216].mxu1 %vm1950_vm3, %v1908_v2  ;;  %v1570_v4 = vadd.f32 %v7015_v36, %v1569_v3  ;;  %v5354_v5 = vpop.f32.mrb[233].mxu0 }
 0x2bb   : > { %5725 = vmatpush3.bf16.msra.mxu1 %v5986_v61  ;;  %5716 = vmatprep.mubr.msk.bf16.mxu1 %vm6027_vm0, %v6026_v1  ;;  %v1572_v6 = vpop.f32.mrb[234].mxu0 }
 0x2bc   : > { %5726 = vmatprep.subr.bf16.mxu1 %v6026_v1  ;;  %v1820_v7 = vmax.f32 %v1570_v4, 0.0  ;;  %v1573_v8 = vadd.f32 %v7015_v36, %v1572_v6  ;;  %v5355_v9 = vpop.f32.mrb[235].mxu0 }
 0x2bd   : > { %v2786_v10 = vpop.f32.mrb[112].mxu1 }
 0x2be   : > { %v2803_v11 = vadd.f32 %v2786_v10, %v2714_v24  ;;  %v5574_v12 = vpop.f32.mrb[113].mxu1  ;;  %v1821_v14 = vmax.f32 %v1573_v8, 0.0 }
 0x2bf   : > { %v2789_v15 = vpop.f32.mrb[114].mxu1  ;;  %5727 = vmatpush3.bf16.msra.mxu1 %v5987_v55 }
 0x2c0   : > { %v2804_v35 = vadd.f32 %v2789_v15, %v2715_v29  ;;  %v5575_v2 = vpop.f32.mrb[115].mxu1  ;;  %v1912_v16 = vpack.c.bf16 %v1821_v14, %v1820_v7  ;;  %5740 = vmatprep.subr.bf16.mxu1 %v6026_v1 }
 0x2c1   : > { %v1577_v17 = vpop.f32.mrb[236].mxu0 }
 0x2c2   : > { %5717 = vmatmul.mubr.msk.bf16.gmra.mrb[220].mxu1 %vm1950_vm3, %v1909_v31  ;;  %v1578_v18 = vadd.f32 %v7015_v36, %v1577_v17  ;;  %v5358_v19 = vpop.f32.mrb[237].mxu0 }
 0x2c3   : > { %5720 = vmatprep.mubr.msk.bf16.mxu1 %vm6027_vm0, %v6026_v1  ;;  %v1580_v20 = vpop.f32.mrb[238].mxu0 }
 0x2c4   : > { %v1822_v21 = vmax.f32 %v1578_v18, 0.0  ;;  %v1581_v22 = vadd.f32 %v7015_v36, %v1580_v20  ;;  %v5359_v23 = vpop.f32.mrb[239].mxu0 }
 0x2c5   : > { %v2794_v26 = vpop.f32.mrb[116].mxu1 }
 0x2c6   : > { %v2805_v24 = vadd.f32 %v2794_v26, %v2716_v41  ;;  %v5578_v27 = vpop.f32.mrb[117].mxu1  ;;  %v1823_v25 = vmax.f32 %v1581_v22, 0.0 }
 0x2c7   : > { %v2797_v28 = vpop.f32.mrb[118].mxu1 }
 0x2c8   : > { %v2806_v29 = vadd.f32 %v2797_v28, %v2717_v13  ;;  %v5579_v30 = vpop.f32.mrb[119].mxu1  ;;  %v1913_v32 = vpack.c.bf16 %v1823_v25, %v1822_v21  ;;  %v5988_v13 = vld [vmem:[%s7223_s3 + $0x140] sm:$0xff]  }
 0x2c9   : > { %v1585_v31 = vpop.f32.mrb[240].mxu0 }
 0x2ca   : > { %5721 = vmatmul.mubr.msk.bf16.gmra.mrb[224].mxu1 %vm1950_vm3, %v1910_v48  ;;  %v1586_v33 = vadd.f32 %v7015_v36, %v1585_v31  ;;  %v5362_v34 = vpop.f32.mrb[241].mxu0 }
 0x2cb   : > { %5728 = vmatprep.mubr.msk.bf16.mxu1 %vm6027_vm0, %v6026_v1  ;;  %v1588_v37 = vpop.f32.mrb[242].mxu0 }
 0x2cc   : > { %v1824_v38 = vmax.f32 %v1586_v33, 0.0  ;;  %v1589_v39 = vadd.f32 %v7015_v36, %v1588_v37  ;;  %v5363_v40 = vpop.f32.mrb[243].mxu0 }
 0x2cd   : > { %v2867_v42 = vpop.f32.mrb[120].mxu1 }
 0x2ce   : > { %v2890_v41 = vadd.f32 %v2867_v42, %v2801_v57  ;;  %v5586_v43 = vpop.f32.mrb[121].mxu1  ;;  %v1825_v44 = vmax.f32 %v1589_v39, 0.0 }
 0x2cf   : > { %v2870_v46 = vpop.f32.mrb[122].mxu1 }
 0x2d0   : > { %v2891_v47 = vadd.f32 %v2870_v46, %v2802_v63  ;;  %v5587_v48 = vpop.f32.mrb[123].mxu1  ;;  %v1914_v49 = vpack.c.bf16 %v1825_v44, %v1824_v38  ;;  %v5991_v38 = vld [vmem:[%s7223_s3 + $0x158] sm:$0xff]  }
 0x2d1   : > { %v1593_v50 = vpop.f32.mrb[244].mxu0 }
 0x2d2   : > { %5729 = vmatmul.mubr.msk.bf16.vlgmr.msra.gmra.mrb[228].mxu1 %vm1950_vm3, %v1911_v0  ;;  %v1594_v51 = vadd.f32 %v7015_v36, %v1593_v50  ;;  %v5366_v52 = vpop.f32.mrb[245].mxu0 }
 0x2d3   : > { %5741 = vmatpush3.bf16.msra.mxu1 %v5988_v13  ;;  %5732 = vmatprep.mubr.msk.bf16.mxu1 %vm6027_vm0, %v6026_v1  ;;  %v1596_v56 = vpop.f32.mrb[246].mxu0 }
 0x2d4   : > { %5742 = vmatprep.subr.bf16.mxu1 %v6026_v1  ;;  %v1826_v53 = vmax.f32 %v1594_v51, 0.0  ;;  %v1597_v45 = vadd.f32 %v7015_v36, %v1596_v56  ;;  %v5367_v57 = vpop.f32.mrb[247].mxu0 }
 0x2d5   : > { %v2875_v58 = vpop.f32.mrb[124].mxu1 }
 0x2d6   : > { %v2892_v59 = vadd.f32 %v2875_v58, %v2803_v11  ;;  %v5590_v60 = vpop.f32.mrb[125].mxu1  ;;  %v1827_v61 = vmax.f32 %v1597_v45, 0.0 }
 0x2d7   : > { %v2878_v63 = vpop.f32.mrb[126].mxu1  ;;  %5743 = vmatpush3.bf16.msra.mxu1 %v5989_v54 }
 0x2d8   : > { %v2893_v62 = vadd.f32 %v2878_v63, %v2804_v35  ;;  %v5591_v0 = vpop.f32.mrb[127].mxu1  ;;  %v1915_v3 = vpack.c.bf16 %v1827_v61, %v1826_v53  ;;  %5756 = vmatprep.subr.bf16.mxu1 %v6026_v1 }
 0x2d9   : > { %v1601_v4 = vpop.f32.mrb[248].mxu0 }
 0x2da   : > { %5733 = vmatmul.mubr.msk.bf16.gmra.mrb[232].mxu1 %vm1950_vm3, %v1912_v16  ;;  %v1602_v5 = vadd.f32 %v7015_v36, %v1601_v4  ;;  %v5370_v55 = vpop.f32.mrb[249].mxu0 }
 0x2db   : > { %5736 = vmatprep.mubr.msk.bf16.mxu1 %vm6027_vm0, %v6026_v1  ;;  %v1604_v6 = vpop.f32.mrb[250].mxu0 }
 0x2dc   : > { %v1828_v7 = vmax.f32 %v1602_v5, 0.0  ;;  %v1605_v8 = vadd.f32 %v7015_v36, %v1604_v6  ;;  %v5371_v9 = vpop.f32.mrb[251].mxu0 }
 0x2dd   : > { %v2883_v10 = vpop.f32.mrb[128].mxu1 }
 0x2de   : > { %v2894_v11 = vadd.f32 %v2883_v10, %v2805_v24  ;;  %v5594_v12 = vpop.f32.mrb[129].mxu1  ;;  %v1829_v14 = vmax.f32 %v1605_v8, 0.0 }
 0x2df   : > { %v2886_v15 = vpop.f32.mrb[130].mxu1 }
 0x2e0   : > { %v2895_v35 = vadd.f32 %v2886_v15, %v2806_v29  ;;  %v5595_v2 = vpop.f32.mrb[131].mxu1  ;;  %v1916_v17 = vpack.c.bf16 %v1829_v14, %v1828_v7  ;;  %v5990_v29 = vld [vmem:[%s7223_s3 + $0x150] sm:$0xff]  }
 0x2e1   : > { %v1609_v16 = vpop.f32.mrb[252].mxu0 }
 0x2e2   : > { %5737 = vmatmul.mubr.msk.bf16.gmra.mrb[236].mxu1 %vm1950_vm3, %v1913_v32  ;;  %v1610_v18 = vadd.f32 %v7015_v36, %v1609_v16  ;;  %v5374_v19 = vpop.f32.mrb[253].mxu0 }
 0x2e3   : > { %5744 = vmatprep.mubr.msk.bf16.mxu1 %vm6027_vm0, %v6026_v1  ;;  %v1612_v20 = vpop.f32.mrb[254].mxu0 }
 0x2e4   : > { %v1830_v21 = vmax.f32 %v1610_v18, 0.0  ;;  %v1613_v22 = vadd.f32 %v7015_v36, %v1612_v20  ;;  %v5375_v23 = vpop.f32.mrb[255].mxu0 }
 0x2e5   : > { %v2956_v26 = vpop.f32.mrb[132].mxu1 }
 0x2e6   : > { %v2979_v24 = vadd.f32 %v2956_v26, %v2890_v41  ;;  %v5602_v27 = vpop.f32.mrb[133].mxu1  ;;  %v1831_v25 = vmax.f32 %v1613_v22, 0.0 }
 0x2e7   : > { %v2959_v28 = vpop.f32.mrb[134].mxu1 }
 0x2e8   : > { %v2980_v30 = vadd.f32 %v2959_v28, %v2891_v47  ;;  %v5603_v32 = vpop.f32.mrb[135].mxu1  ;;  %v1917_v31 = vpack.c.bf16 %v1831_v25, %v1830_v21  ;;  %v5993_v21 = vld [vmem:[%s7223_s3 + $0x168] sm:$0xff]  }
 0x2e9   : > { %v1617_v33 = vpop.f32.mrb[0].mxu0 }
 0x2ea   : > { %5745 = vmatmul.mubr.msk.bf16.vlgmr.msra.gmra.mrb[240].mxu1 %vm1950_vm3, %v1914_v49  ;;  %v1618_v34 = vadd.f32 %v7015_v36, %v1617_v33  ;;  %v5378_v37 = vpop.f32.mrb[1].mxu0 }
 0x2eb   : > { %5757 = vmatpush3.bf16.msra.mxu1 %v5990_v29  ;;  %5748 = vmatprep.mubr.msk.bf16.mxu1 %vm6027_vm0, %v6026_v1  ;;  %v1620_v39 = vpop.f32.mrb[2].mxu0 }
 0x2ec   : > { %5758 = vmatprep.subr.bf16.mxu1 %v6026_v1  ;;  %v1832_v40 = vmax.f32 %v1618_v34, 0.0  ;;  %v1621_v42 = vadd.f32 %v7015_v36, %v1620_v39  ;;  %v5379_v41 = vpop.f32.mrb[3].mxu0 }
 0x2ed   : > { %v2964_v43 = vpop.f32.mrb[136].mxu1 }
 0x2ee   : > { %v2981_v44 = vadd.f32 %v2964_v43, %v2892_v59  ;;  %v5606_v46 = vpop.f32.mrb[137].mxu1  ;;  %v1833_v13 = vmax.f32 %v1621_v42, 0.0 }
 0x2ef   : > { %v2967_v47 = vpop.f32.mrb[138].mxu1  ;;  %5759 = vmatpush3.bf16.msra.mxu1 %v5991_v38 }
 0x2f0   : > { %v2982_v48 = vadd.f32 %v2967_v47, %v2893_v62  ;;  %v5607_v49 = vpop.f32.mrb[139].mxu1  ;;  %v1918_v50 = vpack.c.bf16 %v1833_v13, %v1832_v40  ;;  %5772 = vmatprep.subr.bf16.mxu1 %v6026_v1 }
 0x2f1   : > { %v1625_v51 = vpop.f32.mrb[4].mxu0 }
 0x2f2   : > { %5749 = vmatmul.mubr.msk.bf16.gmra.mrb[244].mxu1 %vm1950_vm3, %v1915_v3  ;;  %v1626_v52 = vadd.f32 %v7015_v36, %v1625_v51  ;;  %v5382_v54 = vpop.f32.mrb[5].mxu0 }
 0x2f3   : > { %5752 = vmatprep.mubr.msk.bf16.mxu1 %vm6027_vm0, %v6026_v1  ;;  %v1628_v56 = vpop.f32.mrb[6].mxu0 }
 0x2f4   : > { %v1834_v53 = vmax.f32 %v1626_v52, 0.0  ;;  %v1629_v45 = vadd.f32 %v7015_v36, %v1628_v56  ;;  %v5383_v57 = vpop.f32.mrb[7].mxu0 }
 0x2f5   : > { %v2972_v58 = vpop.f32.mrb[140].mxu1 }
 0x2f6   : > { %v2983_v59 = vadd.f32 %v2972_v58, %v2894_v11  ;;  %v5610_v60 = vpop.f32.mrb[141].mxu1  ;;  %v1835_v61 = vmax.f32 %v1629_v45, 0.0 }
 0x2f7   : > { %v2975_v63 = vpop.f32.mrb[142].mxu1 }
 0x2f8   : > { %v2984_v62 = vadd.f32 %v2975_v63, %v2895_v35  ;;  %v5611_v0 = vpop.f32.mrb[143].mxu1  ;;  %v1919_v4 = vpack.c.bf16 %v1835_v61, %v1834_v53  ;;  %v5992_v35 = vld [vmem:[%s7223_s3 + $0x160] sm:$0xff]  }
 0x2f9   : > { %v1633_v3 = vpop.f32.mrb[8].mxu0 }
 0x2fa   : > { %5753 = vmatmul.mubr.msk.bf16.gmra.mrb[248].mxu1 %vm1950_vm3, %v1916_v17  ;;  %v1634_v5 = vadd.f32 %v7015_v36, %v1633_v3  ;;  %v5386_v55 = vpop.f32.mrb[9].mxu0 }
 0x2fb   : > { %5760 = vmatprep.mubr.msk.bf16.mxu1 %vm6027_vm0, %v6026_v1  ;;  %v1636_v6 = vpop.f32.mrb[10].mxu0 }
 0x2fc   : > { %v1836_v7 = vmax.f32 %v1634_v5, 0.0  ;;  %v1637_v8 = vadd.f32 %v7015_v36, %v1636_v6  ;;  %v5387_v9 = vpop.f32.mrb[11].mxu0 }
 0x2fd   : > { %v3045_v10 = vpop.f32.mrb[144].mxu1 }
 0x2fe   : > { %v3068_v11 = vadd.f32 %v3045_v10, %v2979_v24  ;;  %v5618_v12 = vpop.f32.mrb[145].mxu1  ;;  %v1837_v14 = vmax.f32 %v1637_v8, 0.0 }
 0x2ff   : > { %v3048_v15 = vpop.f32.mrb[146].mxu1 }
 0x300   : > { %v3069_v2 = vadd.f32 %v3048_v15, %v2980_v30  ;;  %v5619_v17 = vpop.f32.mrb[147].mxu1  ;;  %v1920_v16 = vpack.c.bf16 %v1837_v14, %v1836_v7  ;;  %v5996_v7 = vld [vmem:[%s7223_s3 + $0x178] sm:$0xff]  }
 0x301   : > { %v1641_v18 = vpop.f32.mrb[12].mxu0 }
 0x302   : > { %5761 = vmatmul.mubr.msk.bf16.vlgmr.msra.gmra.mrb[252].mxu1 %vm1950_vm3, %v1917_v31  ;;  %v1642_v19 = vadd.f32 %v7015_v36, %v1641_v18  ;;  %v5390_v20 = vpop.f32.mrb[13].mxu0 }
 0x303   : > { %5773 = vmatpush3.bf16.msra.mxu1 %v5992_v35  ;;  %5764 = vmatprep.mubr.msk.bf16.mxu1 %vm6027_vm0, %v6026_v1  ;;  %v1644_v22 = vpop.f32.mrb[14].mxu0 }
 0x304   : > { %5774 = vmatprep.subr.bf16.mxu1 %v6026_v1  ;;  %v1838_v23 = vmax.f32 %v1642_v19, 0.0  ;;  %v1645_v26 = vadd.f32 %v7015_v36, %v1644_v22  ;;  %v5391_v24 = vpop.f32.mrb[15].mxu0 }
 0x305   : > { %v3053_v27 = vpop.f32.mrb[148].mxu1 }
 0x306   : > { %v3070_v25 = vadd.f32 %v3053_v27, %v2981_v44  ;;  %v5622_v28 = vpop.f32.mrb[149].mxu1  ;;  %v1839_v29 = vmax.f32 %v1645_v26, 0.0 }
 0x307   : > { %v3056_v30 = vpop.f32.mrb[150].mxu1  ;;  %5775 = vmatpush3.bf16.msra.mxu1 %v5993_v21 }
 0x308   : > { %v3071_v32 = vadd.f32 %v3056_v30, %v2982_v48  ;;  %v5623_v31 = vpop.f32.mrb[151].mxu1  ;;  %v1921_v33 = vpack.c.bf16 %v1839_v29, %v1838_v23  ;;  %5788 = vmatprep.subr.bf16.mxu1 %v6026_v1 }
 0x309   : > { %v1649_v34 = vpop.f32.mrb[16].mxu0 }
 0x30a   : > { %5765 = vmatmul.mubr.msk.bf16.gmra.mrb[0].mxu1 %vm1950_vm3, %v1918_v50  ;;  %v1650_v37 = vadd.f32 %v7015_v36, %v1649_v34  ;;  %v5394_v38 = vpop.f32.mrb[17].mxu0 }
 0x30b   : > { %5768 = vmatprep.mubr.msk.bf16.mxu1 %vm6027_vm0, %v6026_v1  ;;  %v1652_v39 = vpop.f32.mrb[18].mxu0 }
 0x30c   : > { %v1840_v40 = vmax.f32 %v1650_v37, 0.0  ;;  %v1653_v42 = vadd.f32 %v7015_v36, %v1652_v39  ;;  %v5395_v41 = vpop.f32.mrb[19].mxu0 }
 0x30d   : > { %v3061_v43 = vpop.f32.mrb[152].mxu1 }
 0x30e   : > { %v3072_v44 = vadd.f32 %v3061_v43, %v2983_v59  ;;  %v5626_v46 = vpop.f32.mrb[153].mxu1  ;;  %v1841_v13 = vmax.f32 %v1653_v42, 0.0 }
 0x30f   : > { %v3064_v47 = vpop.f32.mrb[154].mxu1 }
 0x310   : > { %v3073_v48 = vadd.f32 %v3064_v47, %v2984_v62  ;;  %v5627_v49 = vpop.f32.mrb[155].mxu1  ;;  %v1922_v51 = vpack.c.bf16 %v1841_v13, %v1840_v40  ;;  %v5995_v62 = vld [vmem:[%s7223_s3 + $0x170] sm:$0xff]  }
 0x311   : > { %v1657_v50 = vpop.f32.mrb[20].mxu0  ;;  %v5997_v49 = vld [vmem:[%s7223_s3 + $0x180] sm:$0xff]  }
 0x312   : > { %5769 = vmatmul.mubr.msk.bf16.gmra.mrb[4].mxu1 %vm1950_vm3, %v1919_v4  ;;  %v1658_v52 = vadd.f32 %v7015_v36, %v1657_v50  ;;  %v5398_v54 = vpop.f32.mrb[21].mxu0 }
 0x313   : > { %5776 = vmatprep.mubr.msk.bf16.mxu1 %vm6027_vm0, %v6026_v1  ;;  %v1660_v56 = vpop.f32.mrb[22].mxu0 }
 0x314   : > { %v1842_v53 = vmax.f32 %v1658_v52, 0.0  ;;  %v1661_v45 = vadd.f32 %v7015_v36, %v1660_v56  ;;  %v5399_v57 = vpop.f32.mrb[23].mxu0 }
 0x315   : > { %v3134_v58 = vpop.f32.mrb[156].mxu1 }
 0x316   : > { %v3157_v59 = vadd.f32 %v3134_v58, %v3068_v11  ;;  %v5634_v60 = vpop.f32.mrb[157].mxu1  ;;  %v1843_v61 = vmax.f32 %v1661_v45, 0.0  ;;  %v5998_v45 = vld [vmem:[%s7223_s3 + $0x188] sm:$0xff]  }
 0x317   : > { %v3137_v63 = vpop.f32.mrb[158].mxu1 }
 0x318   : > { %v3158_v0 = vadd.f32 %v3137_v63, %v3069_v2  ;;  %v5635_v4 = vpop.f32.mrb[159].mxu1  ;;  %v1923_v3 = vpack.c.bf16 %v1843_v61, %v1842_v53 }
 0x319   : > { %v1665_v5 = vpop.f32.mrb[24].mxu0 }
 0x31a   : > { %5777 = vmatmul.mubr.msk.bf16.vlgmr.msra.gmra.mrb[8].mxu1 %vm1950_vm3, %v1920_v16  ;;  %v1666_v55 = vadd.f32 %v7015_v36, %v1665_v5  ;;  %v5402_v6 = vpop.f32.mrb[25].mxu0 }
 0x31b   : > { %5789 = vmatpush3.bf16.msra.mxu1 %v5995_v62  ;;  %5780 = vmatprep.mubr.msk.bf16.mxu1 %vm6027_vm0, %v6026_v1  ;;  %v1668_v8 = vpop.f32.mrb[26].mxu0 }
 0x31c   : > { %5790 = vmatprep.subr.bf16.mxu1 %v6026_v1  ;;  %v1844_v9 = vmax.f32 %v1666_v55, 0.0  ;;  %v1669_v10 = vadd.f32 %v7015_v36, %v1668_v8  ;;  %v5403_v11 = vpop.f32.mrb[27].mxu0 }
 0x31d   : > { %v3142_v12 = vpop.f32.mrb[160].mxu1 }
 0x31e   : > { %v3159_v14 = vadd.f32 %v3142_v12, %v3070_v25  ;;  %v5638_v15 = vpop.f32.mrb[161].mxu1  ;;  %v1845_v35 = vmax.f32 %v1669_v10, 0.0 }
 0x31f   : > { %v3145_v2 = vpop.f32.mrb[162].mxu1  ;;  %5791 = vmatpush3.bf16.msra.mxu1 %v5996_v7 }
 0x320   : > { %v3160_v17 = vadd.f32 %v3145_v2, %v3071_v32  ;;  %v5639_v16 = vpop.f32.mrb[163].mxu1  ;;  %v1924_v18 = vpack.c.bf16 %v1845_v35, %v1844_v9  ;;  %5804 = vmatprep.subr.bf16.mxu1 %v6026_v1 }
 0x321   : > { %v1673_v19 = vpop.f32.mrb[28].mxu0 }
 0x322   : > { %5781 = vmatmul.mubr.msk.bf16.gmra.mrb[12].mxu1 %vm1950_vm3, %v1921_v33  ;;  %v1674_v20 = vadd.f32 %v7015_v36, %v1673_v19  ;;  %v5406_v21 = vpop.f32.mrb[29].mxu0  ;;  %v5999_v33 = vld [vmem:[%s7225_s5 + $0x18] sm:$0xff]  }
 0x323   : > { %5784 = vmatprep.mubr.msk.bf16.mxu1 %vm6027_vm0, %v6026_v1  ;;  %v1676_v22 = vpop.f32.mrb[30].mxu0  ;;  %5839 = vmatpush3.bf16.msra.mxu0 %v5999_v33 }
 0x324   : > { %v1846_v23 = vmax.f32 %v1674_v20, 0.0  ;;  %v1677_v26 = vadd.f32 %v7015_v36, %v1676_v22  ;;  %v5407_v24 = vpop.f32.mrb[31].mxu0 }
 0x325   : > { %v3150_v27 = vpop.f32.mrb[164].mxu1 }
 0x326   : > { %v3161_v25 = vadd.f32 %v3150_v27, %v3072_v44  ;;  %v5642_v28 = vpop.f32.mrb[165].mxu1  ;;  %v1847_v29 = vmax.f32 %v1677_v26, 0.0 }
 0x327   : > { %v3153_v30 = vpop.f32.mrb[166].mxu1 }
 0x328   : > { %v3162_v32 = vadd.f32 %v3153_v30, %v3073_v48  ;;  %v5643_v31 = vpop.f32.mrb[167].mxu1  ;;  %v1925_v34 = vpack.c.bf16 %v1847_v29, %v1846_v23 }
 0x329   : > { %v1681_v37 = vpop.f32.mrb[32].mxu0 }
 0x32a   : > { %5785 = vmatmul.mubr.msk.bf16.gmra.mrb[16].mxu1 %vm1950_vm3, %v1922_v51  ;;  %v1682_v38 = vadd.f32 %v7015_v36, %v1681_v37  ;;  %v5410_v39 = vpop.f32.mrb[33].mxu0 }
 0x32b   : > { %5792 = vmatprep.mubr.msk.bf16.mxu1 %vm6027_vm0, %v6026_v1  ;;  %v1684_v40 = vpop.f32.mrb[34].mxu0 }
 0x32c   : > { %v1848_v42 = vmax.f32 %v1682_v38, 0.0  ;;  %v1685_v41 = vadd.f32 %v7015_v36, %v1684_v40  ;;  %v5411_v43 = vpop.f32.mrb[35].mxu0 }
 0x32d   : > { %v3223_v44 = vpop.f32.mrb[168].mxu1 }
 0x32e   : > { %v3246_v46 = vadd.f32 %v3223_v44, %v3157_v59  ;;  %v5650_v13 = vpop.f32.mrb[169].mxu1  ;;  %v1849_v47 = vmax.f32 %v1685_v41, 0.0 }
 0x32f   : > { %v3226_v48 = vpop.f32.mrb[170].mxu1 }
 0x330   : > { %v3247_v51 = vadd.f32 %v3226_v48, %v3158_v0  ;;  %v5651_v50 = vpop.f32.mrb[171].mxu1  ;;  %v1926_v52 = vpack.c.bf16 %v1849_v47, %v1848_v42 }
 0x331   : > { %v1689_v54 = vpop.f32.mrb[36].mxu0 }
 0x332   : > { %5793 = vmatmul.mubr.msk.bf16.vlgmr.msra.gmra.mrb[20].mxu1 %vm1950_vm3, %v1923_v3  ;;  %v1690_v56 = vadd.f32 %v7015_v36, %v1689_v54  ;;  %v5414_v53 = vpop.f32.mrb[37].mxu0 }
 0x333   : > { %5805 = vmatpush3.bf16.msra.mxu1 %v5997_v49  ;;  %5796 = vmatprep.mubr.msk.bf16.mxu1 %vm6027_vm0, %v6026_v1  ;;  %v1692_v57 = vpop.f32.mrb[38].mxu0 }
 0x334   : > { %5806 = vmatprep.subr.bf16.mxu1 %v6026_v1  ;;  %v1850_v58 = vmax.f32 %v1690_v56, 0.0  ;;  %v1693_v59 = vadd.f32 %v7015_v36, %v1692_v57  ;;  %v5415_v60 = vpop.f32.mrb[39].mxu0 }
 0x335   : > { %v3231_v61 = vpop.f32.mrb[172].mxu1 }
 0x336   : > { %v3248_v63 = vadd.f32 %v3231_v61, %v3159_v14  ;;  %v5654_v62 = vpop.f32.mrb[173].mxu1  ;;  %v1851_v0 = vmax.f32 %v1693_v59, 0.0 }
 0x337   : > { %v3234_v4 = vpop.f32.mrb[174].mxu1  ;;  %5807 = vmatpush3.bf16.msra.mxu1 %v5998_v45 }
 0x338   : > { %v3249_v3 = vadd.f32 %v3234_v4, %v3160_v17  ;;  %v5655_v5 = vpop.f32.mrb[175].mxu1  ;;  %v1927_v55 = vpack.c.bf16 %v1851_v0, %v1850_v58  ;;  %5820 = vmatprep.subr.bf16.mxu1 %v6026_v1 }
 0x339   : > { %v1697_v6 = vpop.f32.mrb[40].mxu0 }
 0x33a   : > { %5797 = vmatmul.mubr.msk.bf16.gmra.mrb[24].mxu1 %vm1950_vm3, %v1924_v18  ;;  %v1698_v7 = vadd.f32 %v7015_v36, %v1697_v6  ;;  %v5418_v8 = vpop.f32.mrb[41].mxu0 }
 0x33b   : > { %5800 = vmatprep.mubr.msk.bf16.mxu1 %vm6027_vm0, %v6026_v1  ;;  %v1700_v9 = vpop.f32.mrb[42].mxu0 }
 0x33c   : > { %v1852_v10 = vmax.f32 %v1698_v7, 0.0  ;;  %v1701_v11 = vadd.f32 %v7015_v36, %v1700_v9  ;;  %v5419_v12 = vpop.f32.mrb[43].mxu0 }
 0x33d   : > { %v3239_v14 = vpop.f32.mrb[176].mxu1 }
 0x33e   : > { %v3250_v15 = vadd.f32 %v3239_v14, %v3161_v25  ;;  %v5658_v35 = vpop.f32.mrb[177].mxu1  ;;  %v1853_v2 = vmax.f32 %v1701_v11, 0.0 }
 0x33f   : > { %v3242_v17 = vpop.f32.mrb[178].mxu1 }
 0x340   : > { %v3251_v16 = vadd.f32 %v3242_v17, %v3162_v32  ;;  %v5659_v19 = vpop.f32.mrb[179].mxu1  ;;  %v1928_v20 = vpack.c.bf16 %v1853_v2, %v1852_v10 }
 0x342   : > { %5801 = vmatmul.mubr.msk.bf16.gmra.mrb[28].mxu1 %vm1950_vm3, %v1925_v34 }
 0x343   : > { %5808 = vmatprep.mubr.msk.bf16.mxu1 %vm6027_vm0, %v6026_v1 }
 0x345   : > { %v3312_v18 = vpop.f32.mrb[180].mxu1 }
 0x346   : > { %v3335_v21 = vadd.f32 %v3312_v18, %v3246_v46  ;;  %v5666_v22 = vpop.f32.mrb[181].mxu1 }
 0x347   : > { %v3315_v23 = vpop.f32.mrb[182].mxu1 }
 0x348   : > { %v3336_v26 = vadd.f32 %v3315_v23, %v3247_v51  ;;  %v5667_v36 = vpop.f32.mrb[183].mxu1  ;;  %v6000_v23 = vld [vmem:[%s7225_s5 + $0x20] sm:$0xff]  }
 0x34a   : > { %5809 = vmatmul.mubr.msk.bf16.vlgmr.msra.gmra.mrb[32].mxu1 %vm1950_vm3, %v1926_v52 }
 0x34b   : > { %5812 = vmatprep.mubr.msk.bf16.mxu1 %vm6027_vm0, %v6026_v1  ;;  %5821 = vmatpush3.bf16.msra.mxu1 %v6000_v23 }
 0x34c   : > { %5822 = vmatprep.subr.bf16.mxu1 %v6026_v1 }
 0x34d   : > { %v3320_v24 = vpop.f32.mrb[184].mxu1 }
 0x34e   : > { %v3337_v27 = vadd.f32 %v3320_v24, %v3248_v63  ;;  %v5670_v25 = vpop.f32.mrb[185].mxu1 }
 0x34f   : > { %v3323_v28 = vpop.f32.mrb[186].mxu1 }
 0x350   : > { %v3338_v29 = vadd.f32 %v3323_v28, %v3249_v3  ;;  %v5671_v30 = vpop.f32.mrb[187].mxu1 }
 0x352   : > { %5813 = vmatmul.mubr.msk.bf16.gmra.mrb[36].mxu1 %vm1950_vm3, %v1927_v55 }
 0x353   : > { %5816 = vmatprep.mubr.msk.bf16.mxu1 %vm6027_vm0, %v6026_v1 }
 0x355   : > { %v3328_v32 = vpop.f32.mrb[188].mxu1 }
 0x356   : > { %v3339_v31 = vadd.f32 %v3328_v32, %v3250_v15  ;;  %v5674_v34 = vpop.f32.mrb[189].mxu1 }
 0x357   : > { %v3331_v33 = vpop.f32.mrb[190].mxu1  ;;  %v6002_v34 = vld [vmem:[%s7225_s5 + $0x30] sm:$0xff]  }
 0x358   : > { %v3340_v37 = vadd.f32 %v3331_v33, %v3251_v16  ;;  %v5675_v38 = vpop.f32.mrb[191].mxu1 }
 0x35a   : > { %5817 = vmatmul.mubr.msk.bf16.gmra.mrb[40].mxu1 %vm1950_vm3, %v1928_v20 }
 0x35b   : > { %5828 = vmatprep.mubr.msk.bf16.mxu1 %vm6027_vm0, %v6026_v1 }
 0x35d   : > { %v3401_v39 = vpop.f32.mrb[192].mxu1 }
 0x35e   : > { %v3424_v40 = vadd.f32 %v3401_v39, %v3335_v21  ;;  %v5682_v42 = vpop.f32.mrb[193].mxu1  ;;  %v6003_v39 = vld [vmem:[%s7225_s5 + $0x38] sm:$0xff]  }
 0x35f   : > { %v3404_v41 = vpop.f32.mrb[194].mxu1 }
 0x360   : > { %v3425_v43 = vadd.f32 %v3404_v41, %v3336_v26  ;;  %v5683_v44 = vpop.f32.mrb[195].mxu1 }
 0x365   : > { %v3409_v46 = vpop.f32.mrb[196].mxu1 }
 0x366   : > { %v3426_v13 = vadd.f32 %v3409_v46, %v3337_v27  ;;  %v5686_v47 = vpop.f32.mrb[197].mxu1 }
 0x367   : > { %v3412_v48 = vpop.f32.mrb[198].mxu1 }
 0x368   : > { %v3427_v49 = vadd.f32 %v3412_v48, %v3338_v29  ;;  %v5687_v51 = vpop.f32.mrb[199].mxu1  ;;  %v6001_v29 = vld [vmem:[%s7225_s5 + $0x28] sm:$0xff]  }
 0x369   : > { %5823 = vmatpush3.bf16.msra.mxu1 %v6001_v29 }
 0x36a   : > { %5824 = vmatprep.subr.bf16.mxu1 %v6026_v1 }
 0x36d   : > { %v3417_v50 = vpop.f32.mrb[200].mxu1  ;;  %5825 = vmatpush3.bf16.msra.mxu1 %v6002_v34 }
 0x36e   : > { %v3428_v52 = vadd.f32 %v3417_v50, %v3339_v31  ;;  %v5690_v54 = vpop.f32.mrb[201].mxu1  ;;  %5826 = vmatprep.subr.bf16.mxu1 %v6026_v1 }
 0x36f   : > { %v3420_v56 = vpop.f32.mrb[202].mxu1 }
 0x370   : > { %v3429_v53 = vadd.f32 %v3420_v56, %v3340_v37  ;;  %v5691_v45 = vpop.f32.mrb[203].mxu1 }
 0x371   : > { %5827 = vmatpush3.bf16.msra.mxu1 %v6003_v39 }
 0x372   : > { %5844 = vmatprep.subr.bf16.mxu1 %v6026_v1 }
 0x375   : > { %v3490_v57 = vpop.f32.mrb[204].mxu1 }
 0x376   : > { %v3513_v58 = vadd.f32 %v3490_v57, %v3424_v40  ;;  %v5698_v59 = vpop.f32.mrb[205].mxu1 }
 0x377   : > { %v3493_v60 = vpop.f32.mrb[206].mxu1 }
 0x378   : > { %v3514_v61 = vadd.f32 %v3493_v60, %v3425_v43  ;;  %v5699_v63 = vpop.f32.mrb[207].mxu1 }
 0x37d   : > { %v3498_v62 = vpop.f32.mrb[208].mxu1 }
 0x37e   : > { %v3515_v0 = vadd.f32 %v3498_v62, %v3426_v13  ;;  %v5702_v4 = vpop.f32.mrb[209].mxu1 }
 0x37f   : > { %v3501_v3 = vpop.f32.mrb[210].mxu1 }
 0x380   : > { %v3516_v5 = vadd.f32 %v3501_v3, %v3427_v49  ;;  %v5703_v55 = vpop.f32.mrb[211].mxu1 }
 0x385   : > { %v3506_v6 = vpop.f32.mrb[212].mxu1 }
 0x386   : > { %v3517_v7 = vadd.f32 %v3506_v6, %v3428_v52  ;;  %v5706_v8 = vpop.f32.mrb[213].mxu1 }
 0x387   : > { %v3509_v9 = vpop.f32.mrb[214].mxu1 }
 0x388   : > { %v3518_v10 = vadd.f32 %v3509_v9, %v3429_v53  ;;  %v5707_v11 = vpop.f32.mrb[215].mxu1 }
 0x38d   : > { %v3579_v12 = vpop.f32.mrb[216].mxu1 }
 0x38e   : > { %v3602_v14 = vadd.f32 %v3579_v12, %v3513_v58  ;;  %v5714_v15 = vpop.f32.mrb[217].mxu1 }
 0x38f   : > { %v3582_v35 = vpop.f32.mrb[218].mxu1 }
 0x390   : > { %v3603_v2 = vadd.f32 %v3582_v35, %v3514_v61  ;;  %v5715_v17 = vpop.f32.mrb[219].mxu1 }
 0x395   : > { %v3587_v16 = vpop.f32.mrb[220].mxu1 }
 0x396   : > { %v3604_v19 = vadd.f32 %v3587_v16, %v3515_v0  ;;  %v5718_v20 = vpop.f32.mrb[221].mxu1 }
 0x397   : > { %v3590_v18 = vpop.f32.mrb[222].mxu1 }
 0x398   : > { %v3605_v21 = vadd.f32 %v3590_v18, %v3516_v5  ;;  %v5719_v22 = vpop.f32.mrb[223].mxu1 }
 0x39d   : > { %v3595_v26 = vpop.f32.mrb[224].mxu1 }
 0x39e   : > { %v3606_v36 = vadd.f32 %v3595_v26, %v3517_v7  ;;  %v5722_v24 = vpop.f32.mrb[225].mxu1 }
 0x39f   : > { %v3598_v27 = vpop.f32.mrb[226].mxu1 }
 0x3a0   : > { %v3607_v25 = vadd.f32 %v3598_v27, %v3518_v10  ;;  %v5723_v28 = vpop.f32.mrb[227].mxu1 }
 0x3a5   : > { %v3668_v30 = vpop.f32.mrb[228].mxu1 }
 0x3a6   : > { %v3691_v32 = vadd.f32 %v3668_v30, %v3602_v14  ;;  %v5730_v31 = vpop.f32.mrb[229].mxu1 }
 0x3a7   : > { %v3671_v33 = vpop.f32.mrb[230].mxu1 }
 0x3a8   : > { %v3692_v37 = vadd.f32 %v3671_v33, %v3603_v2  ;;  %v5731_v38 = vpop.f32.mrb[231].mxu1 }
 0x3ad   : > { %v3676_v40 = vpop.f32.mrb[232].mxu1 }
 0x3ae   : > { %v3693_v42 = vadd.f32 %v3676_v40, %v3604_v19  ;;  %v5734_v41 = vpop.f32.mrb[233].mxu1 }
 0x3af   : > { %v3679_v43 = vpop.f32.mrb[234].mxu1 }
 0x3b0   : > { %v3694_v44 = vadd.f32 %v3679_v43, %v3605_v21  ;;  %v5735_v46 = vpop.f32.mrb[235].mxu1 }
 0x3b5   : > { %v3684_v13 = vpop.f32.mrb[236].mxu1 }
 0x3b6   : > { %v3695_v47 = vadd.f32 %v3684_v13, %v3606_v36  ;;  %v5738_v48 = vpop.f32.mrb[237].mxu1 }
 0x3b7   : > { %v3687_v49 = vpop.f32.mrb[238].mxu1 }
 0x3b8   : > { %v3696_v51 = vadd.f32 %v3687_v49, %v3607_v25  ;;  %v5739_v50 = vpop.f32.mrb[239].mxu1 }
 0x3bd   : > { %v3757_v52 = vpop.f32.mrb[240].mxu1 }
 0x3be   : > { %v3780_v54 = vadd.f32 %v3757_v52, %v3691_v32  ;;  %v5746_v56 = vpop.f32.mrb[241].mxu1 }
 0x3bf   : > { %v3760_v53 = vpop.f32.mrb[242].mxu1 }
 0x3c0   : > { %v3781_v45 = vadd.f32 %v3760_v53, %v3692_v37  ;;  %v5747_v57 = vpop.f32.mrb[243].mxu1 }
 0x3c5   : > { %v3765_v58 = vpop.f32.mrb[244].mxu1 }
 0x3c6   : > { %v3782_v59 = vadd.f32 %v3765_v58, %v3693_v42  ;;  %v5750_v60 = vpop.f32.mrb[245].mxu1 }
 0x3c7   : > { %v3768_v61 = vpop.f32.mrb[246].mxu1 }
 0x3c8   : > { %v3783_v63 = vadd.f32 %v3768_v61, %v3694_v44  ;;  %v5751_v62 = vpop.f32.mrb[247].mxu1 }
 0x3cd   : > { %v3773_v0 = vpop.f32.mrb[248].mxu1 }
 0x3ce   : > { %v3784_v4 = vadd.f32 %v3773_v0, %v3695_v47  ;;  %v5754_v3 = vpop.f32.mrb[249].mxu1 }
 0x3cf   : > { %v3776_v5 = vpop.f32.mrb[250].mxu1 }
 0x3d0   : > { %v3785_v55 = vadd.f32 %v3776_v5, %v3696_v51  ;;  %v5755_v6 = vpop.f32.mrb[251].mxu1 }
 0x3d5   : > { %v3846_v7 = vpop.f32.mrb[252].mxu1 }
 0x3d6   : > { %v3869_v8 = vadd.f32 %v3846_v7, %v3780_v54  ;;  %v5762_v9 = vpop.f32.mrb[253].mxu1 }
 0x3d7   : > { %v3849_v10 = vpop.f32.mrb[254].mxu1 }
 0x3d8   : > { %v3870_v11 = vadd.f32 %v3849_v10, %v3781_v45  ;;  %v5763_v12 = vpop.f32.mrb[255].mxu1 }
 0x3dd   : > { %v3854_v14 = vpop.f32.mrb[0].mxu1 }
 0x3de   : > { %v3871_v15 = vadd.f32 %v3854_v14, %v3782_v59  ;;  %v5766_v35 = vpop.f32.mrb[1].mxu1 }
 0x3df   : > { %v3857_v2 = vpop.f32.mrb[2].mxu1 }
 0x3e0   : > { %v3872_v17 = vadd.f32 %v3857_v2, %v3783_v63  ;;  %v5767_v16 = vpop.f32.mrb[3].mxu1  ;;  %v4858_v63 = vld [vmem:[%s7224_s4] ss:$0 sm:$0xff] }
 0x3e5   : > { %v3862_v19 = vpop.f32.mrb[4].mxu1 }
 0x3e6   : > { %v3873_v20 = vadd.f32 %v3862_v19, %v3784_v4  ;;  %v5770_v18 = vpop.f32.mrb[5].mxu1 }
 0x3e7   : > { %v3865_v21 = vpop.f32.mrb[6].mxu1  ;;  %v6004_v18 = vld [vmem:[%s7225_s5 + $0x40] sm:$0xff]  }
 0x3e8   : > { %v3874_v22 = vadd.f32 %v3865_v21, %v3785_v55  ;;  %v5771_v23 = vpop.f32.mrb[7].mxu1 }
 0x3ed   : > { %v3935_v26 = vpop.f32.mrb[8].mxu1 }
 0x3ee   : > { %v3958_v36 = vadd.f32 %v3935_v26, %v3869_v8  ;;  %v5778_v24 = vpop.f32.mrb[9].mxu1 }
 0x3ef   : > { %v3938_v27 = vpop.f32.mrb[10].mxu1 }
 0x3f0   : > { %v3959_v25 = vadd.f32 %v3938_v27, %v3870_v11  ;;  %v5779_v28 = vpop.f32.mrb[11].mxu1 }
 0x3f5   : > { %v3943_v29 = vpop.f32.mrb[12].mxu1 }
 0x3f6   : > { %v3960_v30 = vadd.f32 %v3943_v29, %v3871_v15  ;;  %v5782_v32 = vpop.f32.mrb[13].mxu1 }
 0x3f7   : > { %v3946_v31 = vpop.f32.mrb[14].mxu1  ;;  %v6006_v32 = vld [vmem:[%s7225_s5 + $0x50] sm:$0xff]  }
 0x3f8   : > { %v3961_v34 = vadd.f32 %v3946_v31, %v3872_v17  ;;  %v5783_v33 = vpop.f32.mrb[15].mxu1 }
 0x3fd   : > { %v3951_v37 = vpop.f32.mrb[16].mxu1 }
 0x3fe   : > { %v3962_v38 = vadd.f32 %v3951_v37, %v3873_v20  ;;  %v5786_v39 = vpop.f32.mrb[17].mxu1 }
 0x3ff   : > { %v3954_v40 = vpop.f32.mrb[18].mxu1 }
 0x400   : > { %v3963_v42 = vadd.f32 %v3954_v40, %v3874_v22  ;;  %v5787_v41 = vpop.f32.mrb[19].mxu1 }
 0x405   : > { %v4024_v43 = vpop.f32.mrb[20].mxu1 }
 0x406   : > { %v4047_v44 = vadd.f32 %v4024_v43, %v3958_v36  ;;  %v5794_v46 = vpop.f32.mrb[21].mxu1 }
 0x407   : > { %v4027_v13 = vpop.f32.mrb[22].mxu1 }
 0x408   : > { %v4048_v47 = vadd.f32 %v4027_v13, %v3959_v25  ;;  %v5795_v48 = vpop.f32.mrb[23].mxu1  ;;  %v6005_v25 = vld [vmem:[%s7225_s5 + $0x48] sm:$0xff]  }
 0x40d   : > { %v4032_v49 = vpop.f32.mrb[24].mxu1 }
 0x40e   : > { %v4049_v51 = vadd.f32 %v4032_v49, %v3960_v30  ;;  %v5798_v50 = vpop.f32.mrb[25].mxu1 }
 0x40f   : > { %v4035_v52 = vpop.f32.mrb[26].mxu1 }
 0x410   : > { %v4050_v54 = vadd.f32 %v4035_v52, %v3961_v34  ;;  %v5799_v56 = vpop.f32.mrb[27].mxu1  ;;  %v6007_v34 = vld [vmem:[%s7225_s5 + $0x58] sm:$0xff]  }
 0x415   : > { %v4040_v53 = vpop.f32.mrb[28].mxu1 }
 0x416   : > { %v4051_v45 = vadd.f32 %v4040_v53, %v3962_v38  ;;  %v5802_v57 = vpop.f32.mrb[29].mxu1 }
 0x417   : > { %v4043_v58 = vpop.f32.mrb[30].mxu1 }
 0x418   : > { %v4052_v59 = vadd.f32 %v4043_v58, %v3963_v42  ;;  %v5803_v60 = vpop.f32.mrb[31].mxu1 }
 0x41d   : > { %v4113_v61 = vpop.f32.mrb[32].mxu1 }
 0x41e   : > { %v4136_v62 = vadd.f32 %v4113_v61, %v4047_v44  ;;  %v5810_v0 = vpop.f32.mrb[33].mxu1 }
 0x41f   : > { %v4116_v4 = vpop.f32.mrb[34].mxu1 }
 0x420   : > { %v4149_v3 = vadd.f32 %v4858_v63, %v4136_v62  ;;  %v4137_v5 = vadd.f32 %v4116_v4, %v4048_v47  ;;  %v5811_v55 = vpop.f32.mrb[35].mxu1  ;;  %v4890_v47 = vld [vmem:[%s7226_s6] ss:$0 sm:$0xff] }
 0x422   : > { %v4150_v6 = vadd.f32 %v4858_v63, %v4137_v5  ;;  %v4155_v7 = vmax.f32 %v4149_v3, 0.0 }
 0x424   : > { %v4156_v8 = vmax.f32 %v4150_v6, 0.0 }
 0x425   : > { %v4121_v9 = vpop.f32.mrb[36].mxu1 }
 0x426   : > { %v4161_v10 = vpack.c.bf16 %v4156_v8, %v4155_v7  ;;  %v4138_v11 = vadd.f32 %v4121_v9, %v4049_v51  ;;  %v5814_v12 = vpop.f32.mrb[37].mxu1 }
 0x427   : > { %v4124_v14 = vpop.f32.mrb[38].mxu1 }
 0x428   : > { %v4151_v15 = vadd.f32 %v4858_v63, %v4138_v11  ;;  %v4139_v35 = vadd.f32 %v4124_v14, %v4050_v54  ;;  %v5815_v2 = vpop.f32.mrb[39].mxu1  ;;  %5841 = vmatmul.mubr.msk.bf16.vlgmr.msra.gmra.mrb[44].mxu0 %vm4205_vm4, %v4161_v10 }
 0x42a   : > { %v4152_v17 = vadd.f32 %v4858_v63, %v4139_v35  ;;  %v4157_v16 = vmax.f32 %v4151_v15, 0.0 }
 0x42c   : > { %v4158_v19 = vmax.f32 %v4152_v17, 0.0 }
 0x42d   : > { %v4129_v20 = vpop.f32.mrb[40].mxu1 }
 0x42e   : > { %v4162_v21 = vpack.c.bf16 %v4158_v19, %v4157_v16  ;;  %v4140_v22 = vadd.f32 %v4129_v20, %v4051_v45  ;;  %v5818_v23 = vpop.f32.mrb[41].mxu1 }
 0x42f   : > { %v4132_v26 = vpop.f32.mrb[42].mxu1 }
 0x430   : > { %v4153_v36 = vadd.f32 %v4858_v63, %v4140_v22  ;;  %v4141_v24 = vadd.f32 %v4132_v26, %v4052_v59  ;;  %5829 = vmatmul.mubr.msk.bf16.vlgmr.msra.gmra.mrb[44].mxu1 %vm4205_vm4, %v4162_v21  ;;  %v5819_v27 = vpop.f32.mrb[43].mxu1 }
 0x431   : > { %5845 = vmatpush3.bf16.msra.mxu1 %v6004_v18  ;;  %5852 = vmatprep.mubr.msk.bf16.mxu1 %vm6027_vm0, %v6026_v1 }
 0x432   : > { %v4154_v28 = vadd.f32 %v4858_v63, %v4141_v24  ;;  %5846 = vmatprep.subr.bf16.mxu1 %v6026_v1  ;;  %v4159_v29 = vmax.f32 %v4153_v36, 0.0 }
 0x434   : > { %v4160_v30 = vmax.f32 %v4154_v28, 0.0 }
 0x435   : > { %5847 = vmatpush3.bf16.msra.mxu1 %v6005_v25 }
 0x436   : > { %v4163_v31 = vpack.c.bf16 %v4160_v30, %v4159_v29  ;;  %5848 = vmatprep.subr.bf16.mxu1 %v6026_v1 }
 0x439   : > { %5849 = vmatpush3.bf16.msra.mxu1 %v6006_v32 }
 0x43a   : > { %5850 = vmatprep.subr.bf16.mxu1 %v6026_v1 }
 0x43d   : > { %5851 = vmatpush3.bf16.msra.mxu1 %v6007_v34 }
 0x440   : > { %5853 = vmatmul.mubr.msk.bf16.vlgmr.msra.gmra.mrb[48].mxu1 %vm4205_vm4, %v4163_v31 }
 0x4fb   : > { %v4311_v33 = vpop.f32.mrb[44].mxu0 }
 0x4fc   : > { %v5842_v37 = vpop.f32.mrb[45].mxu0 }
 0x4fd   : > { %v4314_v38 = vpop.f32.mrb[46].mxu0 }
 0x4fe   : > { %v5843_v39 = vpop.f32.mrb[47].mxu0 }
 0x503   : > { %v4243_v40 = vpop.f32.mrb[44].mxu1 }
 0x504   : > { %v4312_v42 = vadd.f32 %v4311_v33, %v4243_v40  ;;  %v5830_v41 = vpop.f32.mrb[45].mxu1 }
 0x505   : > { %v4246_v43 = vpop.f32.mrb[46].mxu1 }
 0x506   : > { %v4315_v44 = vadd.f32 %v4314_v38, %v4246_v43  ;;  %v5831_v46 = vpop.f32.mrb[47].mxu1 }
 0x513   : > { %v4388_v13 = vpop.f32.mrb[48].mxu1 }
 0x514   : > { %v4395_v1 = vadd.f32 %v4388_v13, %v4312_v42  ;;  %v5854_v48 = vpop.f32.mrb[49].mxu1 }
 0x515   : > { %v4391_v49 = vpop.f32.mrb[50].mxu1 }
 0x516   : > { %v4404_v51 = vadd.f32 %v4890_v47, %v4395_v1  ;;  %v4396_v50 = vadd.f32 %v4391_v49, %v4315_v44  ;;  %v5855_v52 = vpop.f32.mrb[51].mxu1 }
 0x518   : > { %v4406_v54 = vsub.f32 0.0, %v4404_v51  ;;  %v4405_v56 = vadd.f32 %v4890_v47, %v4396_v50 }
 0x51a   : > { %v4408_v53 = vmul.f32 1.442695, %v4406_v54  ;;  %v4407_v45 = vsub.f32 0.0, %v4405_v56 }
 0x51c   : > { %6008 = vpow2.f32 %v4408_v53  ;;  %v4410_v57 = vmul.f32 1.442695, %v4407_v45 }
 0x51e   : > { %6010 = vpow2.f32 %v4410_v57 }
 0x526   : > { %v6009_v58 = vpop.eup %6008 }
 0x527   : > { %v4412_v59 = vadd.f32 1.0, %v6009_v58 }
 0x528   : > { %v6011_v60 = vpop.eup %6010 }
 0x529   : > { %6012 = vrcp.f32 %v4412_v59  ;;  %v4413_v61 = vadd.f32 1.0, %v6011_v60 }
 0x52b   : > { %6014 = vrcp.f32 %v4413_v61 }
 0x533   : > { %v6013_v63 = vpop.eup %6012 }
 0x534   : > { %4416 = vst [vmem:[%s278_s9] sm:$0xff] %v6013_v63 }
 0x535   : > { %v6015_v62 = vpop.eup %6014 }
 0x536   : > { %4417 = vst [vmem:[%s278_s9 + $0x8] sm:$0xff] %v6015_v62 }
 0x537 PF: > { %s17_s24 = sadd.s32 1, %s6024_s24  }
 0x538   : > { %p14_p5 = scmp.ge.s32.totalorder %s17_s24, 4  }
 0x53a   :  { %16 = sbr.rel (!%p14_p5) target bundleno = 1 (0x1), region = 104 }

</bundles_post_ra>
